<compile_context>
chip_gen: v6e
topology: v6e:2x2x1
jax: 0.10.0
libtpu: 0.0.40
codegen_flags: <defaults>
</compile_context>

<pallas_src>
import functools

import jax
import jax.numpy as jnp
from jax import lax
from jax.experimental import pallas as pl
from jax.experimental.pallas import tpu as pltpu

_EPS = 1e-5
_LANE = 128


def _attn_kernel(x_ref, l_ref, m_ref,
                 wqt_ref, wk_ref, bk_ref, wv_ref, bv_ref, wwt_ref,
                 o_ref, stats_ref,
                 qsum_s, qsq_s, gain_s, k_s, v_s, lbias_s, ocat_s, qcache_s,
                 *, num_heads, key_channels, value_channels, hw_total, cache_q):
    phase = pl.program_id(1)
    tile = pl.program_id(2)
    kh = key_channels // num_heads
    vh = value_channels // num_heads
    thw = x_ref.shape[0]                                       # static tile height

    # ---------------- per-batch init: q-stats + masked language-side k/v -------
    @pl.when((phase == 0) & (tile == 0))
    def _init_batch():
        qsum_s[...] = jnp.zeros_like(qsum_s)
        qsq_s[...] = jnp.zeros_like(qsq_s)
        lf = l_ref[...]                                        # (Cl, Nl_pad) bf16
        mask = m_ref[...]                                      # (1,  Nl_pad) f32
        k = jnp.dot(wk_ref[...], lf, preferred_element_type=jnp.float32) + bk_ref[...]
        v = jnp.dot(wv_ref[...], lf, preferred_element_type=jnp.float32) + bv_ref[...]
        k_s[...] = (k * mask).astype(k_s.dtype)                # (Kc, Nl_pad)
        v_s[...] = (v * mask).astype(v_s.dtype)                # (Vc, Nl_pad)

    # ---------------- phase 0: q conv per tile, stats, bf16 q cache -------------
    @pl.when(phase == 0)
    def _phase0():
        # bq is dropped: a per-channel constant cancels under affine-free InstanceNorm.
        q_un = jnp.dot(x_ref[...], wqt_ref[...],
                       preferred_element_type=jnp.float32)     # (thw, Kc)
        qsum_s[...] += jnp.sum(q_un, axis=0, keepdims=True)
        qsq_s[...] += jnp.sum(q_un * q_un, axis=0, keepdims=True)
        if cache_q:
            idx = pl.multiple_of(tile * thw, thw)
            qcache_s[pl.ds(idx, thw), :] = q_un.astype(qcache_s.dtype)

    # -------- transition: finalize q-norm, fold mean + mask bias per head -------
    @pl.when((phase == 1) & (tile == 0))
    def _transition():
        stats_ref[...] = jnp.zeros_like(stats_ref)
        inv_hw = 1.0 / float(hw_total)
        mean = qsum_s[...] * inv_hw                            # (1, Kc)
        var = jnp.maximum(qsq_s[...] * inv_hw - mean * mean, 0.0)
        gain = lax.rsqrt(var + _EPS) * (float(key_channels) ** -0.5)
        gain_s[...] = gain                                     # (1, Kc)
        mg = mean * gain                                       # (1, Kc)
        add_bias = 10000.0 * m_ref[...] - 10000.0              # (1, Nl_pad)
        k_all = k_s[...]                                       # (Kc, Nl_pad) bf16
        for h in range(num_heads):                             # once per batch, tiny
            bias_h = jnp.dot(mg[:, h * kh:(h + 1) * kh],
                             k_all[h * kh:(h + 1) * kh, :],
                             preferred_element_type=jnp.float32)   # (1, Nl_pad)
            lbias_s[h:h + 1, :] = add_bias - bias_h

    # ---------------- phase 1: attention + single output projection -------------
    @pl.when(phase == 1)
    def _phase1():
        if cache_q:
            idx = pl.multiple_of(tile * thw, thw)
            qt_f = qcache_s[pl.ds(idx, thw), :].astype(jnp.float32)
        else:
            qt_f = jnp.dot(x_ref[...], wqt_ref[...],
                           preferred_element_type=jnp.float32)
        qt = (qt_f * gain_s[...]).astype(jnp.bfloat16)         # (thw, Kc)

        k_all = k_s[...]                                       # (Kc, Nl_pad) bf16
        v_all = v_s[...]                                       # (Vc, Nl_pad) bf16
        lbias = lbias_s[...]                                   # (H,  Nl_pad) f32
        for h in range(num_heads):                             # static, small
            sim = jnp.dot(qt[:, h * kh:(h + 1) * kh],
                          k_all[h * kh:(h + 1) * kh, :],
                          preferred_element_type=jnp.float32)  # (thw, Nl_pad)
            sim = sim + lbias[h:h + 1, :]
            sim = sim - jnp.max(sim, axis=-1, keepdims=True)
            p = jnp.exp(sim)
            p = p * pl.reciprocal(jnp.sum(p, axis=-1, keepdims=True), approx=True)
            oh = lax.dot_general(p.astype(jnp.bfloat16),
                                 v_all[h * vh:(h + 1) * vh, :],
                                 (((1,), (1,)), ((), ())),
                                 preferred_element_type=jnp.float32)   # (thw, Vh)
            ocat_s[:, h * vh:(h + 1) * vh] = oh.astype(ocat_s.dtype)

        # Single full-Vc output projection (bw cancels under the final InstanceNorm).
        o_acc = jnp.dot(ocat_s[...], wwt_ref[...],
                        preferred_element_type=jnp.float32)    # (thw, Oc_pad)
        o_ref[...] = o_acc.astype(o_ref.dtype)
        stats_ref[0:1, :] += jnp.sum(o_acc, axis=0, keepdims=True)
        stats_ref[1:2, :] += jnp.sum(o_acc * o_acc, axis=0, keepdims=True)


def spatial_image_language_attention(x, l, l_mask, params, *, num_heads, t_hw=None):
    """x: (B, HW, v_in), l: (B, l_in, N_l), l_mask: (B, N_l, 1) -> (B, HW, out_c)."""
    B, HW, Cv = x.shape
    _, Cl, Nl = l.shape
    Kc = params["wq"].shape[0]
    Vc = params["wv"].shape[0]
    Oc = params["ww"].shape[0]
    assert Kc % num_heads == 0 and Vc % num_heads == 0

    # HW tile: largest multiple of 16 (<= 1024) dividing HW; fall back to full HW.
    if t_hw is None:
        t_hw = HW
        upper = min(1024, (HW // 16) * 16)
        for cand in range(upper, 15, -16):
            if HW % cand == 0:
                t_hw = cand
                break
    assert HW % t_hw == 0, "t_hw must divide HW"
    n_t = HW // t_hw

    # Pad language length and output channels to full 128-lane tiles (exact padding).
    Nl_pad = max(_LANE, -(-Nl // _LANE) * _LANE)
    Oc_pad = max(_LANE, -(-Oc // _LANE) * _LANE)
    mask = jnp.transpose(l_mask, (0, 2, 1)).astype(jnp.float32)          # (B, 1, Nl)
    if Nl_pad != Nl:
        l = jnp.pad(l, ((0, 0), (0, 0), (0, Nl_pad - Nl)))
        mask = jnp.pad(mask, ((0, 0), (0, 0), (0, Nl_pad - Nl)))

    # bf16 MXU operands; accumulation / statistics stay f32 inside the kernel.
    x_b = x.astype(jnp.bfloat16)
    l_b = l.astype(jnp.bfloat16)
    wqt = jnp.transpose(params["wq"]).astype(jnp.bfloat16)               # (Cv, Kc)
    wk = params["wk"].astype(jnp.bfloat16)                               # (Kc, Cl)
    wv = params["wv"].astype(jnp.bfloat16)                               # (Vc, Cl)
    wwt = jnp.transpose(params["ww"]).astype(jnp.bfloat16)               # (Vc, Oc)
    if Oc_pad != Oc:
        wwt = jnp.pad(wwt, ((0, 0), (0, Oc_pad - Oc)))
    bk = jnp.reshape(params["bk"], (Kc, 1)).astype(jnp.float32)
    bv = jnp.reshape(params["bv"], (Vc, 1)).astype(jnp.float32)
    # params["bq"] / params["bw"] are intentionally unused: per-channel constants
    # cancel exactly under the affine-free InstanceNorm1d layers.

    # ---- per-generation VMEM budget (v7x: 64 MiB physical, v5e/v6e: 128 MiB) ----
    try:
        info = pltpu.get_tpu_info()
        phys_vmem = int(getattr(info, "vmem_capacity_bytes", 128 * 1024 * 1024))
    except Exception:
        phys_vmem = 128 * 1024 * 1024
    budget = min(phys_vmem * 3 // 4, 100 * 1024 * 1024)

    weights_b = (Cv * Kc + Kc * Cl + Vc * Cl + Vc * Oc_pad) * 2 + (Kc + Vc) * 4
    lang_b = Cl * Nl_pad * 2 + Nl_pad * 4
    scratch_b = ((Kc + Vc) * Nl_pad * 2 + num_heads * Nl_pad * 4
                 + 3 * Kc * 4 + t_hw * Vc * 2)
    stream_b = 2 * t_hw * Cv * 2 + 2 * t_hw * Oc_pad * 2 + 2 * 2 * Oc_pad * 4
    tmp_b = (num_heads + 2) * t_hw * Nl_pad * 4 + t_hw * (Kc + Vc + Oc_pad) * 4
    base_est = 2 * weights_b + 2 * lang_b + scratch_b + stream_b + tmp_b
    qcache_b = HW * Kc * 2
    cache_q = (base_est + qcache_b) <= int(0.7 * budget)
    cache_q = cache_q and (n_t == 1 or t_hw % 16 == 0)   # aligned bf16 cache stores
    vmem_est = base_est + (qcache_b if cache_q else 0)
    vmem_limit = int(min(budget, max(32 * 1024 * 1024, 2 * vmem_est)))

    kernel = functools.partial(_attn_kernel, num_heads=num_heads, key_channels=Kc,
                               value_channels=Vc, hw_total=HW, cache_q=cache_q)

    flops = int(B * ((1 if cache_q else 2) * 2 * HW * Cv * Kc      # q conv
                     + 2 * Cl * Nl_pad * (Kc + Vc)                 # k / v convs
                     + 2 * HW * Nl_pad * (Kc + Vc)                 # q@k^T and p@v
                     + 2 * HW * Vc * Oc_pad))                      # output projection
    transc = int(B * HW * num_heads * Nl_pad)
    bytes_acc = int((1 if cache_q else 2) * x_b.size * 2 + l_b.size * 2 + mask.size * 4
                    + (wqt.size + wk.size + wv.size + wwt.size) * 2
                    + (bk.size + bv.size) * 4
                    + B * HW * Oc_pad * 2 + B * 2 * Oc_pad * 4)

    if cache_q:
        # Phase 1 does not read x: park its index on block 0 so x streams once/batch.
        x_map = lambda b, p, t: (b, (1 - p) * t, 0)
    else:
        x_map = lambda b, p, t: (b, t, 0)

    def build(single_buffer):
        def cspec(shape, index_map):
            # Grid-invariant operands: single-buffer to halve their VMEM footprint.
            if single_buffer and hasattr(pl, "Buffered"):
                return pl.BlockSpec(shape, index_map, pipeline_mode=pl.Buffered(1))
            return pl.BlockSpec(shape, index_map)

        scratch = [
            pltpu.VMEM((1, Kc), jnp.float32),                  # sum q
            pltpu.VMEM((1, Kc), jnp.float32),                  # sum q^2
            pltpu.VMEM((1, Kc), jnp.float32),                  # folded gain
            pltpu.VMEM((Kc, Nl_pad), jnp.bfloat16),            # masked key (per batch)
            pltpu.VMEM((Vc, Nl_pad), jnp.bfloat16),            # masked value (per batch)
            pltpu.VMEM((num_heads, Nl_pad), jnp.float32),      # per-head logit bias
            pltpu.VMEM((t_hw, Vc), jnp.bfloat16),              # per-tile head concat
            pltpu.VMEM((HW, Kc) if cache_q else (16, 128), jnp.bfloat16),  # q cache
        ]
        return pl.pallas_call(
            kernel,
            out_shape=(jax.ShapeDtypeStruct((B, HW, Oc_pad), jnp.bfloat16),
                       jax.ShapeDtypeStruct((B, 2, Oc_pad), jnp.float32)),
            grid_spec=pltpu.PrefetchScalarGridSpec(
                num_scalar_prefetch=0,
                grid=(B, 2, n_t),                              # (batch, phase, HW tile)
                in_specs=[
                    pl.BlockSpec((None, t_hw, Cv), x_map),                  # x
                    cspec((None, Cl, Nl_pad), lambda b, p, t: (b, 0, 0)),   # l
                    cspec((None, 1, Nl_pad), lambda b, p, t: (b, 0, 0)),    # mask
                    cspec((Cv, Kc), lambda b, p, t: (0, 0)),                # wq^T
                    cspec((Kc, Cl), lambda b, p, t: (0, 0)),                # wk
                    cspec((Kc, 1), lambda b, p, t: (0, 0)),                 # bk
                    cspec((Vc, Cl), lambda b, p, t: (0, 0)),                # wv
                    cspec((Vc, 1), lambda b, p, t: (0, 0)),                 # bv
                    cspec((Vc, Oc_pad), lambda b, p, t: (0, 0)),            # ww^T
                ],
                out_specs=(
                    # Phase 0 never writes; its steps alias block 0 so every output
                    # block is flushed exactly once, right after phase 1 fills it.
                    pl.BlockSpec((None, t_hw, Oc_pad), lambda b, p, t: (b, p * t, 0)),
                    pl.BlockSpec((None, 2, Oc_pad), lambda b, p, t: (b, 0, 0)),
                ),
                scratch_shapes=scratch,
            ),
            compiler_params=pltpu.CompilerParams(
                dimension_semantics=("parallel", "arbitrary", "arbitrary"),
                vmem_limit_bytes=vmem_limit),
            cost_estimate=pl.CostEstimate(flops=flops, transcendentals=transc,
                                          bytes_accessed=bytes_acc),
        )

    args = (x_b, l_b, mask, wqt, wk, bk, wv, bv, wwt)
    try:
        o_un, stats = build(True)(*args)
    except Exception:
        # Fallback if this JAX build rejects pipeline_mode=pl.Buffered(1).
        o_un, stats = build(False)(*args)

    # Final InstanceNorm of the output: tiny XLA epilogue on in-kernel statistics.
    mean = stats[:, 0:1, :] / HW
    var = jnp.maximum(stats[:, 1:2, :] / HW - mean * mean, 0.0)
    out = (o_un.astype(jnp.float32) - mean) * lax.rsqrt(var + _EPS)
    return out[:, :, :Oc]


def reference_forward(x, l, l_mask, params, *, num_heads):
    """Pure-JAX (f32) mirror of the PyTorch forward, for correctness checking."""
    B, HW, _ = x.shape
    Kc = params["wq"].shape[0]
    Vc = params["wv"].shape[0]
    xt = jnp.transpose(x, (0, 2, 1))                       # (B, Cv, HW)
    mask = jnp.transpose(l_mask, (0, 2, 1))                # (B, 1, Nl)

    q = jnp.einsum("oc,bch->boh", params["wq"], xt) + params["bq"].T[None]   # (B,Kc,HW)
    mean = q.mean(-1, keepdims=True)
    var = ((q - mean) ** 2).mean(-1, keepdims=True)
    q = (q - mean) / jnp.sqrt(var + _EPS)
    q = jnp.transpose(q, (0, 2, 1))                        # (B,HW,Kc)

    k = jnp.einsum("oc,bcn->bon", params["wk"], l) + params["bk"].T[None]
    v = jnp.einsum("oc,bcn->bon", params["wv"], l) + params["bv"].T[None]
    k = k * mask
    v = v * mask
    Nl = v.shape[-1]

    q = q.reshape(B, HW, num_heads, Kc // num_heads).transpose(0, 2, 1, 3)
    k = k.reshape(B, num_heads, Kc // num_heads, Nl)
    v = v.reshape(B, num_heads, Vc // num_heads, Nl)
    m4 = mask[:, None]                                     # (B,1,1,Nl)

    sim = jnp.einsum("bhqd,bhdn->bhqn", q, k) * (Kc ** -0.5)
    sim = sim + (10000.0 * m4 - 10000.0)
    sim = jax.nn.softmax(sim, axis=-1)
    out = jnp.einsum("bhqn,bhvn->bhqv", sim, v)
    out = out.transpose(0, 2, 1, 3).reshape(B, HW, Vc)

    o = jnp.einsum("bhc,oc->bho", out, params["ww"]) + params["bw"][None]    # (B,HW,Oc)
    mean = o.mean(axis=1, keepdims=True)
    var = ((o - mean) ** 2).mean(axis=1, keepdims=True)
    o = (o - mean) / jnp.sqrt(var + _EPS)
    return o


def init_params(key, v_in, l_in, key_c, value_c, out_c):
    ks = jax.random.split(key, 8)
    s = 0.1
    return {
        "wq": s * jax.random.normal(ks[0], (key_c, v_in), jnp.float32),
        "bq": s * jax.random.normal(ks[1], (1, key_c), jnp.float32),
        "wk": s * jax.random.normal(ks[2], (key_c, l_in), jnp.float32),
        "bk": s * jax.random.normal(ks[3], (1, key_c), jnp.float32),
        "wv": s * jax.random.normal(ks[4], (value_c, l_in), jnp.float32),
        "bv": s * jax.random.normal(ks[5], (1, value_c), jnp.float32),
        "ww": s * jax.random.normal(ks[6], (out_c, value_c), jnp.float32),
        "bw": s * jax.random.normal(ks[7], (1, out_c), jnp.float32),
    }


if __name__ == "__main__":
    B = 2
    H = W = 16
    HW = H * W                      # 256 spatial positions
    Nl = 8                          # padded to 128 inside the wrapper
    v_in = l_in = 16
    key_c = value_c = 16
    num_heads = 2
    out_c = value_c                 # out_channels=None -> value_channels

    root = jax.random.PRNGKey(0)
    k_x, k_l, k_p = jax.random.split(root, 3)

    x = jax.random.normal(k_x, (B, HW, v_in), jnp.float32)
    l = jax.random.normal(k_l, (B, l_in, Nl), jnp.float32)
    lengths = jnp.array([6, 8])
    l_mask = (jnp.arange(Nl)[None, :, None] < lengths[:, None, None]).astype(jnp.float32)
    params = init_params(k_p, v_in, l_in, key_c, value_c, out_c)

    # Round test data / weights to bf16-representable values so the comparison with the
    # f32 reference only measures in-kernel (intermediate) rounding, not input casts.
    snap = lambda a: a.astype(jnp.bfloat16).astype(jnp.float32)
    x, l = snap(x), snap(l)
    params = jax.tree_util.tree_map(snap, params)

    out = spatial_image_language_attention(x, l, l_mask, params,
                                           num_heads=num_heads, t_hw=128)
    out = jax.block_until_ready(out)

    ref = reference_forward(x, l, l_mask, params, num_heads=num_heads)
    assert out.shape == (B, HW, out_c)
    rel_err = jnp.linalg.norm(out - ref) / (jnp.linalg.norm(ref) + 1e-12)
    assert float(rel_err) < 5e-2, f"mismatch vs JAX reference: rel_err={float(rel_err)}"

    print("KERNEL_OK")
</pallas_src>

<mosaic_0001>
module attributes {stable_mosaic.version = 11 : i64} {
  func.func @_attn_kernel(%arg0: i32, %arg1: i32, %arg2: i32, %arg3: memref<1x128x16xbf16, #tpu.memory_space<vmem>>, %arg4: memref<1x16x128xbf16, #tpu.memory_space<vmem>>, %arg5: memref<1x1x128xf32, #tpu.memory_space<vmem>>, %arg6: memref<16x16xbf16, #tpu.memory_space<vmem>>, %arg7: memref<16x16xbf16, #tpu.memory_space<vmem>>, %arg8: memref<16x1xf32, #tpu.memory_space<vmem>>, %arg9: memref<16x16xbf16, #tpu.memory_space<vmem>>, %arg10: memref<16x1xf32, #tpu.memory_space<vmem>>, %arg11: memref<16x128xbf16, #tpu.memory_space<vmem>>, %arg12: memref<1x128x128xbf16, #tpu.memory_space<vmem>>, %arg13: memref<1x2x128xf32, #tpu.memory_space<vmem>>, %arg14: memref<1x16xf32, #tpu.memory_space<vmem>>, %arg15: memref<1x16xf32, #tpu.memory_space<vmem>>, %arg16: memref<1x16xf32, #tpu.memory_space<vmem>>, %arg17: memref<16x128xbf16, #tpu.memory_space<vmem>>, %arg18: memref<16x128xbf16, #tpu.memory_space<vmem>>, %arg19: memref<2x128xf32, #tpu.memory_space<vmem>>, %arg20: memref<128x16xbf16, #tpu.memory_space<vmem>>, %arg21: memref<256x16xbf16, #tpu.memory_space<vmem>>) attributes {dimension_semantics = [#tpu.dimension_semantics<parallel>, #tpu.dimension_semantics<arbitrary>, #tpu.dimension_semantics<arbitrary>], iteration_bounds = array<i64: 2, 2, 2>, scalar_prefetch = 0 : i64, scratch_operands = 8 : i64, tpu.core_type = #tpu.core_type<tc>, window_params = [{transform_indices = @transform_0, window_bounds = array<i64: 1, 128, 16>}, {pipeline_mode = #tpu.pipeline_mode<synchronous>, transform_indices = @transform_1, window_bounds = array<i64: 1, 16, 128>}, {pipeline_mode = #tpu.pipeline_mode<synchronous>, transform_indices = @transform_2, window_bounds = array<i64: 1, 1, 128>}, {pipeline_mode = #tpu.pipeline_mode<synchronous>, transform_indices = @transform_3, window_bounds = array<i64: 16, 16>}, {pipeline_mode = #tpu.pipeline_mode<synchronous>, transform_indices = @transform_4, window_bounds = array<i64: 16, 16>}, {pipeline_mode = #tpu.pipeline_mode<synchronous>, transform_indices = @transform_5, window_bounds = array<i64: 16, 1>}, {pipeline_mode = #tpu.pipeline_mode<synchronous>, transform_indices = @transform_6, window_bounds = array<i64: 16, 16>}, {pipeline_mode = #tpu.pipeline_mode<synchronous>, transform_indices = @transform_7, window_bounds = array<i64: 16, 1>}, {pipeline_mode = #tpu.pipeline_mode<synchronous>, transform_indices = @transform_8, window_bounds = array<i64: 16, 128>}, {transform_indices = @transform_9, window_bounds = array<i64: 1, 128, 128>}, {transform_indices = @transform_10, window_bounds = array<i64: 1, 2, 128>}]} {
    %c0_i32 = arith.constant 0 : i32
    %0 = arith.cmpi eq, %arg1, %c0_i32 : i32
    %c0_i32_0 = arith.constant 0 : i32
    %1 = arith.cmpi eq, %arg2, %c0_i32_0 : i32
    %2 = arith.andi %0, %1 : i1
    %3 = arith.extui %2 : i1 to i32
    %c0_i32_1 = arith.constant 0 : i32
    %4 = arith.cmpi ne, %3, %c0_i32_1 : i32
    scf.if %4 {
      %cst = arith.constant 0.000000e+00 : f32
      %16 = vector.broadcast %cst : f32 to vector<1x16xf32>
      %c0 = arith.constant 0 : index
      %c0_8 = arith.constant 0 : index
      %17 = vector.load %arg14[%c0, %c0_8] : memref<1x16xf32, #tpu.memory_space<vmem>>, vector<1x16xf32>
      tpu.vector_store %arg14[%c0, %c0_8], %16 {strides = array<i32>} : memref<1x16xf32, #tpu.memory_space<vmem>>, vector<1x16xf32>,
      %cst_9 = arith.constant 0.000000e+00 : f32
      %18 = vector.broadcast %cst_9 : f32 to vector<1x16xf32>
      %c0_10 = arith.constant 0 : index
      %c0_11 = arith.constant 0 : index
      %19 = vector.load %arg15[%c0_10, %c0_11] : memref<1x16xf32, #tpu.memory_space<vmem>>, vector<1x16xf32>
      tpu.vector_store %arg15[%c0_10, %c0_11], %18 {strides = array<i32>} : memref<1x16xf32, #tpu.memory_space<vmem>>, vector<1x16xf32>,
      %c0_12 = arith.constant 0 : index
      %c0_13 = arith.constant 0 : index
      %c0_14 = arith.constant 0 : index
      %20 = vector.load %arg4[%c0_12, %c0_13, %c0_14] : memref<1x16x128xbf16, #tpu.memory_space<vmem>>, vector<1x16x128xbf16>
      %21 = vector.shape_cast %20 : vector<1x16x128xbf16> to vector<16x128xbf16>
      %c0_15 = arith.constant 0 : index
      %c0_16 = arith.constant 0 : index
      %c0_17 = arith.constant 0 : index
      %22 = vector.load %arg5[%c0_15, %c0_16, %c0_17] : memref<1x1x128xf32, #tpu.memory_space<vmem>>, vector<1x1x128xf32>
      %23 = vector.shape_cast %22 : vector<1x1x128xf32> to vector<1x128xf32>
      %c0_18 = arith.constant 0 : index
      %c0_19 = arith.constant 0 : index
      %24 = vector.load %arg7[%c0_18, %c0_19] : memref<16x16xbf16, #tpu.memory_space<vmem>>, vector<16x16xbf16>
      %cst_20 = arith.constant dense<0.000000e+00> : vector<16x128xf32>
      %25 = tpu.matmul %24, %21, %cst_20 {dimension_numbers = #tpu.dot_dimension_numbers<[1], [0], [0], [1], [0, 0, 1, 1], [], []>} : vector<16x16xbf16>, vector<16x128xbf16>, vector<16x128xf32> -> vector<16x128xf32>
      %c0_21 = arith.constant 0 : index
      %c0_22 = arith.constant 0 : index
      %26 = vector.load %arg8[%c0_21, %c0_22] : memref<16x1xf32, #tpu.memory_space<vmem>>, vector<16x1xf32>
      %27 = vector.broadcast %26 : vector<16x1xf32> to vector<16x128xf32>
      %28 = arith.addf %25, %27 : vector<16x128xf32>
      %c0_23 = arith.constant 0 : index
      %c0_24 = arith.constant 0 : index
      %29 = vector.load %arg9[%c0_23, %c0_24] : memref<16x16xbf16, #tpu.memory_space<vmem>>, vector<16x16xbf16>
      %cst_25 = arith.constant dense<0.000000e+00> : vector<16x128xf32>
      %30 = tpu.matmul %29, %21, %cst_25 {dimension_numbers = #tpu.dot_dimension_numbers<[1], [0], [0], [1], [0, 0, 1, 1], [], []>} : vector<16x16xbf16>, vector<16x128xbf16>, vector<16x128xf32> -> vector<16x128xf32>
      %c0_26 = arith.constant 0 : index
      %c0_27 = arith.constant 0 : index
      %31 = vector.load %arg10[%c0_26, %c0_27] : memref<16x1xf32, #tpu.memory_space<vmem>>, vector<16x1xf32>
      %32 = vector.broadcast %31 : vector<16x1xf32> to vector<16x128xf32>
      %33 = arith.addf %30, %32 : vector<16x128xf32>
      %34 = vector.broadcast %23 : vector<1x128xf32> to vector<16x128xf32>
      %35 = arith.mulf %28, %34 : vector<16x128xf32>
      %36 = arith.truncf %35 : vector<16x128xf32> to vector<16x128xbf16>
      %c0_28 = arith.constant 0 : index
      %c0_29 = arith.constant 0 : index
      %37 = vector.load %arg17[%c0_28, %c0_29] : memref<16x128xbf16, #tpu.memory_space<vmem>>, vector<16x128xbf16>
      tpu.vector_store %arg17[%c0_28, %c0_29], %36 {strides = array<i32>} : memref<16x128xbf16, #tpu.memory_space<vmem>>, vector<16x128xbf16>,
      %38 = vector.broadcast %23 : vector<1x128xf32> to vector<16x128xf32>
      %39 = arith.mulf %33, %38 : vector<16x128xf32>
      %40 = arith.truncf %39 : vector<16x128xf32> to vector<16x128xbf16>
      %c0_30 = arith.constant 0 : index
      %c0_31 = arith.constant 0 : index
      %41 = vector.load %arg18[%c0_30, %c0_31] : memref<16x128xbf16, #tpu.memory_space<vmem>>, vector<16x128xbf16>
      tpu.vector_store %arg18[%c0_30, %c0_31], %40 {strides = array<i32>} : memref<16x128xbf16, #tpu.memory_space<vmem>>, vector<16x128xbf16>,
    } else {
    }
    %c0_i32_2 = arith.constant 0 : i32
    %5 = arith.cmpi eq, %arg1, %c0_i32_2 : i32
    %6 = arith.extui %5 : i1 to i32
    %c0_i32_3 = arith.constant 0 : i32
    %7 = arith.cmpi ne, %6, %c0_i32_3 : i32
    scf.if %7 {
      %c0 = arith.constant 0 : index
      %c0_8 = arith.constant 0 : index
      %c0_9 = arith.constant 0 : index
      %16 = vector.load %arg3[%c0, %c0_8, %c0_9] : memref<1x128x16xbf16, #tpu.memory_space<vmem>>, vector<1x128x16xbf16>
      %17 = vector.shape_cast %16 : vector<1x128x16xbf16> to vector<128x16xbf16>
      %c0_10 = arith.constant 0 : index
      %c0_11 = arith.constant 0 : index
      %18 = vector.load %arg6[%c0_10, %c0_11] : memref<16x16xbf16, #tpu.memory_space<vmem>>, vector<16x16xbf16>
      %cst = arith.constant dense<0.000000e+00> : vector<128x16xf32>
      %19 = tpu.matmul %17, %18, %cst {dimension_numbers = #tpu.dot_dimension_numbers<[1], [0], [0], [1], [0, 0, 1, 1], [], []>} : vector<128x16xbf16>, vector<16x16xbf16>, vector<128x16xf32> -> vector<128x16xf32>
      %c0_12 = arith.constant 0 : index
      %c0_13 = arith.constant 0 : index
      %20 = vector.load %arg14[%c0_12, %c0_13] : memref<1x16xf32, #tpu.memory_space<vmem>>, vector<1x16xf32>
      %cst_14 = arith.constant dense<0.000000e+00> : vector<16xf32>
      %21 = vector.multi_reduction <add>, %19, %cst_14 [0] : vector<128x16xf32> to vector<16xf32>
      %22 = vector.shape_cast %21 : vector<16xf32> to vector<1x16xf32>
      %23 = arith.addf %20, %22 : vector<1x16xf32>
      %c0_15 = arith.constant 0 : index
      %c0_16 = arith.constant 0 : index
      %24 = vector.load %arg14[%c0_15, %c0_16] : memref<1x16xf32, #tpu.memory_space<vmem>>, vector<1x16xf32>
      tpu.vector_store %arg14[%c0_15, %c0_16], %23 {strides = array<i32>} : memref<1x16xf32, #tpu.memory_space<vmem>>, vector<1x16xf32>,
      %c0_17 = arith.constant 0 : index
      %c0_18 = arith.constant 0 : index
      %25 = vector.load %arg15[%c0_17, %c0_18] : memref<1x16xf32, #tpu.memory_space<vmem>>, vector<1x16xf32>
      %26 = arith.mulf %19, %19 : vector<128x16xf32>
      %cst_19 = arith.constant dense<0.000000e+00> : vector<16xf32>
      %27 = vector.multi_reduction <add>, %26, %cst_19 [0] : vector<128x16xf32> to vector<16xf32>
      %28 = vector.shape_cast %27 : vector<16xf32> to vector<1x16xf32>
      %29 = arith.addf %25, %28 : vector<1x16xf32>
      %c0_20 = arith.constant 0 : index
      %c0_21 = arith.constant 0 : index
      %30 = vector.load %arg15[%c0_20, %c0_21] : memref<1x16xf32, #tpu.memory_space<vmem>>, vector<1x16xf32>
      tpu.vector_store %arg15[%c0_20, %c0_21], %29 {strides = array<i32>} : memref<1x16xf32, #tpu.memory_space<vmem>>, vector<1x16xf32>,
      %c128_i32 = arith.constant 128 : i32
      %31 = arith.muli %arg2, %c128_i32 : i32
      %32 = tpu.assume_multiple %31, 128 : i32
      %33 = arith.truncf %19 : vector<128x16xf32> to vector<128x16xbf16>
      %34 = arith.index_cast %32 : i32 to index
      %c0_22 = arith.constant 0 : index
      %35 = vector.load %arg21[%34, %c0_22] : memref<256x16xbf16, #tpu.memory_space<vmem>>, vector<128x16xbf16>
      tpu.vector_store %arg21[%34, %c0_22], %33 {strides = array<i32>} : memref<256x16xbf16, #tpu.memory_space<vmem>>, vector<128x16xbf16>,
    } else {
    }
    %c1_i32 = arith.constant 1 : i32
    %8 = arith.cmpi eq, %arg1, %c1_i32 : i32
    %c0_i32_4 = arith.constant 0 : i32
    %9 = arith.cmpi eq, %arg2, %c0_i32_4 : i32
    %10 = arith.andi %8, %9 : i1
    %11 = arith.extui %10 : i1 to i32
    %c0_i32_5 = arith.constant 0 : i32
    %12 = arith.cmpi ne, %11, %c0_i32_5 : i32
    scf.if %12 {
      %cst = arith.constant 0.000000e+00 : f32
      %16 = vector.broadcast %cst : f32 to vector<2x128xf32>
      %c0 = arith.constant 0 : index
      %c0_8 = arith.constant 0 : index
      %c0_9 = arith.constant 0 : index
      %17 = vector.load %arg13[%c0, %c0_8, %c0_9] : memref<1x2x128xf32, #tpu.memory_space<vmem>>, vector<1x2x128xf32>
      %18 = vector.shape_cast %17 : vector<1x2x128xf32> to vector<2x128xf32>
      %19 = vector.shape_cast %16 : vector<2x128xf32> to vector<1x2x128xf32>
      tpu.vector_store %arg13[%c0, %c0_8, %c0_9], %19 {strides = array<i32>} : memref<1x2x128xf32, #tpu.memory_space<vmem>>, vector<1x2x128xf32>,
      %c0_10 = arith.constant 0 : index
      %c0_11 = arith.constant 0 : index
      %20 = vector.load %arg14[%c0_10, %c0_11] : memref<1x16xf32, #tpu.memory_space<vmem>>, vector<1x16xf32>
      %cst_12 = arith.constant 3.906250e-03 : f32
      %21 = vector.broadcast %cst_12 : f32 to vector<1x16xf32>
      %22 = arith.mulf %20, %21 : vector<1x16xf32>
      %c0_13 = arith.constant 0 : index
      %c0_14 = arith.constant 0 : index
      %23 = vector.load %arg15[%c0_13, %c0_14] : memref<1x16xf32, #tpu.memory_space<vmem>>, vector<1x16xf32>
      %cst_15 = arith.constant 3.906250e-03 : f32
      %24 = vector.broadcast %cst_15 : f32 to vector<1x16xf32>
      %25 = arith.mulf %23, %24 : vector<1x16xf32>
      %26 = arith.mulf %22, %22 : vector<1x16xf32>
      %27 = arith.subf %25, %26 : vector<1x16xf32>
      %cst_16 = arith.constant 0.000000e+00 : f32
      %28 = vector.broadcast %cst_16 : f32 to vector<1x16xf32>
      %29 = arith.maximumf %27, %28 : vector<1x16xf32>
      %cst_17 = arith.constant 9.99999974E-6 : f32
      %30 = vector.broadcast %cst_17 : f32 to vector<1x16xf32>
      %31 = arith.addf %29, %30 : vector<1x16xf32>
      %32 = math.rsqrt %31 : vector<1x16xf32>
      %cst_18 = arith.constant 2.500000e-01 : f32
      %33 = vector.broadcast %cst_18 : f32 to vector<1x16xf32>
      %34 = arith.mulf %32, %33 : vector<1x16xf32>
      %c0_19 = arith.constant 0 : index
      %c0_20 = arith.constant 0 : index
      %35 = vector.load %arg16[%c0_19, %c0_20] : memref<1x16xf32, #tpu.memory_space<vmem>>, vector<1x16xf32>
      tpu.vector_store %arg16[%c0_19, %c0_20], %34 {strides = array<i32>} : memref<1x16xf32, #tpu.memory_space<vmem>>, vector<1x16xf32>,
      %36 = arith.mulf %22, %34 : vector<1x16xf32>
      %c0_21 = arith.constant 0 : index
      %c0_22 = arith.constant 0 : index
      %c0_23 = arith.constant 0 : index
      %37 = vector.load %arg5[%c0_21, %c0_22, %c0_23] : memref<1x1x128xf32, #tpu.memory_space<vmem>>, vector<1x1x128xf32>
      %38 = vector.shape_cast %37 : vector<1x1x128xf32> to vector<1x128xf32>
      %cst_24 = arith.constant 1.000000e+04 : f32
      %39 = vector.broadcast %cst_24 : f32 to vector<1x128xf32>
      %40 = arith.mulf %39, %38 : vector<1x128xf32>
      %cst_25 = arith.constant 1.000000e+04 : f32
      %41 = vector.broadcast %cst_25 : f32 to vector<1x128xf32>
      %42 = arith.subf %40, %41 : vector<1x128xf32>
      %c0_26 = arith.constant 0 : index
      %c0_27 = arith.constant 0 : index
      %43 = vector.load %arg17[%c0_26, %c0_27] : memref<16x128xbf16, #tpu.memory_space<vmem>>, vector<16x128xbf16>
      %44 = vector.extract_strided_slice %36 {offsets = [0, 0], sizes = [1, 8], strides = [1, 1]} : vector<1x16xf32> to vector<1x8xf32>
      %45 = vector.extract_strided_slice %43 {offsets = [0, 0], sizes = [8, 128], strides = [1, 1]} : vector<16x128xbf16> to vector<8x128xbf16>
      %cst_28 = arith.constant dense<0.000000e+00> : vector<1x128xf32>
      %46 = tpu.matmul %44, %45, %cst_28 {dimension_numbers = #tpu.dot_dimension_numbers<[1], [0], [0], [1], [0, 0, 1, 1], [], []>} : vector<1x8xf32>, vector<8x128xbf16>, vector<1x128xf32> -> vector<1x128xf32>
      %47 = arith.subf %42, %46 : vector<1x128xf32>
      %c0_29 = arith.constant 0 : index
      %c0_30 = arith.constant 0 : index
      %48 = vector.load %arg19[%c0_29, %c0_30] : memref<2x128xf32, #tpu.memory_space<vmem>>, vector<1x128xf32>
      tpu.vector_store %arg19[%c0_29, %c0_30], %47 {strides = array<i32>} : memref<2x128xf32, #tpu.memory_space<vmem>>, vector<1x128xf32>,
      %49 = vector.extract_strided_slice %36 {offsets = [0, 8], sizes = [1, 8], strides = [1, 1]} : vector<1x16xf32> to vector<1x8xf32>
      %50 = vector.extract_strided_slice %43 {offsets = [8, 0], sizes = [8, 128], strides = [1, 1]} : vector<16x128xbf16> to vector<8x128xbf16>
      %cst_31 = arith.constant dense<0.000000e+00> : vector<1x128xf32>
      %51 = tpu.matmul %49, %50, %cst_31 {dimension_numbers = #tpu.dot_dimension_numbers<[1], [0], [0], [1], [0, 0, 1, 1], [], []>} : vector<1x8xf32>, vector<8x128xbf16>, vector<1x128xf32> -> vector<1x128xf32>
      %52 = arith.subf %42, %51 : vector<1x128xf32>
      %c1 = arith.constant 1 : index
      %c0_32 = arith.constant 0 : index
      %53 = vector.load %arg19[%c1, %c0_32] : memref<2x128xf32, #tpu.memory_space<vmem>>, vector<1x128xf32>
      tpu.vector_store %arg19[%c1, %c0_32], %52 {strides = array<i32>} : memref<2x128xf32, #tpu.memory_space<vmem>>, vector<1x128xf32>,
    } else {
    }
    %c1_i32_6 = arith.constant 1 : i32
    %13 = arith.cmpi eq, %arg1, %c1_i32_6 : i32
    %14 = arith.extui %13 : i1 to i32
    %c0_i32_7 = arith.constant 0 : i32
    %15 = arith.cmpi ne, %14, %c0_i32_7 : i32
    scf.if %15 {
      %c128_i32 = arith.constant 128 : i32
      %16 = arith.muli %arg2, %c128_i32 : i32
      %17 = tpu.assume_multiple %16, 128 : i32
      %18 = arith.index_cast %17 : i32 to index
      %c0 = arith.constant 0 : index
      %19 = vector.load %arg21[%18, %c0] : memref<256x16xbf16, #tpu.memory_space<vmem>>, vector<128x16xbf16>
      %20 = arith.extf %19 : vector<128x16xbf16> to vector<128x16xf32>
      %c0_8 = arith.constant 0 : index
      %c0_9 = arith.constant 0 : index
      %21 = vector.load %arg16[%c0_8, %c0_9] : memref<1x16xf32, #tpu.memory_space<vmem>>, vector<1x16xf32>
      %22 = vector.broadcast %21 : vector<1x16xf32> to vector<128x16xf32>
      %23 = arith.mulf %20, %22 : vector<128x16xf32>
      %24 = arith.truncf %23 : vector<128x16xf32> to vector<128x16xbf16>
      %c0_10 = arith.constant 0 : index
      %c0_11 = arith.constant 0 : index
      %25 = vector.load %arg17[%c0_10, %c0_11] : memref<16x128xbf16, #tpu.memory_space<vmem>>, vector<16x128xbf16>
      %c0_12 = arith.constant 0 : index
      %c0_13 = arith.constant 0 : index
      %26 = vector.load %arg18[%c0_12, %c0_13] : memref<16x128xbf16, #tpu.memory_space<vmem>>, vector<16x128xbf16>
      %c0_14 = arith.constant 0 : index
      %c0_15 = arith.constant 0 : index
      %27 = vector.load %arg19[%c0_14, %c0_15] : memref<2x128xf32, #tpu.memory_space<vmem>>, vector<2x128xf32>
      %28 = vector.extract_strided_slice %24 {offsets = [0, 0], sizes = [128, 8], strides = [1, 1]} : vector<128x16xbf16> to vector<128x8xbf16>
      %29 = vector.extract_strided_slice %25 {offsets = [0, 0], sizes = [8, 128], strides = [1, 1]} : vector<16x128xbf16> to vector<8x128xbf16>
      %cst = arith.constant dense<0.000000e+00> : vector<128x128xf32>
      %30 = tpu.matmul %28, %29, %cst {dimension_numbers = #tpu.dot_dimension_numbers<[1], [0], [0], [1], [0, 0, 1, 1], [], []>} : vector<128x8xbf16>, vector<8x128xbf16>, vector<128x128xf32> -> vector<128x128xf32>
      %31 = vector.extract_strided_slice %27 {offsets = [0, 0], sizes = [1, 128], strides = [1, 1]} : vector<2x128xf32> to vector<1x128xf32>
      %32 = vector.broadcast %31 : vector<1x128xf32> to vector<128x128xf32>
      %33 = arith.addf %30, %32 : vector<128x128xf32>
      %cst_16 = arith.constant dense<0xFF800000> : vector<128xf32>
      %34 = vector.multi_reduction <maximumf>, %33, %cst_16 [1] : vector<128x128xf32> to vector<128xf32>
      %35 = vector.shape_cast %34 : vector<128xf32> to vector<128x1xf32>
      %36 = vector.broadcast %35 : vector<128x1xf32> to vector<128x128xf32>
      %37 = arith.subf %33, %36 : vector<128x128xf32>
      %38 = math.exp %37 : vector<128x128xf32>
      %cst_17 = arith.constant dense<0.000000e+00> : vector<128xf32>
      %39 = vector.multi_reduction <add>, %38, %cst_17 [1] : vector<128x128xf32> to vector<128xf32>
      %40 = vector.shape_cast %39 : vector<128xf32> to vector<128x1xf32>
      %41 = tpu.reciprocal %40 {approx = true} : vector<128x1xf32> -> vector<128x1xf32>
      %42 = vector.broadcast %41 : vector<128x1xf32> to vector<128x128xf32>
      %43 = arith.mulf %38, %42 : vector<128x128xf32>
      %44 = arith.truncf %43 : vector<128x128xf32> to vector<128x128xbf16>
      %45 = vector.extract_strided_slice %26 {offsets = [0, 0], sizes = [8, 128], strides = [1, 1]} : vector<16x128xbf16> to vector<8x128xbf16>
      %cst_18 = arith.constant dense<0.000000e+00> : vector<128x8xf32>
      %46 = tpu.matmul %44, %45, %cst_18 {dimension_numbers = #tpu.dot_dimension_numbers<[1], [1], [0], [0], [0, 0, 1, 0], [], []>} : vector<128x128xbf16>, vector<8x128xbf16>, vector<128x8xf32> -> vector<128x8xf32>
      %47 = arith.truncf %46 : vector<128x8xf32> to vector<128x8xbf16>
      %c0_19 = arith.constant 0 : index
      %c0_20 = arith.constant 0 : index
      %48 = vector.load %arg20[%c0_19, %c0_20] : memref<128x16xbf16, #tpu.memory_space<vmem>>, vector<128x8xbf16>
      tpu.vector_store %arg20[%c0_19, %c0_20], %47 {strides = array<i32>} : memref<128x16xbf16, #tpu.memory_space<vmem>>, vector<128x8xbf16>,
      %49 = vector.extract_strided_slice %24 {offsets = [0, 8], sizes = [128, 8], strides = [1, 1]} : vector<128x16xbf16> to vector<128x8xbf16>
      %50 = vector.extract_strided_slice %25 {offsets = [8, 0], sizes = [8, 128], strides = [1, 1]} : vector<16x128xbf16> to vector<8x128xbf16>
      %cst_21 = arith.constant dense<0.000000e+00> : vector<128x128xf32>
      %51 = tpu.matmul %49, %50, %cst_21 {dimension_numbers = #tpu.dot_dimension_numbers<[1], [0], [0], [1], [0, 0, 1, 1], [], []>} : vector<128x8xbf16>, vector<8x128xbf16>, vector<128x128xf32> -> vector<128x128xf32>
      %52 = vector.extract_strided_slice %27 {offsets = [1, 0], sizes = [1, 128], strides = [1, 1]} : vector<2x128xf32> to vector<1x128xf32>
      %53 = vector.broadcast %52 : vector<1x128xf32> to vector<128x128xf32>
      %54 = arith.addf %51, %53 : vector<128x128xf32>
      %cst_22 = arith.constant dense<0xFF800000> : vector<128xf32>
      %55 = vector.multi_reduction <maximumf>, %54, %cst_22 [1] : vector<128x128xf32> to vector<128xf32>
      %56 = vector.shape_cast %55 : vector<128xf32> to vector<128x1xf32>
      %57 = vector.broadcast %56 : vector<128x1xf32> to vector<128x128xf32>
      %58 = arith.subf %54, %57 : vector<128x128xf32>
      %59 = math.exp %58 : vector<128x128xf32>
      %cst_23 = arith.constant dense<0.000000e+00> : vector<128xf32>
      %60 = vector.multi_reduction <add>, %59, %cst_23 [1] : vector<128x128xf32> to vector<128xf32>
      %61 = vector.shape_cast %60 : vector<128xf32> to vector<128x1xf32>
      %62 = tpu.reciprocal %61 {approx = true} : vector<128x1xf32> -> vector<128x1xf32>
      %63 = vector.broadcast %62 : vector<128x1xf32> to vector<128x128xf32>
      %64 = arith.mulf %59, %63 : vector<128x128xf32>
      %65 = arith.truncf %64 : vector<128x128xf32> to vector<128x128xbf16>
      %66 = vector.extract_strided_slice %26 {offsets = [8, 0], sizes = [8, 128], strides = [1, 1]} : vector<16x128xbf16> to vector<8x128xbf16>
      %cst_24 = arith.constant dense<0.000000e+00> : vector<128x8xf32>
      %67 = tpu.matmul %65, %66, %cst_24 {dimension_numbers = #tpu.dot_dimension_numbers<[1], [1], [0], [0], [0, 0, 1, 0], [], []>} : vector<128x128xbf16>, vector<8x128xbf16>, vector<128x8xf32> -> vector<128x8xf32>
      %68 = arith.truncf %67 : vector<128x8xf32> to vector<128x8xbf16>
      %c0_25 = arith.constant 0 : index
      %c8 = arith.constant 8 : index
      %69 = vector.load %arg20[%c0_25, %c8] : memref<128x16xbf16, #tpu.memory_space<vmem>>, vector<128x8xbf16>
      tpu.vector_store %arg20[%c0_25, %c8], %68 {strides = array<i32>} : memref<128x16xbf16, #tpu.memory_space<vmem>>, vector<128x8xbf16>,
      %c0_26 = arith.constant 0 : index
      %c0_27 = arith.constant 0 : index
      %70 = vector.load %arg20[%c0_26, %c0_27] : memref<128x16xbf16, #tpu.memory_space<vmem>>, vector<128x16xbf16>
      %c0_28 = arith.constant 0 : index
      %c0_29 = arith.constant 0 : index
      %71 = vector.load %arg11[%c0_28, %c0_29] : memref<16x128xbf16, #tpu.memory_space<vmem>>, vector<16x128xbf16>
      %cst_30 = arith.constant dense<0.000000e+00> : vector<128x128xf32>
      %72 = tpu.matmul %70, %71, %cst_30 {dimension_numbers = #tpu.dot_dimension_numbers<[1], [0], [0], [1], [0, 0, 1, 1], [], []>} : vector<128x16xbf16>, vector<16x128xbf16>, vector<128x128xf32> -> vector<128x128xf32>
      %73 = arith.truncf %72 : vector<128x128xf32> to vector<128x128xbf16>
      %c0_31 = arith.constant 0 : index
      %c0_32 = arith.constant 0 : index
      %c0_33 = arith.constant 0 : index
      %74 = vector.load %arg12[%c0_31, %c0_32, %c0_33] : memref<1x128x128xbf16, #tpu.memory_space<vmem>>, vector<1x128x128xbf16>
      %75 = vector.shape_cast %74 : vector<1x128x128xbf16> to vector<128x128xbf16>
      %76 = vector.shape_cast %73 : vector<128x128xbf16> to vector<1x128x128xbf16>
      tpu.vector_store %arg12[%c0_31, %c0_32, %c0_33], %76 {strides = array<i32>} : memref<1x128x128xbf16, #tpu.memory_space<vmem>>, vector<1x128x128xbf16>,
      %c0_34 = arith.constant 0 : index
      %c0_35 = arith.constant 0 : index
      %c0_36 = arith.constant 0 : index
      %77 = vector.load %arg13[%c0_34, %c0_35, %c0_36] : memref<1x2x128xf32, #tpu.memory_space<vmem>>, vector<1x1x128xf32>
      %78 = vector.shape_cast %77 : vector<1x1x128xf32> to vector<1x128xf32>
      %cst_37 = arith.constant dense<0.000000e+00> : vector<128xf32>
      %79 = vector.multi_reduction <add>, %72, %cst_37 [0] : vector<128x128xf32> to vector<128xf32>
      %80 = vector.shape_cast %79 : vector<128xf32> to vector<1x128xf32>
      %81 = arith.addf %78, %80 : vector<1x128xf32>
      %c0_38 = arith.constant 0 : index
      %c0_39 = arith.constant 0 : index
      %c0_40 = arith.constant 0 : index
      %82 = vector.load %arg13[%c0_38, %c0_39, %c0_40] : memref<1x2x128xf32, #tpu.memory_space<vmem>>, vector<1x1x128xf32>
      %83 = vector.shape_cast %82 : vector<1x1x128xf32> to vector<1x128xf32>
      %84 = vector.shape_cast %81 : vector<1x128xf32> to vector<1x1x128xf32>
      tpu.vector_store %arg13[%c0_38, %c0_39, %c0_40], %84 {strides = array<i32>} : memref<1x2x128xf32, #tpu.memory_space<vmem>>, vector<1x1x128xf32>,
      %c0_41 = arith.constant 0 : index
      %c1 = arith.constant 1 : index
      %c0_42 = arith.constant 0 : index
      %85 = vector.load %arg13[%c0_41, %c1, %c0_42] : memref<1x2x128xf32, #tpu.memory_space<vmem>>, vector<1x1x128xf32>
      %86 = vector.shape_cast %85 : vector<1x1x128xf32> to vector<1x128xf32>
      %87 = arith.mulf %72, %72 : vector<128x128xf32>
      %cst_43 = arith.constant dense<0.000000e+00> : vector<128xf32>
      %88 = vector.multi_reduction <add>, %87, %cst_43 [0] : vector<128x128xf32> to vector<128xf32>
      %89 = vector.shape_cast %88 : vector<128xf32> to vector<1x128xf32>
      %90 = arith.addf %86, %89 : vector<1x128xf32>
      %c0_44 = arith.constant 0 : index
      %c1_45 = arith.constant 1 : index
      %c0_46 = arith.constant 0 : index
      %91 = vector.load %arg13[%c0_44, %c1_45, %c0_46] : memref<1x2x128xf32, #tpu.memory_space<vmem>>, vector<1x1x128xf32>
      %92 = vector.shape_cast %91 : vector<1x1x128xf32> to vector<1x128xf32>
      %93 = vector.shape_cast %90 : vector<1x128xf32> to vector<1x1x128xf32>
      tpu.vector_store %arg13[%c0_44, %c1_45, %c0_46], %93 {strides = array<i32>} : memref<1x2x128xf32, #tpu.memory_space<vmem>>, vector<1x1x128xf32>,
    } else {
    }
    return
  }
  func.func @transform_0(%arg0: i32, %arg1: i32, %arg2: i32) -> (i32, i32, i32) {
    %c1_i32 = arith.constant 1 : i32
    %0 = arith.subi %c1_i32, %arg1 : i32
    %1 = arith.muli %0, %arg2 : i32
    %c0_i32 = arith.constant 0 : i32
    %c0_i32_0 = arith.constant 0 : i32
    return %arg0, %1, %c0_i32 : i32, i32, i32
  }
  func.func @transform_1(%arg0: i32, %arg1: i32, %arg2: i32) -> (i32, i32, i32) {
    %c0_i32 = arith.constant 0 : i32
    %c0_i32_0 = arith.constant 0 : i32
    %c0_i32_1 = arith.constant 0 : i32
    return %arg0, %c0_i32, %c0_i32_0 : i32, i32, i32
  }
  func.func @transform_2(%arg0: i32, %arg1: i32, %arg2: i32) -> (i32, i32, i32) {
    %c0_i32 = arith.constant 0 : i32
    %c0_i32_0 = arith.constant 0 : i32
    %c0_i32_1 = arith.constant 0 : i32
    return %arg0, %c0_i32, %c0_i32_0 : i32, i32, i32
  }
  func.func @transform_3(%arg0: i32, %arg1: i32, %arg2: i32) -> (i32, i32) {
    %c0_i32 = arith.constant 0 : i32
    %c0_i32_0 = arith.constant 0 : i32
    %c0_i32_1 = arith.constant 0 : i32
    return %c0_i32, %c0_i32_0 : i32, i32
  }
  func.func @transform_4(%arg0: i32, %arg1: i32, %arg2: i32) -> (i32, i32) {
    %c0_i32 = arith.constant 0 : i32
    %c0_i32_0 = arith.constant 0 : i32
    %c0_i32_1 = arith.constant 0 : i32
    return %c0_i32, %c0_i32_0 : i32, i32
  }
  func.func @transform_5(%arg0: i32, %arg1: i32, %arg2: i32) -> (i32, i32) {
    %c0_i32 = arith.constant 0 : i32
    %c0_i32_0 = arith.constant 0 : i32
    %c0_i32_1 = arith.constant 0 : i32
    return %c0_i32, %c0_i32_0 : i32, i32
  }
  func.func @transform_6(%arg0: i32, %arg1: i32, %arg2: i32) -> (i32, i32) {
    %c0_i32 = arith.constant 0 : i32
    %c0_i32_0 = arith.constant 0 : i32
    %c0_i32_1 = arith.constant 0 : i32
    return %c0_i32, %c0_i32_0 : i32, i32
  }
  func.func @transform_7(%arg0: i32, %arg1: i32, %arg2: i32) -> (i32, i32) {
    %c0_i32 = arith.constant 0 : i32
    %c0_i32_0 = arith.constant 0 : i32
    %c0_i32_1 = arith.constant 0 : i32
    return %c0_i32, %c0_i32_0 : i32, i32
  }
  func.func @transform_8(%arg0: i32, %arg1: i32, %arg2: i32) -> (i32, i32) {
    %c0_i32 = arith.constant 0 : i32
    %c0_i32_0 = arith.constant 0 : i32
    %c0_i32_1 = arith.constant 0 : i32
    return %c0_i32, %c0_i32_0 : i32, i32
  }
  func.func @transform_9(%arg0: i32, %arg1: i32, %arg2: i32) -> (i32, i32, i32) {
    %0 = arith.muli %arg1, %arg2 : i32
    %c0_i32 = arith.constant 0 : i32
    %c0_i32_0 = arith.constant 0 : i32
    return %arg0, %0, %c0_i32 : i32, i32, i32
  }
  func.func @transform_10(%arg0: i32, %arg1: i32, %arg2: i32) -> (i32, i32, i32) {
    %c0_i32 = arith.constant 0 : i32
    %c0_i32_0 = arith.constant 0 : i32
    %c0_i32_1 = arith.constant 0 : i32
    return %arg0, %c0_i32, %c0_i32_0 : i32, i32, i32
  }
}

module attributes {stable_mosaic.version = 11 : i64} {
  func.func @_attn_kernel(%arg0: i32, %arg1: i32, %arg2: i32, %arg3: memref<1x128x16xbf16, #tpu.memory_space<vmem>>, %arg4: memref<1x16x128xbf16, #tpu.memory_space<vmem>>, %arg5: memref<1x1x128xf32, #tpu.memory_space<vmem>>, %arg6: memref<16x16xbf16, #tpu.memory_space<vmem>>, %arg7: memref<16x16xbf16, #tpu.memory_space<vmem>>, %arg8: memref<16x1xf32, #tpu.memory_space<vmem>>, %arg9: memref<16x16xbf16, #tpu.memory_space<vmem>>, %arg10: memref<16x1xf32, #tpu.memory_space<vmem>>, %arg11: memref<16x128xbf16, #tpu.memory_space<vmem>>, %arg12: memref<1x128x128xbf16, #tpu.memory_space<vmem>>, %arg13: memref<1x2x128xf32, #tpu.memory_space<vmem>>, %arg14: memref<1x16xf32, #tpu.memory_space<vmem>>, %arg15: memref<1x16xf32, #tpu.memory_space<vmem>>, %arg16: memref<1x16xf32, #tpu.memory_space<vmem>>, %arg17: memref<16x128xbf16, #tpu.memory_space<vmem>>, %arg18: memref<16x128xbf16, #tpu.memory_space<vmem>>, %arg19: memref<2x128xf32, #tpu.memory_space<vmem>>, %arg20: memref<128x16xbf16, #tpu.memory_space<vmem>>, %arg21: memref<256x16xbf16, #tpu.memory_space<vmem>>) attributes {dimension_semantics = [#tpu.dimension_semantics<parallel>, #tpu.dimension_semantics<arbitrary>, #tpu.dimension_semantics<arbitrary>], iteration_bounds = array<i64: 2, 2, 2>, scalar_prefetch = 0 : i64, scratch_operands = 8 : i64, tpu.core_type = #tpu.core_type<tc>, window_params = [{transform_indices = @transform_0, window_bounds = array<i64: 1, 128, 16>}, {transform_indices = @transform_1, window_bounds = array<i64: 1, 16, 128>}, {transform_indices = @transform_2, window_bounds = array<i64: 1, 1, 128>}, {pipeline_mode = #tpu.pipeline_mode<synchronous>, transform_indices = @transform_3, window_bounds = array<i64: 16, 16>}, {pipeline_mode = #tpu.pipeline_mode<synchronous>, transform_indices = @transform_4, window_bounds = array<i64: 16, 16>}, {pipeline_mode = #tpu.pipeline_mode<synchronous>, transform_indices = @transform_5, window_bounds = array<i64: 16, 1>}, {pipeline_mode = #tpu.pipeline_mode<synchronous>, transform_indices = @transform_6, window_bounds = array<i64: 16, 16>}, {pipeline_mode = #tpu.pipeline_mode<synchronous>, transform_indices = @transform_7, window_bounds = array<i64: 16, 1>}, {pipeline_mode = #tpu.pipeline_mode<synchronous>, transform_indices = @transform_8, window_bounds = array<i64: 16, 128>}, {transform_indices = @transform_9, window_bounds = array<i64: 1, 128, 128>}, {transform_indices = @transform_10, window_bounds = array<i64: 1, 2, 128>}]} {
    %c0_i32 = arith.constant 0 : i32
    %0 = arith.cmpi eq, %arg1, %c0_i32 : i32
    %c0_i32_0 = arith.constant 0 : i32
    %1 = arith.cmpi eq, %arg2, %c0_i32_0 : i32
    %2 = arith.andi %0, %1 : i1
    %3 = arith.extui %2 : i1 to i32
    %c0_i32_1 = arith.constant 0 : i32
    %4 = arith.cmpi ne, %3, %c0_i32_1 : i32
    scf.if %4 {
      %cst = arith.constant 0.000000e+00 : f32
      %16 = vector.broadcast %cst : f32 to vector<1x16xf32>
      %c0 = arith.constant 0 : index
      %c0_8 = arith.constant 0 : index
      %17 = vector.load %arg14[%c0, %c0_8] : memref<1x16xf32, #tpu.memory_space<vmem>>, vector<1x16xf32>
      tpu.vector_store %arg14[%c0, %c0_8], %16 {strides = array<i32>} : memref<1x16xf32, #tpu.memory_space<vmem>>, vector<1x16xf32>,
      %cst_9 = arith.constant 0.000000e+00 : f32
      %18 = vector.broadcast %cst_9 : f32 to vector<1x16xf32>
      %c0_10 = arith.constant 0 : index
      %c0_11 = arith.constant 0 : index
      %19 = vector.load %arg15[%c0_10, %c0_11] : memref<1x16xf32, #tpu.memory_space<vmem>>, vector<1x16xf32>
      tpu.vector_store %arg15[%c0_10, %c0_11], %18 {strides = array<i32>} : memref<1x16xf32, #tpu.memory_space<vmem>>, vector<1x16xf32>,
      %c0_12 = arith.constant 0 : index
      %c0_13 = arith.constant 0 : index
      %c0_14 = arith.constant 0 : index
      %20 = vector.load %arg4[%c0_12, %c0_13, %c0_14] : memref<1x16x128xbf16, #tpu.memory_space<vmem>>, vector<1x16x128xbf16>
      %21 = vector.shape_cast %20 : vector<1x16x128xbf16> to vector<16x128xbf16>
      %c0_15 = arith.constant 0 : index
      %c0_16 = arith.constant 0 : index
      %c0_17 = arith.constant 0 : index
      %22 = vector.load %arg5[%c0_15, %c0_16, %c0_17] : memref<1x1x128xf32, #tpu.memory_space<vmem>>, vector<1x1x128xf32>
      %23 = vector.shape_cast %22 : vector<1x1x128xf32> to vector<1x128xf32>
      %c0_18 = arith.constant 0 : index
      %c0_19 = arith.constant 0 : index
      %24 = vector.load %arg7[%c0_18, %c0_19] : memref<16x16xbf16, #tpu.memory_space<vmem>>, vector<16x16xbf16>
      %cst_20 = arith.constant dense<0.000000e+00> : vector<16x128xf32>
      %25 = tpu.matmul %24, %21, %cst_20 {dimension_numbers = #tpu.dot_dimension_numbers<[1], [0], [0], [1], [0, 0, 1, 1], [], []>} : vector<16x16xbf16>, vector<16x128xbf16>, vector<16x128xf32> -> vector<16x128xf32>
      %c0_21 = arith.constant 0 : index
      %c0_22 = arith.constant 0 : index
      %26 = vector.load %arg8[%c0_21, %c0_22] : memref<16x1xf32, #tpu.memory_space<vmem>>, vector<16x1xf32>
      %27 = vector.broadcast %26 : vector<16x1xf32> to vector<16x128xf32>
      %28 = arith.addf %25, %27 : vector<16x128xf32>
      %c0_23 = arith.constant 0 : index
      %c0_24 = arith.constant 0 : index
      %29 = vector.load %arg9[%c0_23, %c0_24] : memref<16x16xbf16, #tpu.memory_space<vmem>>, vector<16x16xbf16>
      %cst_25 = arith.constant dense<0.000000e+00> : vector<16x128xf32>
      %30 = tpu.matmul %29, %21, %cst_25 {dimension_numbers = #tpu.dot_dimension_numbers<[1], [0], [0], [1], [0, 0, 1, 1], [], []>} : vector<16x16xbf16>, vector<16x128xbf16>, vector<16x128xf32> -> vector<16x128xf32>
      %c0_26 = arith.constant 0 : index
      %c0_27 = arith.constant 0 : index
      %31 = vector.load %arg10[%c0_26, %c0_27] : memref<16x1xf32, #tpu.memory_space<vmem>>, vector<16x1xf32>
      %32 = vector.broadcast %31 : vector<16x1xf32> to vector<16x128xf32>
      %33 = arith.addf %30, %32 : vector<16x128xf32>
      %34 = vector.broadcast %23 : vector<1x128xf32> to vector<16x128xf32>
      %35 = arith.mulf %28, %34 : vector<16x128xf32>
      %36 = arith.truncf %35 : vector<16x128xf32> to vector<16x128xbf16>
      %c0_28 = arith.constant 0 : index
      %c0_29 = arith.constant 0 : index
      %37 = vector.load %arg17[%c0_28, %c0_29] : memref<16x128xbf16, #tpu.memory_space<vmem>>, vector<16x128xbf16>
      tpu.vector_store %arg17[%c0_28, %c0_29], %36 {strides = array<i32>} : memref<16x128xbf16, #tpu.memory_space<vmem>>, vector<16x128xbf16>,
      %38 = vector.broadcast %23 : vector<1x128xf32> to vector<16x128xf32>
      %39 = arith.mulf %33, %38 : vector<16x128xf32>
      %40 = arith.truncf %39 : vector<16x128xf32> to vector<16x128xbf16>
      %c0_30 = arith.constant 0 : index
      %c0_31 = arith.constant 0 : index
      %41 = vector.load %arg18[%c0_30, %c0_31] : memref<16x128xbf16, #tpu.memory_space<vmem>>, vector<16x128xbf16>
      tpu.vector_store %arg18[%c0_30, %c0_31], %40 {strides = array<i32>} : memref<16x128xbf16, #tpu.memory_space<vmem>>, vector<16x128xbf16>,
    } else {
    }
    %c0_i32_2 = arith.constant 0 : i32
    %5 = arith.cmpi eq, %arg1, %c0_i32_2 : i32
    %6 = arith.extui %5 : i1 to i32
    %c0_i32_3 = arith.constant 0 : i32
    %7 = arith.cmpi ne, %6, %c0_i32_3 : i32
    scf.if %7 {
      %c0 = arith.constant 0 : index
      %c0_8 = arith.constant 0 : index
      %c0_9 = arith.constant 0 : index
      %16 = vector.load %arg3[%c0, %c0_8, %c0_9] : memref<1x128x16xbf16, #tpu.memory_space<vmem>>, vector<1x128x16xbf16>
      %17 = vector.shape_cast %16 : vector<1x128x16xbf16> to vector<128x16xbf16>
      %c0_10 = arith.constant 0 : index
      %c0_11 = arith.constant 0 : index
      %18 = vector.load %arg6[%c0_10, %c0_11] : memref<16x16xbf16, #tpu.memory_space<vmem>>, vector<16x16xbf16>
      %cst = arith.constant dense<0.000000e+00> : vector<128x16xf32>
      %19 = tpu.matmul %17, %18, %cst {dimension_numbers = #tpu.dot_dimension_numbers<[1], [0], [0], [1], [0, 0, 1, 1], [], []>} : vector<128x16xbf16>, vector<16x16xbf16>, vector<128x16xf32> -> vector<128x16xf32>
      %c0_12 = arith.constant 0 : index
      %c0_13 = arith.constant 0 : index
      %20 = vector.load %arg14[%c0_12, %c0_13] : memref<1x16xf32, #tpu.memory_space<vmem>>, vector<1x16xf32>
      %cst_14 = arith.constant dense<0.000000e+00> : vector<16xf32>
      %21 = vector.multi_reduction <add>, %19, %cst_14 [0] : vector<128x16xf32> to vector<16xf32>
      %22 = vector.shape_cast %21 : vector<16xf32> to vector<1x16xf32>
      %23 = arith.addf %20, %22 : vector<1x16xf32>
      %c0_15 = arith.constant 0 : index
      %c0_16 = arith.constant 0 : index
      %24 = vector.load %arg14[%c0_15, %c0_16] : memref<1x16xf32, #tpu.memory_space<vmem>>, vector<1x16xf32>
      tpu.vector_store %arg14[%c0_15, %c0_16], %23 {strides = array<i32>} : memref<1x16xf32, #tpu.memory_space<vmem>>, vector<1x16xf32>,
      %c0_17 = arith.constant 0 : index
      %c0_18 = arith.constant 0 : index
      %25 = vector.load %arg15[%c0_17, %c0_18] : memref<1x16xf32, #tpu.memory_space<vmem>>, vector<1x16xf32>
      %26 = arith.mulf %19, %19 : vector<128x16xf32>
      %cst_19 = arith.constant dense<0.000000e+00> : vector<16xf32>
      %27 = vector.multi_reduction <add>, %26, %cst_19 [0] : vector<128x16xf32> to vector<16xf32>
      %28 = vector.shape_cast %27 : vector<16xf32> to vector<1x16xf32>
      %29 = arith.addf %25, %28 : vector<1x16xf32>
      %c0_20 = arith.constant 0 : index
      %c0_21 = arith.constant 0 : index
      %30 = vector.load %arg15[%c0_20, %c0_21] : memref<1x16xf32, #tpu.memory_space<vmem>>, vector<1x16xf32>
      tpu.vector_store %arg15[%c0_20, %c0_21], %29 {strides = array<i32>} : memref<1x16xf32, #tpu.memory_space<vmem>>, vector<1x16xf32>,
      %c128_i32 = arith.constant 128 : i32
      %31 = arith.muli %arg2, %c128_i32 : i32
      %32 = tpu.assume_multiple %31, 128 : i32
      %33 = arith.truncf %19 : vector<128x16xf32> to vector<128x16xbf16>
      %34 = arith.index_cast %32 : i32 to index
      %c0_22 = arith.constant 0 : index
      %35 = vector.load %arg21[%34, %c0_22] : memref<256x16xbf16, #tpu.memory_space<vmem>>, vector<128x16xbf16>
      tpu.vector_store %arg21[%34, %c0_22], %33 {strides = array<i32>} : memref<256x16xbf16, #tpu.memory_space<vmem>>, vector<128x16xbf16>,
    } else {
    }
    %c1_i32 = arith.constant 1 : i32
    %8 = arith.cmpi eq, %arg1, %c1_i32 : i32
    %c0_i32_4 = arith.constant 0 : i32
    %9 = arith.cmpi eq, %arg2, %c0_i32_4 : i32
    %10 = arith.andi %8, %9 : i1
    %11 = arith.extui %10 : i1 to i32
    %c0_i32_5 = arith.constant 0 : i32
    %12 = arith.cmpi ne, %11, %c0_i32_5 : i32
    scf.if %12 {
      %cst = arith.constant 0.000000e+00 : f32
      %16 = vector.broadcast %cst : f32 to vector<2x128xf32>
      %c0 = arith.constant 0 : index
      %c0_8 = arith.constant 0 : index
      %c0_9 = arith.constant 0 : index
      %17 = vector.load %arg13[%c0, %c0_8, %c0_9] : memref<1x2x128xf32, #tpu.memory_space<vmem>>, vector<1x2x128xf32>
      %18 = vector.shape_cast %17 : vector<1x2x128xf32> to vector<2x128xf32>
      %19 = vector.shape_cast %16 : vector<2x128xf32> to vector<1x2x128xf32>
      tpu.vector_store %arg13[%c0, %c0_8, %c0_9], %19 {strides = array<i32>} : memref<1x2x128xf32, #tpu.memory_space<vmem>>, vector<1x2x128xf32>,
      %c0_10 = arith.constant 0 : index
      %c0_11 = arith.constant 0 : index
      %20 = vector.load %arg14[%c0_10, %c0_11] : memref<1x16xf32, #tpu.memory_space<vmem>>, vector<1x16xf32>
      %cst_12 = arith.constant 3.906250e-03 : f32
      %21 = vector.broadcast %cst_12 : f32 to vector<1x16xf32>
      %22 = arith.mulf %20, %21 : vector<1x16xf32>
      %c0_13 = arith.constant 0 : index
      %c0_14 = arith.constant 0 : index
      %23 = vector.load %arg15[%c0_13, %c0_14] : memref<1x16xf32, #tpu.memory_space<vmem>>, vector<1x16xf32>
      %cst_15 = arith.constant 3.906250e-03 : f32
      %24 = vector.broadcast %cst_15 : f32 to vector<1x16xf32>
      %25 = arith.mulf %23, %24 : vector<1x16xf32>
      %26 = arith.mulf %22, %22 : vector<1x16xf32>
      %27 = arith.subf %25, %26 : vector<1x16xf32>
      %cst_16 = arith.constant 0.000000e+00 : f32
      %28 = vector.broadcast %cst_16 : f32 to vector<1x16xf32>
      %29 = arith.maximumf %27, %28 : vector<1x16xf32>
      %cst_17 = arith.constant 9.99999974E-6 : f32
      %30 = vector.broadcast %cst_17 : f32 to vector<1x16xf32>
      %31 = arith.addf %29, %30 : vector<1x16xf32>
      %32 = math.rsqrt %31 : vector<1x16xf32>
      %cst_18 = arith.constant 2.500000e-01 : f32
      %33 = vector.broadcast %cst_18 : f32 to vector<1x16xf32>
      %34 = arith.mulf %32, %33 : vector<1x16xf32>
      %c0_19 = arith.constant 0 : index
      %c0_20 = arith.constant 0 : index
      %35 = vector.load %arg16[%c0_19, %c0_20] : memref<1x16xf32, #tpu.memory_space<vmem>>, vector<1x16xf32>
      tpu.vector_store %arg16[%c0_19, %c0_20], %34 {strides = array<i32>} : memref<1x16xf32, #tpu.memory_space<vmem>>, vector<1x16xf32>,
      %36 = arith.mulf %22, %34 : vector<1x16xf32>
      %c0_21 = arith.constant 0 : index
      %c0_22 = arith.constant 0 : index
      %c0_23 = arith.constant 0 : index
      %37 = vector.load %arg5[%c0_21, %c0_22, %c0_23] : memref<1x1x128xf32, #tpu.memory_space<vmem>>, vector<1x1x128xf32>
      %38 = vector.shape_cast %37 : vector<1x1x128xf32> to vector<1x128xf32>
      %cst_24 = arith.constant 1.000000e+04 : f32
      %39 = vector.broadcast %cst_24 : f32 to vector<1x128xf32>
      %40 = arith.mulf %39, %38 : vector<1x128xf32>
      %cst_25 = arith.constant 1.000000e+04 : f32
      %41 = vector.broadcast %cst_25 : f32 to vector<1x128xf32>
      %42 = arith.subf %40, %41 : vector<1x128xf32>
      %c0_26 = arith.constant 0 : index
      %c0_27 = arith.constant 0 : index
      %43 = vector.load %arg17[%c0_26, %c0_27] : memref<16x128xbf16, #tpu.memory_space<vmem>>, vector<16x128xbf16>
      %44 = vector.extract_strided_slice %36 {offsets = [0, 0], sizes = [1, 8], strides = [1, 1]} : vector<1x16xf32> to vector<1x8xf32>
      %45 = vector.extract_strided_slice %43 {offsets = [0, 0], sizes = [8, 128], strides = [1, 1]} : vector<16x128xbf16> to vector<8x128xbf16>
      %cst_28 = arith.constant dense<0.000000e+00> : vector<1x128xf32>
      %46 = tpu.matmul %44, %45, %cst_28 {dimension_numbers = #tpu.dot_dimension_numbers<[1], [0], [0], [1], [0, 0, 1, 1], [], []>} : vector<1x8xf32>, vector<8x128xbf16>, vector<1x128xf32> -> vector<1x128xf32>
      %47 = arith.subf %42, %46 : vector<1x128xf32>
      %c0_29 = arith.constant 0 : index
      %c0_30 = arith.constant 0 : index
      %48 = vector.load %arg19[%c0_29, %c0_30] : memref<2x128xf32, #tpu.memory_space<vmem>>, vector<1x128xf32>
      tpu.vector_store %arg19[%c0_29, %c0_30], %47 {strides = array<i32>} : memref<2x128xf32, #tpu.memory_space<vmem>>, vector<1x128xf32>,
      %49 = vector.extract_strided_slice %36 {offsets = [0, 8], sizes = [1, 8], strides = [1, 1]} : vector<1x16xf32> to vector<1x8xf32>
      %50 = vector.extract_strided_slice %43 {offsets = [8, 0], sizes = [8, 128], strides = [1, 1]} : vector<16x128xbf16> to vector<8x128xbf16>
      %cst_31 = arith.constant dense<0.000000e+00> : vector<1x128xf32>
      %51 = tpu.matmul %49, %50, %cst_31 {dimension_numbers = #tpu.dot_dimension_numbers<[1], [0], [0], [1], [0, 0, 1, 1], [], []>} : vector<1x8xf32>, vector<8x128xbf16>, vector<1x128xf32> -> vector<1x128xf32>
      %52 = arith.subf %42, %51 : vector<1x128xf32>
      %c1 = arith.constant 1 : index
      %c0_32 = arith.constant 0 : index
      %53 = vector.load %arg19[%c1, %c0_32] : memref<2x128xf32, #tpu.memory_space<vmem>>, vector<1x128xf32>
      tpu.vector_store %arg19[%c1, %c0_32], %52 {strides = array<i32>} : memref<2x128xf32, #tpu.memory_space<vmem>>, vector<1x128xf32>,
    } else {
    }
    %c1_i32_6 = arith.constant 1 : i32
    %13 = arith.cmpi eq, %arg1, %c1_i32_6 : i32
    %14 = arith.extui %13 : i1 to i32
    %c0_i32_7 = arith.constant 0 : i32
    %15 = arith.cmpi ne, %14, %c0_i32_7 : i32
    scf.if %15 {
      %c128_i32 = arith.constant 128 : i32
      %16 = arith.muli %arg2, %c128_i32 : i32
      %17 = tpu.assume_multiple %16, 128 : i32
      %18 = arith.index_cast %17 : i32 to index
      %c0 = arith.constant 0 : index
      %19 = vector.load %arg21[%18, %c0] : memref<256x16xbf16, #tpu.memory_space<vmem>>, vector<128x16xbf16>
      %20 = arith.extf %19 : vector<128x16xbf16> to vector<128x16xf32>
      %c0_8 = arith.constant 0 : index
      %c0_9 = arith.constant 0 : index
      %21 = vector.load %arg16[%c0_8, %c0_9] : memref<1x16xf32, #tpu.memory_space<vmem>>, vector<1x16xf32>
      %22 = vector.broadcast %21 : vector<1x16xf32> to vector<128x16xf32>
      %23 = arith.mulf %20, %22 : vector<128x16xf32>
      %24 = arith.truncf %23 : vector<128x16xf32> to vector<128x16xbf16>
      %c0_10 = arith.constant 0 : index
      %c0_11 = arith.constant 0 : index
      %25 = vector.load %arg17[%c0_10, %c0_11] : memref<16x128xbf16, #tpu.memory_space<vmem>>, vector<16x128xbf16>
      %c0_12 = arith.constant 0 : index
      %c0_13 = arith.constant 0 : index
      %26 = vector.load %arg18[%c0_12, %c0_13] : memref<16x128xbf16, #tpu.memory_space<vmem>>, vector<16x128xbf16>
      %c0_14 = arith.constant 0 : index
      %c0_15 = arith.constant 0 : index
      %27 = vector.load %arg19[%c0_14, %c0_15] : memref<2x128xf32, #tpu.memory_space<vmem>>, vector<2x128xf32>
      %28 = vector.extract_strided_slice %24 {offsets = [0, 0], sizes = [128, 8], strides = [1, 1]} : vector<128x16xbf16> to vector<128x8xbf16>
      %29 = vector.extract_strided_slice %25 {offsets = [0, 0], sizes = [8, 128], strides = [1, 1]} : vector<16x128xbf16> to vector<8x128xbf16>
      %cst = arith.constant dense<0.000000e+00> : vector<128x128xf32>
      %30 = tpu.matmul %28, %29, %cst {dimension_numbers = #tpu.dot_dimension_numbers<[1], [0], [0], [1], [0, 0, 1, 1], [], []>} : vector<128x8xbf16>, vector<8x128xbf16>, vector<128x128xf32> -> vector<128x128xf32>
      %31 = vector.extract_strided_slice %27 {offsets = [0, 0], sizes = [1, 128], strides = [1, 1]} : vector<2x128xf32> to vector<1x128xf32>
      %32 = vector.broadcast %31 : vector<1x128xf32> to vector<128x128xf32>
      %33 = arith.addf %30, %32 : vector<128x128xf32>
      %cst_16 = arith.constant dense<0xFF800000> : vector<128xf32>
      %34 = vector.multi_reduction <maximumf>, %33, %cst_16 [1] : vector<128x128xf32> to vector<128xf32>
      %35 = vector.shape_cast %34 : vector<128xf32> to vector<128x1xf32>
      %36 = vector.broadcast %35 : vector<128x1xf32> to vector<128x128xf32>
      %37 = arith.subf %33, %36 : vector<128x128xf32>
      %38 = math.exp %37 : vector<128x128xf32>
      %cst_17 = arith.constant dense<0.000000e+00> : vector<128xf32>
      %39 = vector.multi_reduction <add>, %38, %cst_17 [1] : vector<128x128xf32> to vector<128xf32>
      %40 = vector.shape_cast %39 : vector<128xf32> to vector<128x1xf32>
      %41 = tpu.reciprocal %40 {approx = true} : vector<128x1xf32> -> vector<128x1xf32>
      %42 = vector.broadcast %41 : vector<128x1xf32> to vector<128x128xf32>
      %43 = arith.mulf %38, %42 : vector<128x128xf32>
      %44 = arith.truncf %43 : vector<128x128xf32> to vector<128x128xbf16>
      %45 = vector.extract_strided_slice %26 {offsets = [0, 0], sizes = [8, 128], strides = [1, 1]} : vector<16x128xbf16> to vector<8x128xbf16>
      %cst_18 = arith.constant dense<0.000000e+00> : vector<128x8xf32>
      %46 = tpu.matmul %44, %45, %cst_18 {dimension_numbers = #tpu.dot_dimension_numbers<[1], [1], [0], [0], [0, 0, 1, 0], [], []>} : vector<128x128xbf16>, vector<8x128xbf16>, vector<128x8xf32> -> vector<128x8xf32>
      %47 = arith.truncf %46 : vector<128x8xf32> to vector<128x8xbf16>
      %c0_19 = arith.constant 0 : index
      %c0_20 = arith.constant 0 : index
      %48 = vector.load %arg20[%c0_19, %c0_20] : memref<128x16xbf16, #tpu.memory_space<vmem>>, vector<128x8xbf16>
      tpu.vector_store %arg20[%c0_19, %c0_20], %47 {strides = array<i32>} : memref<128x16xbf16, #tpu.memory_space<vmem>>, vector<128x8xbf16>,
      %49 = vector.extract_strided_slice %24 {offsets = [0, 8], sizes = [128, 8], strides = [1, 1]} : vector<128x16xbf16> to vector<128x8xbf16>
      %50 = vector.extract_strided_slice %25 {offsets = [8, 0], sizes = [8, 128], strides = [1, 1]} : vector<16x128xbf16> to vector<8x128xbf16>
      %cst_21 = arith.constant dense<0.000000e+00> : vector<128x128xf32>
      %51 = tpu.matmul %49, %50, %cst_21 {dimension_numbers = #tpu.dot_dimension_numbers<[1], [0], [0], [1], [0, 0, 1, 1], [], []>} : vector<128x8xbf16>, vector<8x128xbf16>, vector<128x128xf32> -> vector<128x128xf32>
      %52 = vector.extract_strided_slice %27 {offsets = [1, 0], sizes = [1, 128], strides = [1, 1]} : vector<2x128xf32> to vector<1x128xf32>
      %53 = vector.broadcast %52 : vector<1x128xf32> to vector<128x128xf32>
      %54 = arith.addf %51, %53 : vector<128x128xf32>
      %cst_22 = arith.constant dense<0xFF800000> : vector<128xf32>
      %55 = vector.multi_reduction <maximumf>, %54, %cst_22 [1] : vector<128x128xf32> to vector<128xf32>
      %56 = vector.shape_cast %55 : vector<128xf32> to vector<128x1xf32>
      %57 = vector.broadcast %56 : vector<128x1xf32> to vector<128x128xf32>
      %58 = arith.subf %54, %57 : vector<128x128xf32>
      %59 = math.exp %58 : vector<128x128xf32>
      %cst_23 = arith.constant dense<0.000000e+00> : vector<128xf32>
      %60 = vector.multi_reduction <add>, %59, %cst_23 [1] : vector<128x128xf32> to vector<128xf32>
      %61 = vector.shape_cast %60 : vector<128xf32> to vector<128x1xf32>
      %62 = tpu.reciprocal %61 {approx = true} : vector<128x1xf32> -> vector<128x1xf32>
      %63 = vector.broadcast %62 : vector<128x1xf32> to vector<128x128xf32>
      %64 = arith.mulf %59, %63 : vector<128x128xf32>
      %65 = arith.truncf %64 : vector<128x128xf32> to vector<128x128xbf16>
      %66 = vector.extract_strided_slice %26 {offsets = [8, 0], sizes = [8, 128], strides = [1, 1]} : vector<16x128xbf16> to vector<8x128xbf16>
      %cst_24 = arith.constant dense<0.000000e+00> : vector<128x8xf32>
      %67 = tpu.matmul %65, %66, %cst_24 {dimension_numbers = #tpu.dot_dimension_numbers<[1], [1], [0], [0], [0, 0, 1, 0], [], []>} : vector<128x128xbf16>, vector<8x128xbf16>, vector<128x8xf32> -> vector<128x8xf32>
      %68 = arith.truncf %67 : vector<128x8xf32> to vector<128x8xbf16>
      %c0_25 = arith.constant 0 : index
      %c8 = arith.constant 8 : index
      %69 = vector.load %arg20[%c0_25, %c8] : memref<128x16xbf16, #tpu.memory_space<vmem>>, vector<128x8xbf16>
      tpu.vector_store %arg20[%c0_25, %c8], %68 {strides = array<i32>} : memref<128x16xbf16, #tpu.memory_space<vmem>>, vector<128x8xbf16>,
      %c0_26 = arith.constant 0 : index
      %c0_27 = arith.constant 0 : index
      %70 = vector.load %arg20[%c0_26, %c0_27] : memref<128x16xbf16, #tpu.memory_space<vmem>>, vector<128x16xbf16>
      %c0_28 = arith.constant 0 : index
      %c0_29 = arith.constant 0 : index
      %71 = vector.load %arg11[%c0_28, %c0_29] : memref<16x128xbf16, #tpu.memory_space<vmem>>, vector<16x128xbf16>
      %cst_30 = arith.constant dense<0.000000e+00> : vector<128x128xf32>
      %72 = tpu.matmul %70, %71, %cst_30 {dimension_numbers = #tpu.dot_dimension_numbers<[1], [0], [0], [1], [0, 0, 1, 1], [], []>} : vector<128x16xbf16>, vector<16x128xbf16>, vector<128x128xf32> -> vector<128x128xf32>
      %73 = arith.truncf %72 : vector<128x128xf32> to vector<128x128xbf16>
      %c0_31 = arith.constant 0 : index
      %c0_32 = arith.constant 0 : index
      %c0_33 = arith.constant 0 : index
      %74 = vector.load %arg12[%c0_31, %c0_32, %c0_33] : memref<1x128x128xbf16, #tpu.memory_space<vmem>>, vector<1x128x128xbf16>
      %75 = vector.shape_cast %74 : vector<1x128x128xbf16> to vector<128x128xbf16>
      %76 = vector.shape_cast %73 : vector<128x128xbf16> to vector<1x128x128xbf16>
      tpu.vector_store %arg12[%c0_31, %c0_32, %c0_33], %76 {strides = array<i32>} : memref<1x128x128xbf16, #tpu.memory_space<vmem>>, vector<1x128x128xbf16>,
      %c0_34 = arith.constant 0 : index
      %c0_35 = arith.constant 0 : index
      %c0_36 = arith.constant 0 : index
      %77 = vector.load %arg13[%c0_34, %c0_35, %c0_36] : memref<1x2x128xf32, #tpu.memory_space<vmem>>, vector<1x1x128xf32>
      %78 = vector.shape_cast %77 : vector<1x1x128xf32> to vector<1x128xf32>
      %cst_37 = arith.constant dense<0.000000e+00> : vector<128xf32>
      %79 = vector.multi_reduction <add>, %72, %cst_37 [0] : vector<128x128xf32> to vector<128xf32>
      %80 = vector.shape_cast %79 : vector<128xf32> to vector<1x128xf32>
      %81 = arith.addf %78, %80 : vector<1x128xf32>
      %c0_38 = arith.constant 0 : index
      %c0_39 = arith.constant 0 : index
      %c0_40 = arith.constant 0 : index
      %82 = vector.load %arg13[%c0_38, %c0_39, %c0_40] : memref<1x2x128xf32, #tpu.memory_space<vmem>>, vector<1x1x128xf32>
      %83 = vector.shape_cast %82 : vector<1x1x128xf32> to vector<1x128xf32>
      %84 = vector.shape_cast %81 : vector<1x128xf32> to vector<1x1x128xf32>
      tpu.vector_store %arg13[%c0_38, %c0_39, %c0_40], %84 {strides = array<i32>} : memref<1x2x128xf32, #tpu.memory_space<vmem>>, vector<1x1x128xf32>,
      %c0_41 = arith.constant 0 : index
      %c1 = arith.constant 1 : index
      %c0_42 = arith.constant 0 : index
      %85 = vector.load %arg13[%c0_41, %c1, %c0_42] : memref<1x2x128xf32, #tpu.memory_space<vmem>>, vector<1x1x128xf32>
      %86 = vector.shape_cast %85 : vector<1x1x128xf32> to vector<1x128xf32>
      %87 = arith.mulf %72, %72 : vector<128x128xf32>
      %cst_43 = arith.constant dense<0.000000e+00> : vector<128xf32>
      %88 = vector.multi_reduction <add>, %87, %cst_43 [0] : vector<128x128xf32> to vector<128xf32>
      %89 = vector.shape_cast %88 : vector<128xf32> to vector<1x128xf32>
      %90 = arith.addf %86, %89 : vector<1x128xf32>
      %c0_44 = arith.constant 0 : index
      %c1_45 = arith.constant 1 : index
      %c0_46 = arith.constant 0 : index
      %91 = vector.load %arg13[%c0_44, %c1_45, %c0_46] : memref<1x2x128xf32, #tpu.memory_space<vmem>>, vector<1x1x128xf32>
      %92 = vector.shape_cast %91 : vector<1x1x128xf32> to vector<1x128xf32>
      %93 = vector.shape_cast %90 : vector<1x128xf32> to vector<1x1x128xf32>
      tpu.vector_store %arg13[%c0_44, %c1_45, %c0_46], %93 {strides = array<i32>} : memref<1x2x128xf32, #tpu.memory_space<vmem>>, vector<1x1x128xf32>,
    } else {
    }
    return
  }
  func.func @transform_0(%arg0: i32, %arg1: i32, %arg2: i32) -> (i32, i32, i32) {
    %c1_i32 = arith.constant 1 : i32
    %0 = arith.subi %c1_i32, %arg1 : i32
    %1 = arith.muli %0, %arg2 : i32
    %c0_i32 = arith.constant 0 : i32
    %c0_i32_0 = arith.constant 0 : i32
    return %arg0, %1, %c0_i32 : i32, i32, i32
  }
  func.func @transform_1(%arg0: i32, %arg1: i32, %arg2: i32) -> (i32, i32, i32) {
    %c0_i32 = arith.constant 0 : i32
    %c0_i32_0 = arith.constant 0 : i32
    %c0_i32_1 = arith.constant 0 : i32
    return %arg0, %c0_i32, %c0_i32_0 : i32, i32, i32
  }
  func.func @transform_2(%arg0: i32, %arg1: i32, %arg2: i32) -> (i32, i32, i32) {
    %c0_i32 = arith.constant 0 : i32
    %c0_i32_0 = arith.constant 0 : i32
    %c0_i32_1 = arith.constant 0 : i32
    return %arg0, %c0_i32, %c0_i32_0 : i32, i32, i32
  }
  func.func @transform_3(%arg0: i32, %arg1: i32, %arg2: i32) -> (i32, i32) {
    %c0_i32 = arith.constant 0 : i32
    %c0_i32_0 = arith.constant 0 : i32
    %c0_i32_1 = arith.constant 0 : i32
    return %c0_i32, %c0_i32_0 : i32, i32
  }
  func.func @transform_4(%arg0: i32, %arg1: i32, %arg2: i32) -> (i32, i32) {
    %c0_i32 = arith.constant 0 : i32
    %c0_i32_0 = arith.constant 0 : i32
    %c0_i32_1 = arith.constant 0 : i32
    return %c0_i32, %c0_i32_0 : i32, i32
  }
  func.func @transform_5(%arg0: i32, %arg1: i32, %arg2: i32) -> (i32, i32) {
    %c0_i32 = arith.constant 0 : i32
    %c0_i32_0 = arith.constant 0 : i32
    %c0_i32_1 = arith.constant 0 : i32
    return %c0_i32, %c0_i32_0 : i32, i32
  }
  func.func @transform_6(%arg0: i32, %arg1: i32, %arg2: i32) -> (i32, i32) {
    %c0_i32 = arith.constant 0 : i32
    %c0_i32_0 = arith.constant 0 : i32
    %c0_i32_1 = arith.constant 0 : i32
    return %c0_i32, %c0_i32_0 : i32, i32
  }
  func.func @transform_7(%arg0: i32, %arg1: i32, %arg2: i32) -> (i32, i32) {
    %c0_i32 = arith.constant 0 : i32
    %c0_i32_0 = arith.constant 0 : i32
    %c0_i32_1 = arith.constant 0 : i32
    return %c0_i32, %c0_i32_0 : i32, i32
  }
  func.func @transform_8(%arg0: i32, %arg1: i32, %arg2: i32) -> (i32, i32) {
    %c0_i32 = arith.constant 0 : i32
    %c0_i32_0 = arith.constant 0 : i32
    %c0_i32_1 = arith.constant 0 : i32
    return %c0_i32, %c0_i32_0 : i32, i32
  }
  func.func @transform_9(%arg0: i32, %arg1: i32, %arg2: i32) -> (i32, i32, i32) {
    %0 = arith.muli %arg1, %arg2 : i32
    %c0_i32 = arith.constant 0 : i32
    %c0_i32_0 = arith.constant 0 : i32
    return %arg0, %0, %c0_i32 : i32, i32, i32
  }
  func.func @transform_10(%arg0: i32, %arg1: i32, %arg2: i32) -> (i32, i32, i32) {
    %c0_i32 = arith.constant 0 : i32
    %c0_i32_0 = arith.constant 0 : i32
    %c0_i32_1 = arith.constant 0 : i32
    return %arg0, %c0_i32, %c0_i32_0 : i32, i32, i32
  }
}

</mosaic_0001>

<bundles_post_ra>
// kernel: tpu_custom_call.1
= control target key start
LH: loop header
LB: loop body
LE: loop exit
PB: predicated region body
PF: predicated region fallthrough
CT: control target
= control target key end

     0   :  { %s4513_s0 = inlined_call_operand.vmem [shape: bf16[2,256,16], index: 0, kind: input, shape index: {}]   ;;  %s4514_s1 = inlined_call_operand.vmem [shape: bf16[2,16,128], index: 1, kind: input, shape index: {}]   ;;  %s4515_s2 = inlined_call_operand.vmem [shape: f32[2,1,128], index: 2, kind: input, shape index: {}]   ;;  %s4516_s3 = inlined_call_operand.vmem [shape: bf16[16,16], index: 3, kind: input, shape index: {}]   ;;  %s4517_s4 = inlined_call_operand.vmem [shape: bf16[16,16], index: 4, kind: input, shape index: {}]   ;;  %s4518_s5 = inlined_call_operand.vmem [shape: f32[16,1], index: 5, kind: input, shape index: {}]   ;;  %s4519_s6 = inlined_call_operand.vmem [shape: bf16[16,16], index: 6, kind: input, shape index: {}]   ;;  %s4520_s7 = inlined_call_operand.vmem [shape: f32[16,1], index: 7, kind: input, shape index: {}]   ;;  %s4521_s8 = inlined_call_operand.vmem [shape: bf16[16,128], index: 8, kind: input, shape index: {}]   ;;  %s4522_s9 = inlined_call_operand.hbm [shape: bf16[2,256,128], index: 9, kind: output, shape index: {0}]   ;;  %s4523_s10 = inlined_call_operand.hbm [shape: f32[2,2,128], index: 10, kind: output, shape index: {1}]  }
   0x1   :  { %4548 = sst [smem:[#allocation35_spill]] %s4513_s0 }
   0x2   :  { %4549 = sst [smem:[#allocation36_spill]] %s4514_s1 }
   0x3   :  { %4550 = sst [smem:[#allocation37_spill]] %s4522_s9 }
   0x4   :  { %4551 = sst [smem:[#allocation38_spill]] %s4523_s10 }
   0x5   :  { %16 = vsyncpa [#allocation11], 0 }
   0x6   :  { %18 = vsyncpa [#allocation11 + $0x1], 0 }
   0x7   :  { %19 = vsyncpa [#allocation13], 0 }
   0x8   :  { %21 = vsyncpa [#allocation13 + $0x1], 0  ;;  %s3723_s13 = smov 0   ;;  %s3725_s14 = smov 0  }
   0x9   :  { %s3727_s15 = smov 0   ;;  %s3729_s16 = smov 0  }
   0xa   :  { %s3731_s17 = smov 0   ;;  %s3733_s18 = smov 0  }
   0xb   :  { %s3735_s19 = smov 0   ;;  %s3737_s20 = smov 0  }
   0xc   :  { %s3739_s21 = smov 0   ;;  %s3741_s22 = smov 0  }
   0xd   :  { %s3743_s23 = smov 0   ;;  %s3745_s24 = smov 0  }
   0xe   :  { %s3747_s25 = smov 0  }
   0xf LB: > { %4552 = sst [smem:[#allocation16_spill]] %s3606_s13  ;;  %s2695_s26 = sadd.s32 4294967295, %s3654_s25   ;;  %s3654_s25 = sphi %s3747_s25, %s27_s25   ;;  %s3650_s24 = sphi %s3745_s24, %s4607_s24   ;;  %s3646_s23 = sphi %s3743_s23, %s4606_s23   ;;  %s3642_s22 = sphi %s3741_s22, %s4605_s22   ;;  %s3638_s21 = sphi %s3739_s21, %s4604_s21   ;;  %s3634_s20 = sphi %s3737_s20, %s4609_s20   ;;  %s3630_s19 = sphi %s3735_s19, %s4602_s19   ;;  %s3626_s18 = sphi %s3733_s18, %s4601_s18   ;;  %s3622_s17 = sphi %s3731_s17, %s4600_s17   ;;  %s3618_s16 = sphi %s3729_s16, %s4599_s16   ;;  %s3614_s15 = sphi %s3727_s15, %s4598_s15   ;;  %s3610_s14 = sphi %s3725_s14, %s4597_s14   ;;  %s3606_s13 = sphi %s3723_s13, %s4596_s13  }
  0x10   : > { %4553 = sst [smem:[#allocation17_spill]] %s3610_s14  ;;  %s2696_s27 = sadd.s32 4294967294, %s3654_s25  }
  0x11   : > { %4554 = sst [smem:[#allocation18_spill]] %s3614_s15  ;;  %s39_s28 = sadd.s32 1, %s3642_s22 }
  0x12   : > { %4555 = sst [smem:[#allocation19_spill]] %s3618_s16  ;;  %s42_s29 = sadd.s32 1, %s3646_s23 }
  0x13   : > { %4556 = sst [smem:[#allocation20_spill]] %s3622_s17  ;;  %p40_p0 = scmp.ge.s32.totalorder %s39_s28, 2 }
  0x14   : > { %4557 = sst [smem:[#allocation21_spill]] %s3626_s18  ;;  %s46_s30 = sadd.s32 1, %s3650_s24 }
  0x15   : > { %4558 = sst [smem:[#allocation22_spill]] %s3642_s22  ;;  %s260_s11 = smul.u32 %s3642_s22, %s3646_s23 }
  0x16   : > { %4559 = sst [smem:[#allocation23_spill]] %s3646_s23  ;;  %s267_s12 = sadd.s32 1, %s3626_s18 }
  0x17   : > { %4560 = sst [smem:[#allocation24_spill]] %s3650_s24  ;;  %s4611_s28 = smov (%p40_p0, %s39_s28), 0 }
  0x18   : > { %4561 = sst [smem:[#allocation25_spill]] %s3654_s25  ;;  %s4613_s29 = smov (!%p40_p0, %s42_s29), %s3646_s23 }
  0x19   : > { %4562 = sst [smem:[#allocation26_spill]] %s4611_s28  ;;  %p277_p1 = scmp.ne.s32.totalorder %s3626_s18, %s3622_s17 }
  0x1a   : > { %p3801_p2 = scmp.eq.s32.totalorder %s2695_s26, 7  ;;  %p44_p3 = scmp.ge.s32.totalorder %s4613_s29, 2 }
  0x1b   : > { %p283_p4 = scmp.ne.s32.totalorder %s3622_s17, %s3618_s16  ;;  %p3813_p6 = scmp.eq.s32.totalorder %s2696_s27, 7 }
  0x1c   : > { %p3809_p5 = por %p3801_p2, %p277_p1  ;;  %s4615_s29 = smov (%p44_p3, %s4613_s29), 0 }
  0x1d   : > { %4567 = sst [smem:[#allocation28_spill]] %s4615_s29  ;;  %s4617_s30 = smov (!%p44_p3, %s46_s30), %s3650_s24 }
  0x1e   : > { %s4564_s22 = scalar_select %p3809_p5, 1, 0 }
  0x1f   : > { %s261_s26 = smul.u32 %s4615_s29, %s4611_s28  ;;  %p3824_p7 = por %p3813_p6, %p283_p4 }
  0x20   : > { %4565 = sst [smem:[#allocation27_spill]] %s4564_s22  ;;  %p48_p8 = scmp.ge.s32.totalorder %s4617_s30, 2 }
  0x21   : > { %s4568_s16 = scalar_select %p3824_p7, 1, 0 }
  0x22   : > { %s293_s27 = sadd.s32 1, %s3614_s15  ;;  %s263_s9 = ssub.s32 %s260_s11, %s261_s26 }
  0x23   : > { %4569 = sst [smem:[#allocation29_spill]] %s4568_s16  ;;  %p303_p9 = scmp.ne.s32.totalorder %s3614_s15, %s3610_s14 }
  0x24   : > { %s4619_s30 = smov (%p48_p8, %s4617_s30), 0  ;;  %p309_p11 = scmp.ne.s32.totalorder %s3610_s14, %s3606_s13 }
  0x25   : > { %4570 = sst [smem:[#allocation30_spill]] %s4619_s30  ;;  %p3835_p10 = por %p303_p9, %p3801_p2 }
  0x26   : > { %s262_s29 = ssub.s32 %s3650_s24, %s4619_s30  ;;  %p2699_p12 = scmp.ge.s32.totalorder %s3654_s25, 1 }
  0x27   : > { %s4571_s22 = scalar_select %p3835_p10, 1, 0 }
  0x28   : > { %s264_s28 = sor.u32 %s263_s9, %s262_s29  ;;  %p291_p13 = scmp.eq.s32.totalorder %s262_s29, 0 }
  0x29   : > { %4572 = sst [smem:[#allocation31_spill]] %s4571_s22  ;;  %p265_p0 = scmp.eq.s32.totalorder %s264_s28, 0 }
  0x2a   : > { %p3846_p1 = por %p309_p11, %p3813_p6  ;;  %p377_p3 = scmp.lt.s32.totalorder %s3654_s25, 9 }
  0x2b   : > { %s3851_s11 = scalar_select %p291_p13, %s3614_s15, %s293_s27  }
  0x2c   : > { %s4573_s16 = scalar_select %p3846_p1, 1, 0 }
  0x2d   : > { %4575 = sst [smem:[#allocation33_spill]] %s3851_s11  ;;  %p378_p2 = pnand %p2699_p12, %p377_p3 }
  0x2e   : > { %4574 = sst [smem:[#allocation32_spill]] %s4573_s16  ;;  %s4539_s9 = sand.u32 (!%p378_p2), 1, %s3622_s17  }
  0x2f   : > { %s3854_s26 = scalar_select %p265_p0, %s3626_s18, %s267_s12  }
  0x30   : > { %381 = sbr.rel (%p378_p2) target bundleno = 2167 (0x877), region = 56  ;;  %s4540_s10 = sand.u32 (!%p378_p2), 1, %s3610_s14  }
  0x31   : > { %4576 = sst [smem:[#allocation34_spill]] %s3854_s26  ;;  %s2700_s23 = sshll.u32 (!%p378_p2), %s4539_s9, 6 }
  0x32   : > { %s2701_s28 = sshll.u32 (!%p378_p2), %s4540_s10, 1  ;;  %s434_s29 = ssub.s32 (!%p378_p2), 1, %s3634_s20 }
  0x33   : > { %p437_p4 = scmp.lt.s32.totalorder (!%p378_p2), %s3638_s21, 1  ;;  %s435_s12 = smul.u32 (!%p378_p2), %s3630_s19, %s434_s29 }
  0x34   : > { %p459_p6 = scmp.eq.s32.totalorder (!%p378_p2), %s3634_s20, 0  ;;  %p460_p8 = scmp.eq.s32.totalorder (!%p378_p2), %s3630_s19, 0 }
  0x35   : > { %s438_s27 = scalar_select %p437_p4, %s3638_s21, 1 }
  0x36   : > { %s2702_s30 = sshll.u32 %s435_s12, 4  ;;  %s4577_s1 = sld [smem:[#allocation36_spill]] }
  0x37   : > { %p439_p9 = scmp.lt.s32.totalorder %s2702_s30, 31  ;;  %s2703_s24 = sshll.u32 %s438_s27, 5 }
  0x38   : > { %s2849_s26 = sshll.u32 %s438_s27, 3  ;;  %s3872_s15 = scalar_lea.vmem %s4515_s2, %s438_s27 }
  0x39   : > { %s4621_s30 = smov (!%p439_p9, %s2702_s30), 31  ;;  %p461_p11 = pnand %p460_p8, %p459_p6 }
  0x3a   : > { %s442_s29 = sadd.s32 %s2703_s24, %s4621_s30  ;;  %s4578_s0 = sld [smem:[#allocation35_spill]] }
  0x3b   : > { %s2704_s13 = sshll.u32 %s442_s29, 2  ;;  %s3884_s14 = scalar_lea.vmem [#allocation10], %s2700_s23 }
  0x3c   : > { %s452_s10 = scalar_lea.vmem %s4577_s1, %s2849_s26  ;;  %s3886_s17 = scalar_lea.vmem [#allocation12], %s2701_s28 }
  0x3d   : > { %464 = sbr.rel (%p461_p11) target bundleno = 276 (0x114), region = 60 }
  0x40   : > { %s3882_s22 = scalar_lea.vmem %s4578_s0, %s2704_s13 }
  0x42   : > { %vm465_vm0 = vcmask 122880   ;;  %v3656_v0 = vmov 0.0   ;;  %v3341_v1 = vld [vmem:[%s452_s10] sm:$0xff]   ;;  %vm3657_vm1 = vmmov 0   ;;  %vm496_vm2 = vcmask 130048   ;;  %v544_v7 = vld [vmem:[%s4520_s7 + $0x8] sm:$0xff] }
  0x43   : > { %466 = vst.msk [vmem:[#allocation2] sm:$0x1] %vm465_vm0, %v3656_v0  ;;  %467 = vst.msk [vmem:[#allocation3] sm:$0x1] %vm465_vm0, %v3656_v0  ;;  %3076 = vmatprep.subr.bf16.mxu0 %v3656_v0  ;;  %3082 = vmatprep.subr.bf16.mxu1 %v3656_v0  ;;  %v3342_v2 = vld [vmem:[%s4517_s4] sm:$0xff]   ;;  %v3658_v6 = vmov 0  }
  0x44   : > { %3078 = vmatprep.mubr.msk.bf16.mxu0 %vm3657_vm1, %v3656_v0  ;;  %3084 = vmatprep.mubr.msk.bf16.mxu1 %vm3657_vm1, %v3656_v0  ;;  %v3343_v3 = vld [vmem:[%s4519_s6] sm:$0xff]   ;;  %v474_v8 = vld [vmem:[%s4518_s5 + $0x8] sm:$0xff] }
  0x45   : > { %3077 = vmatpush3.bf16.msra.mxu0 %v3341_v1  ;;  %3083 = vmatpush3.bf16.msra.mxu1 %v3341_v1  ;;  %v543_v4 = vld [vmem:[%s4520_s7] sm:$0xff] }
  0x46   : > { %v473_v5 = vld [vmem:[%s4518_s5] sm:$0xff]  ;;  %3340 = vset.pattern.permute.xlu1 %v3658_v6  ;;  %3339 = vset.pattern.permute.xlu0 %v3658_v6 }
  0x47   : > { %547 = vperm.xlu1 %3340, %v543_v4   ;;  %477 = vperm.xlu0 %3339, %v473_v5   ;;  %v2712_v19 = vld [vmem:[%s3872_s15] ss:$0 sm:$0xff] }
  0x48   : > { %3079 = vmatmul.mubr.msk.bf16.vlgmr.msra.gmra.mxu0 %vm496_vm2, %v3342_v2  ;;  %3085 = vmatmul.mubr.msk.bf16.vlgmr.msra.gmra.mxu1 %vm496_vm2, %v3343_v3 }
  0x4b   : > { %552 = vperm.xlu1 %3340, %v544_v7   ;;  %482 = vperm.xlu0 %3339, %v474_v8  }
  0xc2   : > { %v548_v9 = vpop.permute.xlu1 %547  ;;  %v478_v10 = vpop.permute.xlu0 %477 }
  0xc6   : > { %v553_v15 = vpop.permute.xlu1 %552  ;;  %v483_v16 = vpop.permute.xlu0 %482 }
 0x108   : > { %v534_v11 = vpop.f32.mrf.mxu0  ;;  %v597_v12 = vpop.f32.mrf.mxu1 }
 0x109   : > { %v535_v17 = vadd.f32 %v534_v11, %v478_v10  ;;  %v598_v18 = vadd.f32 %v597_v12, %v548_v9 }
 0x10a   : > { %v3080_v13 = vpop.f32.mrf.mxu0  ;;  %v3086_v14 = vpop.f32.mrf.mxu1 }
 0x10b   : > { %v610_v26 = vmul.f32 %v2712_v19, %v535_v17  ;;  %v622_v27 = vmul.f32 %v2712_v19, %v598_v18 }
 0x10c   : > { %v537_v20 = vpop.f32.mrf.mxu0  ;;  %v600_v21 = vpop.f32.mrf.mxu1 }
 0x10d   : > { %v538_v22 = vadd.f32 %v537_v20, %v483_v16  ;;  %v601_v23 = vadd.f32 %v600_v21, %v553_v15 }
 0x10e   : > { %v3081_v24 = vpop.f32.mrf.mxu0  ;;  %v3087_v25 = vpop.f32.mrf.mxu1 }
 0x10f   : > { %v611_v28 = vmul.f32 %v2712_v19, %v538_v22  ;;  %v623_v29 = vmul.f32 %v2712_v19, %v601_v23 }
 0x111   : > { %v2921_v30 = vpack.c.bf16 %v611_v28, %v610_v26  ;;  %v2926_v31 = vpack.c.bf16 %v623_v29, %v622_v27 }
 0x113   : > { %2922 = vst [vmem:[#allocation5] sm:$0xff] %v2921_v30   ;;  %2927 = vst [vmem:[#allocation6] sm:$0xff] %v2926_v31  }
 0x114 PF: > { %p2717_p12 = scmp.ne.s32.totalorder %s3634_s20, 0 }
 0x115   : > { %s2735_s12 = sshll.u32 (!%p2717_p12), %s3630_s19, 7 }
 0x116   : > { %636 = sbr.rel (%p2717_p12) target bundleno = 535 (0x217), region = 64  ;;  %s985_s16 = sshra.s32 (!%p2717_p12), %s2735_s12, 3 }
 0x117   : > { %s2752_s18 = sshll.u32 (!%p2717_p12), %s985_s16, 2 }
 0x118   : > { %s3930_s13 = scalar_lea.vmem (!%p2717_p12), [#allocation9], %s2752_s18 }
 0x11b   : > { %v3344_v32 = vld [vmem:[%s4516_s3] sm:$0xff]   ;;  %vm701_vm3 = vcmask 130048   ;;  %v3346_v34 = vld [vmem:[%s3882_s22 + $0x8] sm:$0xff]   ;;  %v3347_v35 = vld [vmem:[%s3882_s22 + $0x10] sm:$0xff]   ;;  %vm989_vm4 = vcmask 125952   ;;  %vm862_vm5 = vcmask 122880  }
 0x11c   : > { %v3345_v33 = vld [vmem:[%s3882_s22] sm:$0xff]   ;;  %3088 = vmatprep.subr.bf16.mxu0 %v3344_v32  ;;  %3206 = vmatprep.subr.bf16.mxu1 %v3344_v32  ;;  %v3350_v37 = vld [vmem:[%s3882_s22 + $0x28] sm:$0xff]   ;;  %v3351_v38 = vld [vmem:[%s3882_s22 + $0x30] sm:$0xff]  }
 0x11d   : > { %3089 = vmatpush3.bf16.msra.mxu0 %v3344_v32  ;;  %3090 = vmatprep.mubr.msk.bf16.mxu0 %vm701_vm3, %v3345_v33  ;;  %v3349_v36 = vld [vmem:[%s3882_s22 + $0x20] sm:$0xff]   ;;  %v3348_v39 = vld [vmem:[%s3882_s22 + $0x18] sm:$0xff]  }
 0x11e   : > { %3207 = vmatpush3.bf16.msra.mxu1 %v3344_v32  ;;  %3098 = vmatprep.mubr.msk.bf16.mxu1 %vm701_vm3, %v3349_v36  ;;  %v3352_v40 = vld [vmem:[%s3882_s22 + $0x38] sm:$0xff]  }
 0x120   : > { %3091 = vmatmul.mubr.msk.bf16.vlgmr.msra.gmra.mxu0 %vm701_vm3, %v3346_v34 }
 0x121   : > { %3094 = vmatprep.mubr.msk.bf16.mxu0 %vm701_vm3, %v3347_v35  ;;  %3099 = vmatmul.mubr.msk.bf16.vlgmr.msra.gmra.mxu1 %vm701_vm3, %v3350_v37 }
 0x122   : > { %3102 = vmatprep.mubr.msk.bf16.mxu1 %vm701_vm3, %v3351_v38 }
 0x128   : > { %3095 = vmatmul.mubr.msk.bf16.gmra.mxu0 %vm701_vm3, %v3348_v39 }
 0x129   : > { %3103 = vmatmul.mubr.msk.bf16.gmra.mxu1 %vm701_vm3, %v3352_v40 }
 0x1e0   : > { %v3092_v41 = vpop.f32.mrf.mxu0 }
 0x1e1   : > { %v2856_v42 = vpack.c.bf16 %v3092_v41, %v3092_v41  ;;  %v3928_v44 = vpop.f32.mrf.mxu1  ;;  %v867_v51 = vmul.f32 %v3092_v41, %v3092_v41  ;;  %v827_v59 = vsel %vm701_vm3, %v3092_v41, 0.0 }
 0x1e2   : > { %v760_v43 = vpop.f32.mrf.mxu0  ;;  %v2864_v47 = vpack.c.bf16 %v3928_v44, %v3928_v44 }
 0x1e3   : > { %992 = vst.msk [vmem:[%s3930_s13 + $0x8] sm:$0xf] %vm989_vm4, %v2856_v42  ;;  %v2854_v45 = vpack.c.bf16 %v760_v43, %v760_v43  ;;  %v3936_v48 = vpop.f32.mrf.mxu1  ;;  %v865_v49 = vmul.f32 %v760_v43, %v760_v43  ;;  %v824_v55 = vsel %vm701_vm3, %v760_v43, 0.0  ;;  %v884_v8 = vsel %vm701_vm3, %v867_v51, 0.0 }
 0x1e4   : > { %v3093_v46 = vpop.f32.mrf.mxu0  ;;  %1000 = vst.msk [vmem:[%s3930_s13 + $0x28] sm:$0xf] %vm989_vm4, %v2864_v47  ;;  %v2862_v53 = vpack.c.bf16 %v3936_v48, %v3936_v48  ;;  %v873_v41 = vmul.f32 %v3936_v48, %v3936_v48  ;;  %v839_v47 = vsel %vm701_vm3, %v3936_v48, 0.0 }
 0x1e5   : > { %990 = vst.msk [vmem:[%s3930_s13] sm:$0xf] %vm989_vm4, %v2854_v45  ;;  %v2857_v50 = vpack.c.bf16 %v3093_v46, %v3093_v46  ;;  %v3944_v54 = vpop.f32.mrf.mxu1  ;;  %v881_v63 = vsel %vm701_vm3, %v865_v49, 0.0  ;;  %v868_v0 = vmul.f32 %v3093_v46, %v3093_v46  ;;  %v829_v9 = vsel %vm701_vm3, %v3093_v46, 0.0 }
 0x1e6   : > { %v763_v52 = vpop.f32.mrf.mxu0  ;;  %998 = vst.msk [vmem:[%s3930_s13 + $0x20] sm:$0xf] %vm989_vm4, %v2862_v53  ;;  %v2865_v6 = vpack.c.bf16 %v3944_v54, %v3944_v54  ;;  %v875_v53 = vmul.f32 %v3928_v44, %v3928_v44 }
 0x1e7   : > { %993 = vst.msk [vmem:[%s3930_s13 + $0xc] sm:$0xf] %vm989_vm4, %v2857_v50  ;;  %v825_v56 = vsel %vm701_vm3, %v763_v52, 0.0  ;;  %v866_v57 = vmul.f32 %v763_v52, %v763_v52  ;;  %v2855_v58 = vpack.c.bf16 %v763_v52, %v763_v52  ;;  %v3953_v62 = vpop.f32.mrf.mxu1  ;;  %v886_v16 = vsel %vm701_vm3, %v868_v0, 0.0 }
 0x1e8   : > { %v826_v60 = vadd.f32 %v825_v56, %v824_v55  ;;  %v3096_v61 = vpop.f32.mrf.mxu0  ;;  %1001 = vst.msk [vmem:[%s3930_s13 + $0x2c] sm:$0xf] %vm989_vm4, %v2865_v6  ;;  %v2863_v23 = vpack.c.bf16 %v3953_v62, %v3953_v62  ;;  %v874_v49 = vmul.f32 %v3953_v62, %v3953_v62  ;;  %v896_v55 = vsel %vm701_vm3, %v873_v41, 0.0 }
 0x1e9   : > { %v882_v1 = vsel %vm701_vm3, %v866_v57, 0.0  ;;  %991 = vst.msk [vmem:[%s3930_s13 + $0x4] sm:$0xf] %vm989_vm4, %v2855_v58  ;;  %v2860_v2 = vpack.c.bf16 %v3096_v61, %v3096_v61  ;;  %v3961_v7 = vpop.f32.mrf.mxu1  ;;  %v871_v19 = vmul.f32 %v3096_v61, %v3096_v61  ;;  %v835_v31 = vsel %vm701_vm3, %v3096_v61, 0.0 }
 0x1ea   : > { %v828_v3 = vadd.f32 %v827_v59, %v826_v60  ;;  %v883_v4 = vadd.f32 %v882_v1, %v881_v63  ;;  %v776_v5 = vpop.f32.mrf.mxu0  ;;  %999 = vst.msk [vmem:[%s3930_s13 + $0x24] sm:$0xf] %vm989_vm4, %v2863_v23  ;;  %v2868_v34 = vpack.c.bf16 %v3961_v7, %v3961_v7  ;;  %v841_v56 = vsel %vm701_vm3, %v3953_v62, 0.0 }
 0x1eb   : > { %996 = vst.msk [vmem:[%s3930_s13 + $0x18] sm:$0xf] %vm989_vm4, %v2860_v2  ;;  %v869_v10 = vmul.f32 %v776_v5, %v776_v5  ;;  %v2858_v11 = vpack.c.bf16 %v776_v5, %v776_v5  ;;  %v808_v15 = vpop.f32.mrf.mxu1  ;;  %v831_v17 = vsel %vm701_vm3, %v776_v5, 0.0  ;;  %v892_v39 = vsel %vm701_vm3, %v871_v19, 0.0 }
 0x1ec   : > { %v885_v12 = vadd.f32 %v884_v8, %v883_v4  ;;  %v830_v13 = vadd.f32 %v829_v9, %v828_v3  ;;  %v3097_v14 = vpop.f32.mrf.mxu0  ;;  %v2866_v37 = vpack.c.bf16 %v808_v15, %v808_v15  ;;  %1004 = vst.msk [vmem:[%s3930_s13 + $0x38] sm:$0xf] %vm989_vm4, %v2868_v34  ;;  %v843_v58 = vsel %vm701_vm3, %v3928_v44, 0.0 }
 0x1ed   : > { %994 = vst.msk [vmem:[%s3930_s13 + $0x10] sm:$0xf] %vm989_vm4, %v2858_v11  ;;  %v2861_v18 = vpack.c.bf16 %v3097_v14, %v3097_v14  ;;  %v3975_v24 = vpop.f32.mrf.mxu1  ;;  %v888_v25 = vsel %vm701_vm3, %v869_v10, 0.0  ;;  %v872_v32 = vmul.f32 %v3097_v14, %v3097_v14  ;;  %v837_v40 = vsel %vm701_vm3, %v3097_v14, 0.0 }
 0x1ee   : > { %v832_v20 = vadd.f32 %v831_v17, %v830_v13  ;;  %v887_v21 = vadd.f32 %v886_v16, %v885_v12  ;;  %v779_v22 = vpop.f32.mrf.mxu0  ;;  %v2869_v42 = vpack.c.bf16 %v3975_v24, %v3975_v24  ;;  %1002 = vst.msk [vmem:[%s3930_s13 + $0x30] sm:$0xf] %vm989_vm4, %v2866_v37  ;;  %v876_v59 = vmul.f32 %v3944_v54, %v3944_v54 }
 0x1ef   : > { %997 = vst.msk [vmem:[%s3930_s13 + $0x1c] sm:$0xf] %vm989_vm4, %v2861_v18  ;;  %v833_v26 = vsel %vm701_vm3, %v779_v22, 0.0  ;;  %v870_v27 = vmul.f32 %v779_v22, %v779_v22  ;;  %v2859_v28 = vpack.c.bf16 %v779_v22, %v779_v22  ;;  %v811_v38 = vpop.f32.mrf.mxu1  ;;  %v894_v46 = vsel %vm701_vm3, %v872_v32, 0.0 }
 0x1f0   : > { %v889_v29 = vadd.f32 %v888_v25, %v887_v21  ;;  %v834_v30 = vadd.f32 %v833_v26, %v832_v20  ;;  %1005 = vst.msk [vmem:[%s3930_s13 + $0x3c] sm:$0xf] %vm989_vm4, %v2869_v42  ;;  %v2867_v50 = vpack.c.bf16 %v811_v38, %v811_v38  ;;  %v898_v60 = vsel %vm701_vm3, %v874_v49, 0.0 }
 0x1f1   : > { %v890_v33 = vsel %vm701_vm3, %v870_v27, 0.0  ;;  %995 = vst.msk [vmem:[%s3930_s13 + $0x14] sm:$0xf] %vm989_vm4, %v2859_v28  ;;  %v900_v0 = vsel %vm701_vm3, %v875_v53, 0.0  ;;  %v845_v1 = vsel %vm701_vm3, %v3944_v54, 0.0  ;;  %v877_v62 = vmul.f32 %v808_v15, %v808_v15 }
 0x1f2   : > { %v836_v35 = vadd.f32 %v835_v31, %v834_v30  ;;  %v891_v36 = vadd.f32 %v890_v33, %v889_v29  ;;  %1003 = vst.msk [vmem:[%s3930_s13 + $0x34] sm:$0xf] %vm989_vm4, %v2867_v50  ;;  %v902_v4 = vsel %vm701_vm3, %v876_v59, 0.0  ;;  %v847_v5 = vsel %vm701_vm3, %v808_v15, 0.0  ;;  %v823_v33 = vld [vmem:[#allocation2] sm:$0x1] }
 0x1f3   : > { %v878_v44 = vmul.f32 %v811_v38, %v811_v38  ;;  %v879_v9 = vmul.f32 %v3961_v7, %v3961_v7  ;;  %v904_v10 = vsel %vm701_vm3, %v877_v62, 0.0  ;;  %v849_v11 = vsel %vm701_vm3, %v811_v38, 0.0 }
 0x1f4   : > { %v838_v43 = vadd.f32 %v837_v40, %v836_v35  ;;  %v893_v45 = vadd.f32 %v892_v39, %v891_v36  ;;  %v851_v54 = vsel %vm701_vm3, %v3961_v7, 0.0  ;;  %v880_v14 = vmul.f32 %v3975_v24, %v3975_v24  ;;  %v864_v36 = vld [vmem:[#allocation3] sm:$0x1] }
 0x1f5   : > { %v906_v15 = vsel %vm701_vm3, %v878_v44, 0.0  ;;  %v908_v18 = vsel %vm701_vm3, %v879_v9, 0.0  ;;  %v853_v19 = vsel %vm701_vm3, %v3975_v24, 0.0 }
 0x1f6   : > { %v895_v51 = vadd.f32 %v894_v46, %v893_v45  ;;  %v840_v52 = vadd.f32 %v839_v47, %v838_v43  ;;  %v910_v22 = vsel %vm701_vm3, %v880_v14, 0.0 }
 0x1f8   : > { %v842_v57 = vadd.f32 %v841_v56, %v840_v52  ;;  %v897_v48 = vadd.f32 %v896_v55, %v895_v51 }
 0x1fa   : > { %v844_v61 = vadd.f32 %v843_v58, %v842_v57  ;;  %v899_v63 = vadd.f32 %v898_v60, %v897_v48 }
 0x1fc   : > { %v901_v2 = vadd.f32 %v900_v0, %v899_v63  ;;  %v846_v3 = vadd.f32 %v845_v1, %v844_v61 }
 0x1fe   : > { %v848_v6 = vadd.f32 %v847_v5, %v846_v3  ;;  %v903_v8 = vadd.f32 %v902_v4, %v901_v2 }
 0x200   : > { %v905_v12 = vadd.f32 %v904_v10, %v903_v8  ;;  %v850_v13 = vadd.f32 %v849_v11, %v848_v6 }
 0x202   : > { %v852_v16 = vadd.f32 %v851_v54, %v850_v13  ;;  %v907_v17 = vadd.f32 %v906_v15, %v905_v12 }
 0x204   : > { %v854_v20 = vadd.f32 %v853_v19, %v852_v16  ;;  %v909_v21 = vadd.f32 %v908_v18, %v907_v17 }
 0x206   : > { %v855_v23 = vrot.slane %v854_v20, 4  ;;  %v911_v25 = vadd.f32 %v910_v22, %v909_v21 }
 0x208   : > { %v856_v26 = vadd.f32 %v855_v23, %v854_v20  ;;  %v912_v7 = vrot.slane %v911_v25, 4 }
 0x20a   : > { %v857_v27 = vrot.slane %v856_v26, 2  ;;  %v913_v28 = vadd.f32 %v912_v7, %v911_v25 }
 0x20c   : > { %v858_v29 = vadd.f32 %v857_v27, %v856_v26  ;;  %v914_v30 = vrot.slane %v913_v28, 2 }
 0x20e   : > { %v859_v31 = vrot.slane %v858_v29, 1  ;;  %v915_v32 = vadd.f32 %v914_v30, %v913_v28 }
 0x210   : > { %v860_v34 = vadd.f32 %v859_v31, %v858_v29  ;;  %v916_v35 = vrot.slane %v915_v32, 1 }
 0x212   : > { %v861_v24 = vadd.f32 %v860_v34, %v823_v33  ;;  %v917_v37 = vadd.f32 %v916_v35, %v915_v32 }
 0x214   : > { %863 = vst.msk [vmem:[#allocation2] sm:$0x1] %vm862_vm5, %v861_v24  ;;  %v918_v38 = vadd.f32 %v917_v37, %v864_v36 }
 0x216   : > { %919 = vst.msk [vmem:[#allocation3] sm:$0x1] %vm862_vm5, %v918_v38 }
 0x217 PF: > { %p1006_p13 = scmp.eq.s32.totalorder %s3634_s20, 1 }
 0x219   : > { %p1007_p0 = pnand %p1006_p13, %p460_p8 }
 0x21a   : > { %s3661_s22 = smov (!%p1007_p0), 120  }
 0x21b   : > { %1010 = sbr.rel (%p1007_p0) target bundleno = 886 (0x376), region = 68 }
 0x220   : > { %v1012_v39 = vld [vmem:[#allocation2] sm:$0x1]  ;;  %v1014_v40 = vld [vmem:[#allocation3] sm:$0x1]  ;;  %v1028_v43 = vld [vmem:[#allocation5] sm:$0xf]  ;;  %v1078_v55 = vlaneseq }
 0x221   : > { %v1013_v41 = vmul.f32 0.00390625, %v1012_v39  ;;  %v1015_v42 = vmul.f32 0.00390625, %v1014_v40  ;;  %vm1034_vm6 = vcmask 1043456   ;;  %v3659_v45 = vmov 0.0   ;;  %v1029_v47 = vld [vmem:[#allocation5 + $0x4] sm:$0xf] }
 0x222   : > { %1011 = vst [vmem:[%s3886_s17] sm:$0x3] %v3659_v45  ;;  %3106 = vmatprep.subr.bf16.mxu0 %v3659_v45  ;;  %v1036_v46 = vsel %vm1034_vm6, %v1028_v43, 0  ;;  %3111 = vmatprep.subr.bf16.mxu1 %v3659_v45  ;;  %vm3660_vm7 = vmmov 0   ;;  %v1087_v50 = vsel %vm1034_vm6, %v1029_v47, 0  ;;  %v1079_v56 = vshrl.u32 %v1078_v55, 7 }
 0x223   : > { %v1016_v49 = vmul.f32 %v1013_v41, %v1013_v41  ;;  %3107 = vmatpush3.bf16.msra.mxu0 %v1036_v46  ;;  %3108 = vmatprep.mubr.msk.f32.mxu0 %vm3660_vm7, %v3659_v45  ;;  %vm1022_vm8 = vcmask 122880   ;;  %vm1030_vm9 = vcmask 64512   ;;  %v1025_v63 = vld [vmem:[%s3872_s15] sm:$0x1] }
 0x224   : > { %3112 = vmatpush3.bf16.msra.mxu1 %v1087_v50  ;;  %3113 = vmatprep.mubr.msk.f32.mxu1 %vm3660_vm7, %v3659_v45  ;;  %v1080_v58 = vsub.s32 0, %v1079_v56  ;;  %v1026_v0 = vmul.f32 10000.0, %v1025_v63 }
 0x225   : > { %v1017_v51 = vsub.f32 %v1015_v42, %v1016_v49 }
 0x226   : > { %v2753_v1 = vadd.f32 -10000.0, %v1026_v0 }
 0x227   : > { %v1018_v52 = vmax.f32 %v1017_v51, 0.0 }
 0x229   : > { %v1019_v53 = vadd.f32 1e-05, %v1018_v52 }
 0x22b   : > { %3353 = vrsqrt.f32 %v1019_v53 }
 0x238   : > { %v3354_v57 = vpop.eup %3353 }
 0x239   : > { %v1021_v48 = vmul.f32 0.25, %v3354_v57 }
 0x23b   : > { %1023 = vst.msk [vmem:[#allocation4] sm:$0x1] %vm1022_vm8, %v1021_v48  ;;  %v1024_v59 = vmul.f32 %v1021_v48, %v1013_v41 }
 0x23d   : > { %v1081_v60 = vrot.slane %v1024_v59, %v1080_v58  ;;  %3109 = vmatmul.mubr.msk.f32.vlgmr.msra.gmra.mxu0 %vm1030_vm9, %v1024_v59 }
 0x23f   : > { %1082 = vrot.lane.b32.xlu0 %v1081_v60, %s3661_s22 }
 0x2b1   : > { %v1083_v61 = vpop.permute.xlu0 %1082 }
 0x2b2   : > { %3114 = vmatmul.mubr.msk.f32.vlgmr.msra.gmra.mxu1 %vm1030_vm9, %v1083_v61 }
 0x2fd   : > { %v1072_v62 = vpop.f32.mrf.mxu0 }
 0x2fe   : > { %v1076_v2 = vsub.f32 %v2753_v1, %v1072_v62 }
 0x2ff   : > { %v3110_v3 = vpop.f32.mrf.mxu0 }
 0x300   : > { %1077 = vst [vmem:[#allocation7] sm:$0x1] %v1076_v2 }
 0x372   : > { %v1123_v4 = vpop.f32.mrf.mxu1 }
 0x373   : > { %v1127_v5 = vsub.f32 %v2753_v1, %v1123_v4 }
 0x374   : > { %v3115_v44 = vpop.f32.mrf.mxu1 }
 0x375   : > { %1128 = vst [vmem:[#allocation7 + $0x1] sm:$0x1] %v1127_v5 }
 0x376 PF: > { %p2756_p3 = scmp.ne.s32.totalorder %s3634_s20, 1 }
 0x377   : > { %s2757_s24 = sshll.u32 (!%p2756_p3), %s3630_s19, 7  ;;  %s3662_s11 = smov (!%p2756_p3), 120  }
 0x378   : > { %1131 = sbr.rel (%p2756_p3) target bundleno = 2113 (0x841), region = 72  ;;  %s1133_s15 = sshra.s32 (!%p2756_p3), %s2757_s24, 3 }
 0x379   : > { %s2758_s25 = sshll.u32 (!%p2756_p3), %s1133_s15, 2  ;;  %s3663_s10 = smov (!%p2756_p3), 8  }
 0x37a   : > { %s1136_s30 = scalar_lea.vmem (!%p2756_p3), [#allocation9], %s2758_s25 }
 0x37d   : > { %v1200_v6 = vld [vmem:[#allocation5] sm:$0xf]  ;;  %vm1234_vm10 = vcmask 1043456   ;;  %v1201_v9 = vld [vmem:[#allocation5 + $0x4] sm:$0xf]  ;;  %vm1209_vm11 = vcmask 64512   ;;  %v1205_v4 = vlaneseq }
 0x37e   : > { %3210 = vmatprep.subr.msk.bf16.mxu0 %vm1234_vm10, %v1200_v6  ;;  %v1236_v8 = vsel %vm1234_vm10, %v1200_v6, 0  ;;  %3211 = vmatprep.subr.msk.bf16.mxu1 %vm1234_vm10, %v1200_v6  ;;  %v2759_v10 = vld [vmem:[#allocation4] ss:$0 sm:$0xff]  ;;  %v3000_v12 = vld [vmem:[%s1136_s30 + $0x8] sm:$0xff]   ;;  %v3001_v13 = vld [vmem:[%s1136_s30 + $0x10] sm:$0xff]   ;;  %v1718_v32 = vsel %vm1234_vm10, %v1201_v9, 0 }
 0x37f   : > { %3117 = vmatpush3.bf16.msra.mxu0 %v1236_v8  ;;  %3209 = vmatpush3.bf16.msra.mxu1 %v1236_v8  ;;  %v2929_v11 = vld [vmem:[%s1136_s30] sm:$0xff]   ;;  %v2934_v15 = vunpack.c.l.bf16 %v3000_v12  ;;  %v2935_v16 = vunpack.c.h.bf16 %v3000_v12  ;;  %v3002_v17 = vld [vmem:[%s1136_s30 + $0x18] sm:$0xff]   ;;  %v2938_v18 = vunpack.c.l.bf16 %v3001_v13  ;;  %v2939_v19 = vunpack.c.h.bf16 %v3001_v13  ;;  %v3004_v27 = vld [vmem:[%s1136_s30 + $0x28] sm:$0xff]  }
 0x380   : > { %3212 = vmatprep.subr.msk.bf16.mxu0 %vm1234_vm10, %v1201_v9  ;;  %v2930_v54 = vunpack.c.l.bf16 %v2929_v11  ;;  %v2931_v14 = vunpack.c.h.bf16 %v2929_v11  ;;  %v2942_v20 = vunpack.c.l.bf16 %v3002_v17  ;;  %v2943_v21 = vunpack.c.h.bf16 %v3002_v17  ;;  %v3003_v22 = vld [vmem:[%s1136_s30 + $0x20] sm:$0xff]   ;;  %v3005_v31 = vld [vmem:[%s1136_s30 + $0x30] sm:$0xff]   ;;  %v3006_v24 = vld [vmem:[%s1136_s30 + $0x38] sm:$0xff]  }
 0x381   : > { %v1178_v26 = vmul.f32 %v2934_v15, %v2759_v10  ;;  %v1179_v7 = vmul.f32 %v2935_v16, %v2759_v10  ;;  %v1180_v28 = vmul.f32 %v2938_v18, %v2759_v10  ;;  %v1181_v29 = vmul.f32 %v2939_v19, %v2759_v10  ;;  %v1204_v6 = vld [vmem:[#allocation7] sm:$0x3] }
 0x382   : > { %v1176_v23 = vmul.f32 %v2930_v54, %v2759_v10  ;;  %v1177_v25 = vmul.f32 %v2931_v14, %v2759_v10  ;;  %v1182_v30 = vmul.f32 %v2942_v20, %v2759_v10  ;;  %v2946_v35 = vunpack.c.l.bf16 %v3003_v22 }
 0x383   : > { %v1193_v34 = vpack.c.bf16 %v1179_v7, %v1178_v26  ;;  %v2947_v36 = vunpack.c.h.bf16 %v3003_v22  ;;  %v1194_v37 = vpack.c.bf16 %v1181_v29, %v1180_v28  ;;  %v1183_v38 = vmul.f32 %v2943_v21, %v2759_v10 }
 0x384   : > { %v1192_v33 = vpack.c.bf16 %v1177_v25, %v1176_v23  ;;  %v2950_v39 = vunpack.c.l.bf16 %v3004_v27  ;;  %v2951_v40 = vunpack.c.h.bf16 %v3004_v27  ;;  %v1184_v41 = vmul.f32 %v2946_v35, %v2759_v10 }
 0x385   : > { %v1185_v42 = vmul.f32 %v2947_v36, %v2759_v10  ;;  %v2954_v43 = vunpack.c.l.bf16 %v3005_v31  ;;  %v2955_v45 = vunpack.c.h.bf16 %v3005_v31  ;;  %1681 = vrot.lane.b32.xlu1 %v1194_v37, %s3662_s11  ;;  %v2958_v49 = vunpack.c.l.bf16 %v3006_v24 }
 0x386   : > { %1677 = vrot.lane.b32.xlu0 %v1192_v33, %s3662_s11  ;;  %3118 = vmatprep.mubr.msk.bf16.mxu0 %vm1209_vm11, %v1192_v33  ;;  %v1186_v46 = vmul.f32 %v2950_v39, %v2759_v10  ;;  %v1187_v47 = vmul.f32 %v2951_v40, %v2759_v10  ;;  %v2959_v50 = vunpack.c.h.bf16 %v3006_v24  ;;  %v1195_v55 = vpack.c.bf16 %v1183_v38, %v1182_v30 }
 0x387   : > { %3119 = vmatmul.mubr.msk.bf16.vlgmr.msra.gmra.mxu0 %vm1209_vm11, %v1193_v34  ;;  %v1196_v51 = vpack.c.bf16 %v1185_v42, %v1184_v41  ;;  %v1188_v52 = vmul.f32 %v2954_v43, %v2759_v10  ;;  %v1189_v53 = vmul.f32 %v2955_v45, %v2759_v10  ;;  %v1190_v48 = vmul.f32 %v2958_v49, %v2759_v10 }
 0x388   : > { %3122 = vmatprep.mubr.msk.bf16.mxu0 %vm1209_vm11, %v1194_v37  ;;  %3153 = vmatpush3.bf16.msra.mxu0 %v1718_v32  ;;  %v1197_v56 = vpack.c.bf16 %v1187_v47, %v1186_v46  ;;  %v1191_v58 = vmul.f32 %v2959_v50, %v2759_v10  ;;  %v1206_v5 = vshrl.u32 %v1205_v4, 7  ;;  %vm1648_vm12 = vcmask 60416  }
 0x389   : > { %3126 = vmatprep.mubr.msk.bf16.mxu1 %vm1209_vm11, %v1196_v51  ;;  %v1198_v57 = vpack.c.bf16 %v1189_v53, %v1188_v52  ;;  %1683 = vrot.lane.b32.xlu1 %v1195_v55, %s3662_s11  ;;  %vm2162_vm13 = vcmask 126016   ;;  %vm2243_vm14 = vcmask 130048  }
 0x38a   : > { %1679 = vrot.lane.b32.xlu0 %v1193_v34, %s3662_s11  ;;  %3127 = vmatmul.mubr.msk.bf16.vlgmr.msra.gmra.mxu1 %vm1209_vm11, %v1197_v56  ;;  %v1199_v59 = vpack.c.bf16 %v1191_v58, %v1190_v48  ;;  %v1207_v44 = vsub.s32 0, %v1206_v5  ;;  %v1667_v39 = vsub.s32 1, %v1206_v5 }
 0x38b   : > { %3130 = vmatprep.mubr.msk.bf16.mxu1 %vm1209_vm11, %v1198_v57 }
 0x38c   : > { %v1208_v8 = vrot.slane %v1204_v6, %v1207_v44  ;;  %v1668_v41 = vrot.slane %v1204_v6, %v1667_v39 }
 0x38d   : > { %1687 = vrot.lane.b32.xlu1 %v1197_v56, %s3662_s11 }
 0x38e   : > { %1685 = vrot.lane.b32.xlu0 %v1196_v51, %s3662_s11 }
 0x38f   : > { %3123 = vmatmul.mubr.msk.bf16.gmra.mxu0 %vm1209_vm11, %v1195_v55 }
 0x391   : > { %1691 = vrot.lane.b32.xlu1 %v1199_v59, %s3662_s11 }
 0x392   : > { %1689 = vrot.lane.b32.xlu0 %v1198_v57, %s3662_s11  ;;  %3131 = vmatmul.mubr.msk.bf16.gmra.mxu1 %vm1209_vm11, %v1199_v59 }
 0x3f7   : > { %v1682_v61 = vpop.permute.xlu1 %1681 }
 0x3f8   : > { %v1678_v60 = vpop.permute.xlu0 %1677 }
 0x3f9   : > { %3154 = vmatprep.mubr.msk.bf16.mxu0 %vm1209_vm11, %v1678_v60 }
 0x3fb   : > { %v1684_v0 = vpop.permute.xlu1 %1683 }
 0x3fc   : > { %v1680_v63 = vpop.permute.xlu0 %1679 }
 0x3fd   : > { %3155 = vmatmul.mubr.msk.bf16.vlgmr.msra.gmra.mxu0 %vm1209_vm11, %v1680_v63 }
 0x3fe   : > { %3158 = vmatprep.mubr.msk.bf16.mxu0 %vm1209_vm11, %v1682_v61 }
 0x3ff   : > { %v1688_v62 = vpop.permute.xlu1 %1687 }
 0x400   : > { %v1686_v1 = vpop.permute.xlu0 %1685 }
 0x403   : > { %v1692_v3 = vpop.permute.xlu1 %1691 }
 0x404   : > { %v1690_v2 = vpop.permute.xlu0 %1689 }
 0x405   : > { %3159 = vmatmul.mubr.msk.bf16.gmra.mxu0 %vm1209_vm11, %v1684_v0 }
 0x406   : > { %3162 = vmatprep.mubr.msk.bf16.mxu0 %vm1209_vm11, %v1686_v1 }
 0x40d   : > { %3163 = vmatmul.mubr.msk.bf16.gmra.mxu0 %vm1209_vm11, %v1688_v62 }
 0x40e   : > { %3166 = vmatprep.mubr.msk.bf16.mxu0 %vm1209_vm11, %v1690_v2 }
 0x415   : > { %3167 = vmatmul.mubr.msk.bf16.gmra.mxu0 %vm1209_vm11, %v1692_v3 }
 0x447   : > { %v3120_v9 = vpop.f32.mrf.mxu0 }
 0x448   : > { %v4074_v54 = vadd.f32 %v3120_v9, %v1208_v8 }
 0x449   : > { %v1272_v10 = vpop.f32.mrf.mxu0 }
 0x44a   : > { %v4072_v11 = vadd.f32 %v1272_v10, %v1208_v8  ;;  %v3128_v13 = vpop.f32.mrf.mxu1 }
 0x44b   : > { %v3121_v12 = vpop.f32.mrf.mxu0  ;;  %v4097_v31 = vadd.f32 %v3128_v13, %v1208_v8 }
 0x44c   : > { %1335 = vmax.xlane.f32.xlu0 %v4072_v11  ;;  %v1304_v15 = vpop.f32.mrf.mxu1  ;;  %v4079_v19 = vadd.f32 %v3121_v12, %v1208_v8 }
 0x44d   : > { %v1275_v14 = vpop.f32.mrf.mxu0  ;;  %v4095_v29 = vadd.f32 %v1304_v15, %v1208_v8 }
 0x44e   : > { %v4077_v16 = vadd.f32 %v1275_v14, %v1208_v8  ;;  %v3129_v18 = vpop.f32.mrf.mxu1 }
 0x44f   : > { %v3124_v17 = vpop.f32.mrf.mxu0  ;;  %v4103_v34 = vadd.f32 %v3129_v18, %v1208_v8 }
 0x450   : > { %1337 = vmax.xlane.f32.xlu1 %v4077_v16  ;;  %1339 = vmax.xlane.f32.xlu0 %v4074_v54  ;;  %v1307_v21 = vpop.f32.mrf.mxu1  ;;  %v4085_v25 = vadd.f32 %v3124_v17, %v1208_v8 }
 0x451   : > { %v1288_v20 = vpop.f32.mrf.mxu0  ;;  %v4101_v32 = vadd.f32 %v1307_v21, %v1208_v8 }
 0x452   : > { %v4083_v22 = vadd.f32 %v1288_v20, %v1208_v8  ;;  %v3132_v7 = vpop.f32.mrf.mxu1 }
 0x453   : > { %v3125_v23 = vpop.f32.mrf.mxu0  ;;  %v4109_v24 = vadd.f32 %v3132_v7, %v1208_v8 }
 0x454   : > { %1343 = vmax.xlane.f32.xlu1 %v4083_v22  ;;  %1341 = vmax.xlane.f32.xlu0 %v4079_v19  ;;  %v4091_v28 = vadd.f32 %v3125_v23, %v1208_v8  ;;  %v1320_v30 = vpop.f32.mrf.mxu1 }
 0x455   : > { %v1291_v26 = vpop.f32.mrf.mxu0  ;;  %v4107_v35 = vadd.f32 %v1320_v30, %v1208_v8 }
 0x456   : > { %v4089_v27 = vadd.f32 %v1291_v26, %v1208_v8  ;;  %v3133_v33 = vpop.f32.mrf.mxu1 }
 0x457   : > { %v4115_v38 = vadd.f32 %v3133_v33, %v1208_v8 }
 0x458   : > { %1347 = vmax.xlane.f32.xlu1 %v4085_v25  ;;  %1345 = vmax.xlane.f32.xlu0 %v4089_v27  ;;  %v1323_v36 = vpop.f32.mrf.mxu1 }
 0x459   : > { %v4113_v37 = vadd.f32 %v1323_v36, %v1208_v8 }
 0x45c   : > { %1351 = vmax.xlane.f32.xlu1 %v4095_v29  ;;  %1349 = vmax.xlane.f32.xlu0 %v4091_v28 }
 0x460   : > { %1355 = vmax.xlane.f32.xlu1 %v4097_v31  ;;  %1353 = vmax.xlane.f32.xlu0 %v4101_v32 }
 0x464   : > { %1359 = vmax.xlane.f32.xlu1 %v4107_v35  ;;  %1357 = vmax.xlane.f32.xlu0 %v4103_v34 }
 0x468   : > { %1363 = vmax.xlane.f32.xlu1 %v4109_v24  ;;  %1361 = vmax.xlane.f32.xlu0 %v4113_v37 }
 0x46c   : > { %1365 = vmax.xlane.f32.xlu0 %v4115_v38 }
 0x4bd   : > { %v3156_v40 = vpop.f32.mrf.mxu0 }
 0x4be   : > { %v4123_v47 = vadd.f32 %v3156_v40, %v1668_v41 }
 0x4bf   : > { %v1754_v42 = vpop.f32.mrf.mxu0 }
 0x4c0   : > { %v4120_v43 = vadd.f32 %v1754_v42, %v1668_v41 }
 0x4c1   : > { %v3157_v45 = vpop.f32.mrf.mxu0 }
 0x4c2   : > { %1817 = vmax.xlane.f32.xlu1 %v4120_v43  ;;  %v4129_v52 = vadd.f32 %v3157_v45, %v1668_v41 }
 0x4c3   : > { %v1757_v46 = vpop.f32.mrf.mxu0 }
 0x4c4   : > { %v4125_v49 = vadd.f32 %v1757_v46, %v1668_v41 }
 0x4c5   : > { %v3160_v50 = vpop.f32.mrf.mxu0 }
 0x4c6   : > { %1821 = vmax.xlane.f32.xlu1 %v4123_v47  ;;  %1819 = vmax.xlane.f32.xlu0 %v4125_v49  ;;  %v4135_v57 = vadd.f32 %v3160_v50, %v1668_v41 }
 0x4c7   : > { %v1770_v51 = vpop.f32.mrf.mxu0 }
 0x4c8   : > { %v4131_v53 = vadd.f32 %v1770_v51, %v1668_v41 }
 0x4c9   : > { %v3161_v55 = vpop.f32.mrf.mxu0 }
 0x4ca   : > { %1825 = vmax.xlane.f32.xlu1 %v4131_v53  ;;  %1823 = vmax.xlane.f32.xlu0 %v4129_v52  ;;  %v4141_v60 = vadd.f32 %v3161_v55, %v1668_v41 }
 0x4cb   : > { %v1773_v56 = vpop.f32.mrf.mxu0 }
 0x4cc   : > { %v4137_v48 = vadd.f32 %v1773_v56, %v1668_v41 }
 0x4cd   : > { %v3164_v58 = vpop.f32.mrf.mxu0 }
 0x4ce   : > { %1829 = vmax.xlane.f32.xlu1 %v4135_v57  ;;  %1827 = vmax.xlane.f32.xlu0 %v4137_v48  ;;  %v4147_v1 = vadd.f32 %v3164_v58, %v1668_v41 }
 0x4cf   : > { %v1786_v59 = vpop.f32.mrf.mxu0 }
 0x4d0   : > { %v4143_v61 = vadd.f32 %v1786_v59, %v1668_v41 }
 0x4d1   : > { %v3165_v63 = vpop.f32.mrf.mxu0 }
 0x4d2   : > { %1833 = vmax.xlane.f32.xlu1 %v4143_v61  ;;  %1831 = vmax.xlane.f32.xlu0 %v4141_v60  ;;  %v4154_v44 = vadd.f32 %v3165_v63, %v1668_v41 }
 0x4d3   : > { %v1789_v0 = vpop.f32.mrf.mxu0 }
 0x4d4   : > { %v4149_v62 = vadd.f32 %v1789_v0, %v1668_v41 }
 0x4d5   : > { %v3168_v2 = vpop.f32.mrf.mxu0  ;;  %v1336_v3 = vpop.xlane.xlu0 %1335 }
 0x4d6   : > { %v1367_v4 = vsub.f32 %v4072_v11, %v1336_v3  ;;  %1837 = vmax.xlane.f32.xlu1 %v4147_v1  ;;  %1835 = vmax.xlane.f32.xlu0 %v4149_v62  ;;  %v4162_v15 = vadd.f32 %v3168_v2, %v1668_v41 }
 0x4d7   : > { %v1802_v5 = vpop.f32.mrf.mxu0 }
 0x4d8   : > { %v1383_v6 = vmul.f32 1.442695, %v1367_v4  ;;  %v4156_v8 = vadd.f32 %v1802_v5, %v1668_v41 }
 0x4d9   : > { %v3169_v9 = vpop.f32.mrf.mxu0  ;;  %v1338_v10 = vpop.xlane.xlu1 %1337 }
 0x4da   : > { %3364 = vpow2.f32 %v1383_v6  ;;  %v1368_v12 = vsub.f32 %v4077_v16, %v1338_v10  ;;  %v1340_v13 = vpop.xlane.xlu0 %1339  ;;  %1841 = vmax.xlane.f32.xlu1 %v4156_v8  ;;  %1839 = vmax.xlane.f32.xlu0 %v4154_v44 }
 0x4db   : > { %v1369_v11 = vsub.f32 %v4074_v54, %v1340_v13  ;;  %v1805_v14 = vpop.f32.mrf.mxu0  ;;  %v4170_v54 = vadd.f32 %v3169_v9, %v1668_v41 }
 0x4dc   : > { %v1385_v17 = vmul.f32 1.442695, %v1368_v12  ;;  %v4164_v18 = vadd.f32 %v1805_v14, %v1668_v41 }
 0x4dd   : > { %v1387_v20 = vmul.f32 1.442695, %v1369_v11  ;;  %v1344_v21 = vpop.xlane.xlu1 %1343 }
 0x4de   : > { %3366 = vpow2.f32 %v1385_v17  ;;  %v1371_v23 = vsub.f32 %v4083_v22, %v1344_v21  ;;  %v1342_v26 = vpop.xlane.xlu0 %1341  ;;  %1845 = vmax.xlane.f32.xlu1 %v4162_v15  ;;  %1843 = vmax.xlane.f32.xlu0 %v4164_v18 }
 0x4df   : > { %3368 = vpow2.f32 %v1387_v20  ;;  %v1370_v16 = vsub.f32 %v4079_v19, %v1342_v26 }
 0x4e0   : > { %v1391_v7 = vmul.f32 1.442695, %v1371_v23 }
 0x4e1   : > { %v1389_v30 = vmul.f32 1.442695, %v1370_v16  ;;  %v1348_v33 = vpop.xlane.xlu1 %1347 }
 0x4e2   : > { %3370 = vpow2.f32 %v1391_v7  ;;  %v1373_v36 = vsub.f32 %v4085_v25, %v1348_v33  ;;  %v1346_v39 = vpop.xlane.xlu0 %1345  ;;  %1847 = vmax.xlane.f32.xlu0 %v4170_v54  ;;  %v1202_v33 = vld [vmem:[#allocation6] sm:$0xf] }
 0x4e3   : > { %3372 = vpow2.f32 %v1389_v30  ;;  %v1372_v22 = vsub.f32 %v4089_v27, %v1346_v39  ;;  %3134 = vmatprep.subr.bf16.mxu1 %v1202_v33  ;;  %v4232_v39 = vld [vmem:[#allocation6 + $0x4] sm:$0xf] }
 0x4e4   : > { %v1395_v40 = vmul.f32 1.442695, %v1373_v36  ;;  %3135 = vmatpush3.bf16.xpose.msra.mxu1 %v1202_v33 }
 0x4e5   : > { %v1393_v42 = vmul.f32 1.442695, %v1372_v22  ;;  %v1352_v45 = vpop.xlane.xlu1 %1351  ;;  %3170 = vmatprep.subr.bf16.mxu1 %v4232_v39 }
 0x4e6   : > { %3374 = vpow2.f32 %v1395_v40  ;;  %v1375_v19 = vsub.f32 %v4095_v29, %v1352_v45  ;;  %v1350_v41 = vpop.xlane.xlu0 %1349 }
 0x4e7   : > { %v4176_v46 = vpop.eup %3364  ;;  %3376 = vpow2.f32 %v1393_v42  ;;  %v1374_v50 = vsub.f32 %v4091_v28, %v1350_v41 }
 0x4e8   : > { %v1399_v51 = vmul.f32 1.442695, %v1375_v19  ;;  %1415 = vadd.xlane.f32.xlu1 %v4176_v46 }
 0x4e9   : > { %v1397_v25 = vmul.f32 1.442695, %v1374_v50  ;;  %v1356_v55 = vpop.xlane.xlu1 %1355 }
 0x4ea   : > { %3378 = vpow2.f32 %v1399_v51  ;;  %v1377_v27 = vsub.f32 %v4097_v31, %v1356_v55  ;;  %v1354_v56 = vpop.xlane.xlu0 %1353 }
 0x4eb   : > { %v4181_v58 = vpop.eup %3366  ;;  %3380 = vpow2.f32 %v1397_v25  ;;  %v1376_v29 = vsub.f32 %v4101_v32, %v1354_v56 }
 0x4ec   : > { %v4184_v59 = vpop.eup %3368  ;;  %v1403_v63 = vmul.f32 1.442695, %v1377_v27  ;;  %1417 = vadd.xlane.f32.xlu0 %v4181_v58 }
 0x4ed   : > { %v1401_v28 = vmul.f32 1.442695, %v1376_v29  ;;  %1419 = vadd.xlane.f32.xlu1 %v4184_v59  ;;  %v1360_v0 = vpop.xlane.xlu1 %1359 }
 0x4ee   : > { %3382 = vpow2.f32 %v1403_v63  ;;  %v1379_v2 = vsub.f32 %v4107_v35, %v1360_v0  ;;  %v1358_v3 = vpop.xlane.xlu0 %1357 }
 0x4ef   : > { %v4189_v31 = vpop.eup %3370  ;;  %3384 = vpow2.f32 %v1401_v28  ;;  %v1378_v4 = vsub.f32 %v4103_v34, %v1358_v3 }
 0x4f0   : > { %v4192_v5 = vpop.eup %3372  ;;  %v1407_v32 = vmul.f32 1.442695, %v1379_v2 }
 0x4f1   : > { %v1405_v6 = vmul.f32 1.442695, %v1378_v4  ;;  %1423 = vadd.xlane.f32.xlu1 %v4189_v31  ;;  %1421 = vadd.xlane.f32.xlu0 %v4192_v5  ;;  %v1364_v9 = vpop.xlane.xlu1 %1363 }
 0x4f2   : > { %3386 = vpow2.f32 %v1407_v32  ;;  %v1381_v10 = vsub.f32 %v4109_v24, %v1364_v9  ;;  %v1362_v12 = vpop.xlane.xlu0 %1361 }
 0x4f3   : > { %v4197_v35 = vpop.eup %3374  ;;  %3388 = vpow2.f32 %v1405_v6  ;;  %v1380_v13 = vsub.f32 %v4113_v37, %v1362_v12 }
 0x4f4   : > { %v4200_v11 = vpop.eup %3376  ;;  %v1411_v34 = vmul.f32 1.442695, %v1381_v10 }
 0x4f5   : > { %v1409_v14 = vmul.f32 1.442695, %v1380_v13  ;;  %1427 = vadd.xlane.f32.xlu1 %v4197_v35  ;;  %1425 = vadd.xlane.f32.xlu0 %v4200_v11 }
 0x4f6   : > { %3390 = vpow2.f32 %v1411_v34  ;;  %v1366_v17 = vpop.xlane.xlu0 %1365 }
 0x4f7   : > { %v4204_v20 = vpop.eup %3378  ;;  %3392 = vpow2.f32 %v1409_v14  ;;  %v1382_v24 = vsub.f32 %v4115_v38, %v1366_v17 }
 0x4f8   : > { %v4207_v21 = vpop.eup %3380 }
 0x4f9   : > { %v1413_v23 = vmul.f32 1.442695, %v1382_v24  ;;  %1431 = vadd.xlane.f32.xlu1 %v4204_v20  ;;  %1429 = vadd.xlane.f32.xlu0 %v4207_v21 }
 0x4fb   : > { %v4211_v37 = vpop.eup %3382  ;;  %3394 = vpow2.f32 %v1413_v23 }
 0x4fc   : > { %v4213_v26 = vpop.eup %3384 }
 0x4fd   : > { %1435 = vadd.xlane.f32.xlu1 %v4211_v37  ;;  %1433 = vadd.xlane.f32.xlu0 %v4213_v26 }
 0x4ff   : > { %v4217_v16 = vpop.eup %3386 }
 0x500   : > { %v4219_v7 = vpop.eup %3388 }
 0x501   : > { %1439 = vadd.xlane.f32.xlu1 %v4217_v16  ;;  %1437 = vadd.xlane.f32.xlu0 %v4219_v7 }
 0x503   : > { %v4223_v38 = vpop.eup %3390 }
 0x504   : > { %v4225_v30 = vpop.eup %3392 }
 0x505   : > { %1443 = vadd.xlane.f32.xlu1 %v4223_v38  ;;  %1441 = vadd.xlane.f32.xlu0 %v4225_v30 }
 0x508   : > { %v4229_v36 = vpop.eup %3394 }
 0x509   : > { %1445 = vadd.xlane.f32.xlu0 %v4229_v36 }
 0x54b   : > { %v1818_v22 = vpop.xlane.xlu1 %1817 }
 0x54c   : > { %v1849_v40 = vsub.f32 %v4120_v43, %v1818_v22 }
 0x54e   : > { %v1865_v42 = vmul.f32 1.442695, %v1849_v40 }
 0x54f   : > { %v1822_v45 = vpop.xlane.xlu1 %1821  ;;  %v1820_v19 = vpop.xlane.xlu0 %1819 }
 0x550   : > { %3396 = vpow2.f32 %v1865_v42  ;;  %v1851_v41 = vsub.f32 %v4123_v47, %v1822_v45  ;;  %v1850_v50 = vsub.f32 %v4125_v49, %v1820_v19 }
 0x552   : > { %v1869_v51 = vmul.f32 1.442695, %v1851_v41  ;;  %v1867_v25 = vmul.f32 1.442695, %v1850_v50 }
 0x553   : > { %v1826_v55 = vpop.xlane.xlu1 %1825  ;;  %v1824_v27 = vpop.xlane.xlu0 %1823 }
 0x554   : > { %3398 = vpow2.f32 %v1869_v51  ;;  %v1853_v56 = vsub.f32 %v4131_v53, %v1826_v55  ;;  %v1852_v29 = vsub.f32 %v4129_v52, %v1824_v27 }
 0x555   : > { %3400 = vpow2.f32 %v1867_v25 }
 0x556   : > { %v1873_v63 = vmul.f32 1.442695, %v1853_v56  ;;  %v1871_v43 = vmul.f32 1.442695, %v1852_v29 }
 0x557   : > { %v1830_v28 = vpop.xlane.xlu1 %1829  ;;  %v1828_v0 = vpop.xlane.xlu0 %1827 }
 0x558   : > { %3402 = vpow2.f32 %v1873_v63  ;;  %v1855_v2 = vsub.f32 %v4135_v57, %v1830_v28  ;;  %v1854_v47 = vsub.f32 %v4137_v48, %v1828_v0 }
 0x559   : > { %3404 = vpow2.f32 %v1871_v43 }
 0x55a   : > { %v1877_v49 = vmul.f32 1.442695, %v1855_v2  ;;  %v1875_v3 = vmul.f32 1.442695, %v1854_v47 }
 0x55b   : > { %v1834_v4 = vpop.xlane.xlu1 %1833  ;;  %v1832_v32 = vpop.xlane.xlu0 %1831 }
 0x55c   : > { %3406 = vpow2.f32 %v1877_v49  ;;  %v1857_v53 = vsub.f32 %v4143_v61, %v1834_v4  ;;  %v1856_v52 = vsub.f32 %v4141_v60, %v1832_v32 }
 0x55d   : > { %v4244_v6 = vpop.eup %3396  ;;  %3408 = vpow2.f32 %v1875_v3 }
 0x55e   : > { %v1881_v9 = vmul.f32 1.442695, %v1857_v53  ;;  %v1879_v10 = vmul.f32 1.442695, %v1856_v52  ;;  %1897 = vadd.xlane.f32.xlu1 %v4244_v6 }
 0x55f   : > { %v1838_v57 = vpop.xlane.xlu1 %1837  ;;  %v1836_v12 = vpop.xlane.xlu0 %1835 }
 0x560   : > { %3410 = vpow2.f32 %v1881_v9  ;;  %v1859_v48 = vsub.f32 %v4147_v1, %v1838_v57  ;;  %v1858_v13 = vsub.f32 %v4149_v62, %v1836_v12 }
 0x561   : > { %v4249_v34 = vpop.eup %3398  ;;  %3412 = vpow2.f32 %v1879_v10 }
 0x562   : > { %v4251_v61 = vpop.eup %3400  ;;  %v1885_v60 = vmul.f32 1.442695, %v1859_v48  ;;  %v1883_v14 = vmul.f32 1.442695, %v1858_v13  ;;  %1901 = vadd.xlane.f32.xlu1 %v4249_v34 }
 0x563   : > { %1899 = vadd.xlane.f32.xlu0 %v4251_v61  ;;  %v1842_v17 = vpop.xlane.xlu1 %1841  ;;  %v1840_v24 = vpop.xlane.xlu0 %1839 }
 0x564   : > { %3414 = vpow2.f32 %v1885_v60  ;;  %v1861_v23 = vsub.f32 %v4156_v8, %v1842_v17  ;;  %v1860_v1 = vsub.f32 %v4154_v44, %v1840_v24 }
 0x565   : > { %v4257_v33 = vpop.eup %3402  ;;  %3416 = vpow2.f32 %v1883_v14 }
 0x566   : > { %v4259_v62 = vpop.eup %3404  ;;  %v1889_v22 = vmul.f32 1.442695, %v1861_v23  ;;  %v1887_v40 = vmul.f32 1.442695, %v1860_v1  ;;  %1905 = vadd.xlane.f32.xlu1 %v4257_v33 }
 0x567   : > { %1903 = vadd.xlane.f32.xlu0 %v4259_v62  ;;  %v1846_v42 = vpop.xlane.xlu1 %1845  ;;  %v1844_v45 = vpop.xlane.xlu0 %1843 }
 0x568   : > { %3418 = vpow2.f32 %v1889_v22  ;;  %v1863_v19 = vsub.f32 %v4162_v15, %v1846_v42  ;;  %v1862_v8 = vsub.f32 %v4164_v18, %v1844_v45 }
 0x569   : > { %v4265_v41 = vpop.eup %3406  ;;  %3420 = vpow2.f32 %v1887_v40 }
 0x56a   : > { %v4267_v44 = vpop.eup %3408  ;;  %v1893_v50 = vmul.f32 1.442695, %v1863_v19  ;;  %v1891_v51 = vmul.f32 1.442695, %v1862_v8  ;;  %1909 = vadd.xlane.f32.xlu1 %v4265_v41 }
 0x56b   : > { %1907 = vadd.xlane.f32.xlu0 %v4267_v44  ;;  %v1848_v25 = vpop.xlane.xlu0 %1847 }
 0x56c   : > { %3422 = vpow2.f32 %v1893_v50  ;;  %v1864_v55 = vsub.f32 %v4170_v54, %v1848_v25 }
 0x56d   : > { %v4272_v27 = vpop.eup %3410  ;;  %3424 = vpow2.f32 %v1891_v51 }
 0x56e   : > { %v4274_v15 = vpop.eup %3412  ;;  %v1895_v18 = vmul.f32 1.442695, %v1864_v55  ;;  %1913 = vadd.xlane.f32.xlu1 %v4272_v27 }
 0x56f   : > { %1911 = vadd.xlane.f32.xlu0 %v4274_v15 }
 0x570   : > { %3426 = vpow2.f32 %v1895_v18 }
 0x571   : > { %v4278_v56 = vpop.eup %3414  ;;  %v1416_v29 = vpop.xlane.xlu1 %1415 }
 0x572   : > { %v4280_v63 = vpop.eup %3416  ;;  %1917 = vadd.xlane.f32.xlu1 %v4278_v56  ;;  %3428 = vrcp.f32 %v1416_v29 }
 0x573   : > { %1915 = vadd.xlane.f32.xlu0 %v4280_v63 }
 0x575   : > { %v4284_v54 = vpop.eup %3418  ;;  %v1418_v43 = vpop.xlane.xlu0 %1417 }
 0x576   : > { %v4286_v28 = vpop.eup %3420  ;;  %v1420_v0 = vpop.xlane.xlu1 %1419  ;;  %3430 = vrcp.f32 %v1418_v43  ;;  %1921 = vadd.xlane.f32.xlu1 %v4284_v54 }
 0x577   : > { %1919 = vadd.xlane.f32.xlu0 %v4286_v28  ;;  %3432 = vrcp.f32 %v1420_v0 }
 0x579   : > { %v4290_v2 = vpop.eup %3422 }
 0x57a   : > { %v4292_v47 = vpop.eup %3424  ;;  %v1424_v49 = vpop.xlane.xlu1 %1423  ;;  %1925 = vadd.xlane.f32.xlu1 %v4290_v2 }
 0x57b   : > { %v1422_v3 = vpop.xlane.xlu0 %1421  ;;  %1923 = vadd.xlane.f32.xlu0 %v4292_v47 }
 0x57c   : > { %3434 = vrcp.f32 %v1422_v3 }
 0x57d   : > { %v4296_v4 = vpop.eup %3426  ;;  %3436 = vrcp.f32 %v1424_v49 }
 0x57e   : > { %v1428_v32 = vpop.xlane.xlu1 %1427 }
 0x57f   : > { %v1426_v53 = vpop.xlane.xlu0 %1425  ;;  %1927 = vadd.xlane.f32.xlu0 %v4296_v4  ;;  %v3429_v52 = vpop.eup %3428 }
 0x580   : > { %3438 = vrcp.f32 %v1426_v53  ;;  %v1463_v12 = vmul.f32 %v3429_v52, %v4176_v46 }
 0x581   : > { %3440 = vrcp.f32 %v1428_v32 }
 0x582   : > { %v1432_v9 = vpop.xlane.xlu1 %1431 }
 0x583   : > { %v1430_v10 = vpop.xlane.xlu0 %1429  ;;  %v3431_v57 = vpop.eup %3430 }
 0x584   : > { %3442 = vrcp.f32 %v1430_v10  ;;  %v1464_v48 = vmul.f32 %v3431_v57, %v4181_v58  ;;  %v3433_v17 = vpop.eup %3432 }
 0x585   : > { %3444 = vrcp.f32 %v1432_v9  ;;  %v1465_v22 = vmul.f32 %v3433_v17, %v4184_v59 }
 0x586   : > { %v1436_v13 = vpop.xlane.xlu1 %1435  ;;  %v1479_v14 = vpack.c.bf16 %v1464_v48, %v1463_v12 }
 0x587   : > { %v1434_v60 = vpop.xlane.xlu0 %1433 }
 0x588   : > { %3446 = vrcp.f32 %v1434_v60  ;;  %3136 = vmatprep.mubr.bf16.mxu1 %v1479_v14 }
 0x589   : > { %v3435_v24 = vpop.eup %3434  ;;  %3448 = vrcp.f32 %v1436_v13 }
 0x58a   : > { %v1440_v23 = vpop.xlane.xlu1 %1439  ;;  %v1466_v40 = vmul.f32 %v3435_v24, %v4192_v5  ;;  %v3437_v42 = vpop.eup %3436 }
 0x58b   : > { %v1438_v1 = vpop.xlane.xlu0 %1437  ;;  %v1467_v8 = vmul.f32 %v3437_v42, %v4189_v31 }
 0x58c   : > { %3450 = vrcp.f32 %v1438_v1  ;;  %v1480_v46 = vpack.c.bf16 %v1466_v40, %v1465_v22 }
 0x58d   : > { %v3439_v45 = vpop.eup %3438  ;;  %3452 = vrcp.f32 %v1440_v23 }
 0x58e   : > { %3137 = vmatmul.mubr.bf16.vlgmr.msra.gmra.mxu1 %v1480_v46  ;;  %v1444_v58 = vpop.xlane.xlu1 %1443  ;;  %v1468_v50 = vmul.f32 %v3439_v45, %v4200_v11  ;;  %v3441_v51 = vpop.eup %3440 }
 0x58f   : > { %v1442_v19 = vpop.xlane.xlu0 %1441  ;;  %3171 = vmatpush3.bf16.xpose.msra.mxu1 %v4232_v39  ;;  %v1469_v55 = vmul.f32 %v3441_v51, %v4197_v35 }
 0x590   : > { %3454 = vrcp.f32 %v1442_v19  ;;  %v1481_v25 = vpack.c.bf16 %v1468_v50, %v1467_v8 }
 0x591   : > { %v3443_v59 = vpop.eup %3442  ;;  %3456 = vrcp.f32 %v1444_v58 }
 0x592   : > { %3140 = vmatprep.mubr.bf16.mxu1 %v1481_v25  ;;  %v1470_v18 = vmul.f32 %v3443_v59, %v4207_v21  ;;  %v3445_v29 = vpop.eup %3444 }
 0x593   : > { %v1446_v5 = vpop.xlane.xlu0 %1445  ;;  %v1471_v31 = vmul.f32 %v3445_v29, %v4204_v20 }
 0x594   : > { %3458 = vrcp.f32 %v1446_v5  ;;  %v1482_v43 = vpack.c.bf16 %v1470_v18, %v1469_v55 }
 0x595   : > { %v3447_v0 = vpop.eup %3446 }
 0x596   : > { %3141 = vmatmul.mubr.bf16.gmra.mxu1 %v1482_v43  ;;  %v1472_v11 = vmul.f32 %v3447_v0, %v4213_v26  ;;  %v3449_v39 = vpop.eup %3448 }
 0x597   : > { %v1473_v32 = vmul.f32 %v3449_v39, %v4211_v37 }
 0x598   : > { %v1483_v49 = vpack.c.bf16 %v1472_v11, %v1471_v31 }
 0x599   : > { %v3451_v3 = vpop.eup %3450 }
 0x59a   : > { %3144 = vmatprep.mubr.bf16.mxu1 %v1483_v49  ;;  %v1474_v53 = vmul.f32 %v3451_v3, %v4219_v7  ;;  %v3453_v35 = vpop.eup %3452 }
 0x59b   : > { %v1475_v10 = vmul.f32 %v3453_v35, %v4217_v16 }
 0x59c   : > { %v1484_v52 = vpack.c.bf16 %v1474_v53, %v1473_v32 }
 0x59d   : > { %v3455_v21 = vpop.eup %3454 }
 0x59e   : > { %v3457_v9 = vpop.eup %3456  ;;  %3145 = vmatmul.mubr.bf16.gmra.mxu1 %v1484_v52  ;;  %v1476_v57 = vmul.f32 %v3455_v21, %v4225_v30 }
 0x59f   : > { %v1477_v26 = vmul.f32 %v3457_v9, %v4223_v38 }
 0x5a0   : > { %v1485_v12 = vpack.c.bf16 %v1476_v57, %v1475_v10 }
 0x5a1   : > { %v3459_v20 = vpop.eup %3458 }
 0x5a2   : > { %v1478_v48 = vmul.f32 %v3459_v20, %v4229_v36  ;;  %3148 = vmatprep.mubr.bf16.mxu1 %v1485_v12 }
 0x5a4   : > { %v1486_v13 = vpack.c.bf16 %v1478_v48, %v1477_v26 }
 0x5a6   : > { %3149 = vmatmul.mubr.bf16.gmra.mxu1 %v1486_v13 }
 0x5e7   : > { %v1898_v37 = vpop.xlane.xlu1 %1897 }
 0x5e8   : > { %3460 = vrcp.f32 %v1898_v37 }
 0x5eb   : > { %v1902_v7 = vpop.xlane.xlu1 %1901 }
 0x5ec   : > { %v1900_v60 = vpop.xlane.xlu0 %1899 }
 0x5ed   : > { %3462 = vrcp.f32 %v1900_v60 }
 0x5ee   : > { %3464 = vrcp.f32 %v1902_v7 }
 0x5ef   : > { %v1906_v14 = vpop.xlane.xlu1 %1905 }
 0x5f0   : > { %v1904_v17 = vpop.xlane.xlu0 %1903 }
 0x5f1   : > { %3466 = vrcp.f32 %v1904_v17 }
 0x5f2   : > { %3468 = vrcp.f32 %v1906_v14 }
 0x5f3   : > { %v1910_v16 = vpop.xlane.xlu1 %1909 }
 0x5f4   : > { %v1908_v30 = vpop.xlane.xlu0 %1907 }
 0x5f5   : > { %3470 = vrcp.f32 %v1908_v30  ;;  %v3461_v24 = vpop.eup %3460 }
 0x5f6   : > { %3472 = vrcp.f32 %v1910_v16  ;;  %v1945_v22 = vmul.f32 %v3461_v24, %v4244_v6 }
 0x5f7   : > { %v1914_v38 = vpop.xlane.xlu1 %1913 }
 0x5f8   : > { %v1912_v36 = vpop.xlane.xlu0 %1911 }
 0x5f9   : > { %3474 = vrcp.f32 %v1912_v36 }
 0x5fa   : > { %v3463_v23 = vpop.eup %3462  ;;  %3476 = vrcp.f32 %v1914_v38 }
 0x5fb   : > { %v1918_v1 = vpop.xlane.xlu1 %1917  ;;  %v1946_v40 = vmul.f32 %v3463_v23, %v4251_v61  ;;  %v3465_v42 = vpop.eup %3464 }
 0x5fc   : > { %v1916_v46 = vpop.xlane.xlu0 %1915  ;;  %v1947_v8 = vmul.f32 %v3465_v42, %v4249_v34 }
 0x5fd   : > { %3478 = vrcp.f32 %v1916_v46  ;;  %v1961_v45 = vpack.c.bf16 %v1946_v40, %v1945_v22 }
 0x5fe   : > { %v3467_v58 = vpop.eup %3466  ;;  %3480 = vrcp.f32 %v1918_v1 }
 0x5ff   : > { %3172 = vmatprep.mubr.bf16.mxu1 %v1961_v45  ;;  %v1922_v19 = vpop.xlane.xlu1 %1921  ;;  %v1948_v50 = vmul.f32 %v3467_v58, %v4259_v62  ;;  %v3469_v51 = vpop.eup %3468 }
 0x600   : > { %v1920_v25 = vpop.xlane.xlu0 %1919  ;;  %v1949_v6 = vmul.f32 %v3469_v51, %v4257_v33 }
 0x601   : > { %3482 = vrcp.f32 %v1920_v25  ;;  %v1962_v59 = vpack.c.bf16 %v1948_v50, %v1947_v8  ;;  %v3355_v8 = vld [vmem:[%s4521_s8] sm:$0xff]  }
 0x602   : > { %v3471_v5 = vpop.eup %3470  ;;  %3484 = vrcp.f32 %v1922_v19  ;;  %3188 = vmatprep.subr.bf16.mxu0 %v3355_v8 }
 0x603   : > { %3173 = vmatmul.mubr.bf16.vlgmr.msra.gmra.mxu1 %v1962_v59  ;;  %v1950_v61 = vmul.f32 %v3471_v5, %v4267_v44  ;;  %v3473_v55 = vpop.eup %3472  ;;  %v1926_v18 = vpop.xlane.xlu1 %1925  ;;  %3189 = vmatpush3.bf16.msra.mxu0 %v3355_v8 }
 0x604   : > { %v1924_v29 = vpop.xlane.xlu0 %1923  ;;  %v1951_v34 = vmul.f32 %v3473_v55, %v4265_v41 }
 0x605   : > { %3486 = vrcp.f32 %v1924_v29  ;;  %v1963_v43 = vpack.c.bf16 %v1950_v61, %v1949_v6 }
 0x606   : > { %v3475_v0 = vpop.eup %3474  ;;  %3488 = vrcp.f32 %v1926_v18 }
 0x607   : > { %3176 = vmatprep.mubr.bf16.mxu1 %v1963_v43  ;;  %v1952_v62 = vmul.f32 %v3475_v0, %v4274_v15  ;;  %v3477_v31 = vpop.eup %3476 }
 0x608   : > { %v1928_v11 = vpop.xlane.xlu0 %1927  ;;  %v1953_v33 = vmul.f32 %v3477_v31, %v4272_v27 }
 0x609   : > { %3490 = vrcp.f32 %v1928_v11  ;;  %v1964_v39 = vpack.c.bf16 %v1952_v62, %v1951_v34 }
 0x60a   : > { %v3479_v49 = vpop.eup %3478 }
 0x60b   : > { %3177 = vmatmul.mubr.bf16.gmra.mxu1 %v1964_v39  ;;  %v1954_v44 = vmul.f32 %v3479_v49, %v4280_v63  ;;  %v3481_v3 = vpop.eup %3480 }
 0x60c   : > { %v1955_v35 = vmul.f32 %v3481_v3, %v4278_v56 }
 0x60d   : > { %v1965_v32 = vpack.c.bf16 %v1954_v44, %v1953_v33 }
 0x60e   : > { %v3483_v53 = vpop.eup %3482 }
 0x60f   : > { %3180 = vmatprep.mubr.bf16.mxu1 %v1965_v32  ;;  %v1956_v41 = vmul.f32 %v3483_v53, %v4286_v28  ;;  %v3485_v52 = vpop.eup %3484 }
 0x610   : > { %v1957_v9 = vmul.f32 %v3485_v52, %v4284_v54 }
 0x611   : > { %v1966_v15 = vpack.c.bf16 %v1956_v41, %v1955_v35 }
 0x612   : > { %v3487_v21 = vpop.eup %3486 }
 0x613   : > { %3181 = vmatmul.mubr.bf16.gmra.mxu1 %v1966_v15  ;;  %v1958_v10 = vmul.f32 %v3487_v21, %v4292_v47  ;;  %v3489_v57 = vpop.eup %3488 }
 0x614   : > { %v1959_v63 = vmul.f32 %v3489_v57, %v4290_v2 }
 0x615   : > { %v1967_v27 = vpack.c.bf16 %v1958_v10, %v1957_v9 }
 0x616   : > { %v3491_v20 = vpop.eup %3490 }
 0x617   : > { %3184 = vmatprep.mubr.bf16.mxu1 %v1967_v27  ;;  %v1960_v12 = vmul.f32 %v3491_v20, %v4296_v4 }
 0x619   : > { %v1968_v26 = vpack.c.bf16 %v1960_v12, %v1959_v63 }
 0x61b   : > { %3185 = vmatmul.mubr.bf16.gmra.mxu1 %v1968_v26 }
 0x64e   : > { %v3138_v56 = vpop.f32.mrf.mxu1 }
 0x64f   : > { %v2872_v28 = vpack.c.bf16 %v3138_v56, %v3138_v56 }
 0x650   : > { %v1521_v48 = vpop.f32.mrf.mxu1 }
 0x651   : > { %1651 = vst.msk [vmem:[#allocation8 + $0x8] sm:$0xf] %vm1648_vm12, %v2872_v28  ;;  %v2870_v13 = vpack.c.bf16 %v1521_v48, %v1521_v48 }
 0x652   : > { %v3139_v54 = vpop.f32.mrf.mxu1 }
 0x653   : > { %1649 = vst.msk [vmem:[#allocation8] sm:$0xf] %vm1648_vm12, %v2870_v13  ;;  %v2873_v47 = vpack.c.bf16 %v3139_v54, %v3139_v54 }
 0x654   : > { %v1524_v37 = vpop.f32.mrf.mxu1 }
 0x655   : > { %1652 = vst.msk [vmem:[#allocation8 + $0xc] sm:$0xf] %vm1648_vm12, %v2873_v47  ;;  %v2871_v7 = vpack.c.bf16 %v1524_v37, %v1524_v37 }
 0x656   : > { %v3142_v2 = vpop.f32.mrf.mxu1 }
 0x657   : > { %1650 = vst.msk [vmem:[#allocation8 + $0x4] sm:$0xf] %vm1648_vm12, %v2871_v7  ;;  %v2876_v4 = vpack.c.bf16 %v3142_v2, %v3142_v2 }
 0x658   : > { %v1537_v60 = vpop.f32.mrf.mxu1 }
 0x659   : > { %1655 = vst.msk [vmem:[#allocation8 + $0x18] sm:$0xf] %vm1648_vm12, %v2876_v4  ;;  %v2874_v14 = vpack.c.bf16 %v1537_v60, %v1537_v60 }
 0x65a   : > { %v3143_v17 = vpop.f32.mrf.mxu1 }
 0x65b   : > { %1653 = vst.msk [vmem:[#allocation8 + $0x10] sm:$0xf] %vm1648_vm12, %v2874_v14  ;;  %v2877_v16 = vpack.c.bf16 %v3143_v17, %v3143_v17 }
 0x65c   : > { %v1540_v30 = vpop.f32.mrf.mxu1 }
 0x65d   : > { %1656 = vst.msk [vmem:[#allocation8 + $0x1c] sm:$0xf] %vm1648_vm12, %v2877_v16  ;;  %v2875_v38 = vpack.c.bf16 %v1540_v30, %v1540_v30 }
 0x65e   : > { %v3146_v24 = vpop.f32.mrf.mxu1 }
 0x65f   : > { %1654 = vst.msk [vmem:[#allocation8 + $0x14] sm:$0xf] %vm1648_vm12, %v2875_v38  ;;  %v2880_v36 = vpack.c.bf16 %v3146_v24, %v3146_v24 }
 0x660   : > { %v1553_v23 = vpop.f32.mrf.mxu1 }
 0x661   : > { %1659 = vst.msk [vmem:[#allocation8 + $0x28] sm:$0xf] %vm1648_vm12, %v2880_v36  ;;  %v2878_v1 = vpack.c.bf16 %v1553_v23, %v1553_v23 }
 0x662   : > { %v3147_v22 = vpop.f32.mrf.mxu1 }
 0x663   : > { %1657 = vst.msk [vmem:[#allocation8 + $0x20] sm:$0xf] %vm1648_vm12, %v2878_v1  ;;  %v2881_v40 = vpack.c.bf16 %v3147_v22, %v3147_v22 }
 0x664   : > { %v1556_v42 = vpop.f32.mrf.mxu1 }
 0x665   : > { %1660 = vst.msk [vmem:[#allocation8 + $0x2c] sm:$0xf] %vm1648_vm12, %v2881_v40  ;;  %v2879_v46 = vpack.c.bf16 %v1556_v42, %v1556_v42 }
 0x666   : > { %v3150_v45 = vpop.f32.mrf.mxu1 }
 0x667   : > { %1658 = vst.msk [vmem:[#allocation8 + $0x24] sm:$0xf] %vm1648_vm12, %v2879_v46  ;;  %v2884_v58 = vpack.c.bf16 %v3150_v45, %v3150_v45 }
 0x668   : > { %v1569_v19 = vpop.f32.mrf.mxu1 }
 0x669   : > { %1663 = vst.msk [vmem:[#allocation8 + $0x38] sm:$0xf] %vm1648_vm12, %v2884_v58  ;;  %v2882_v50 = vpack.c.bf16 %v1569_v19, %v1569_v19 }
 0x66a   : > { %v3151_v51 = vpop.f32.mrf.mxu1 }
 0x66b   : > { %1661 = vst.msk [vmem:[#allocation8 + $0x30] sm:$0xf] %vm1648_vm12, %v2882_v50  ;;  %v2885_v25 = vpack.c.bf16 %v3151_v51, %v3151_v51 }
 0x66c   : > { %v1572_v59 = vpop.f32.mrf.mxu1 }
 0x66d   : > { %1664 = vst.msk [vmem:[#allocation8 + $0x3c] sm:$0xf] %vm1648_vm12, %v2885_v25  ;;  %v2883_v5 = vpack.c.bf16 %v1572_v59, %v1572_v59 }
 0x66f   : > { %1662 = vst.msk [vmem:[#allocation8 + $0x34] sm:$0xf] %vm1648_vm12, %v2883_v5 }
 0x6c3   : > { %v3174_v6 = vpop.f32.mrf.mxu1 }
 0x6c4   : > { %v2888_v43 = vpack.c.bf16 %v3174_v6, %v3174_v6 }
 0x6c5   : > { %v2003_v61 = vpop.f32.mrf.mxu1 }
 0x6c6   : > { %v2886_v55 = vpack.c.bf16 %v2003_v61, %v2003_v61 }
 0x6c7   : > { %v3175_v18 = vpop.f32.mrf.mxu1 }
 0x6c8   : > { %2114 = vrot.lane.b32.xlu1 %v2886_v55, %s3663_s10  ;;  %v2889_v31 = vpack.c.bf16 %v3175_v18, %v3175_v18 }
 0x6c9   : > { %v2006_v29 = vpop.f32.mrf.mxu1 }
 0x6ca   : > { %v2887_v0 = vpack.c.bf16 %v2006_v29, %v2006_v29 }
 0x6cb   : > { %v3178_v34 = vpop.f32.mrf.mxu1 }
 0x6cc   : > { %2118 = vrot.lane.b32.xlu1 %v2888_v43, %s3663_s10  ;;  %2116 = vrot.lane.b32.xlu0 %v2887_v0, %s3663_s10  ;;  %v2892_v33 = vpack.c.bf16 %v3178_v34, %v3178_v34 }
 0x6cd   : > { %v2019_v62 = vpop.f32.mrf.mxu1 }
 0x6ce   : > { %v2890_v11 = vpack.c.bf16 %v2019_v62, %v2019_v62 }
 0x6cf   : > { %v3179_v39 = vpop.f32.mrf.mxu1 }
 0x6d0   : > { %2120 = vrot.lane.b32.xlu1 %v2889_v31, %s3663_s10  ;;  %2122 = vrot.lane.b32.xlu0 %v2890_v11, %s3663_s10  ;;  %v2893_v53 = vpack.c.bf16 %v3179_v39, %v3179_v39 }
 0x6d1   : > { %v2022_v49 = vpop.f32.mrf.mxu1 }
 0x6d2   : > { %v2891_v44 = vpack.c.bf16 %v2022_v49, %v2022_v49 }
 0x6d3   : > { %v3182_v3 = vpop.f32.mrf.mxu1 }
 0x6d4   : > { %2126 = vrot.lane.b32.xlu0 %v2892_v33, %s3663_s10  ;;  %2124 = vrot.lane.b32.xlu1 %v2891_v44, %s3663_s10  ;;  %v2896_v15 = vpack.c.bf16 %v3182_v3, %v3182_v3 }
 0x6d5   : > { %v2035_v32 = vpop.f32.mrf.mxu1 }
 0x6d6   : > { %v2894_v35 = vpack.c.bf16 %v2035_v32, %v2035_v32 }
 0x6d7   : > { %v3183_v41 = vpop.f32.mrf.mxu1 }
 0x6d8   : > { %2128 = vrot.lane.b32.xlu1 %v2893_v53, %s3663_s10  ;;  %2130 = vrot.lane.b32.xlu0 %v2894_v35, %s3663_s10  ;;  %v2897_v57 = vpack.c.bf16 %v3183_v41, %v3183_v41 }
 0x6d9   : > { %v2038_v52 = vpop.f32.mrf.mxu1 }
 0x6da   : > { %v2895_v21 = vpack.c.bf16 %v2038_v52, %v2038_v52 }
 0x6db   : > { %v3186_v9 = vpop.f32.mrf.mxu1 }
 0x6dc   : > { %2134 = vrot.lane.b32.xlu0 %v2896_v15, %s3663_s10  ;;  %2132 = vrot.lane.b32.xlu1 %v2895_v21, %s3663_s10  ;;  %v2900_v12 = vpack.c.bf16 %v3186_v9, %v3186_v9 }
 0x6dd   : > { %v2051_v10 = vpop.f32.mrf.mxu1 }
 0x6de   : > { %v2898_v27 = vpack.c.bf16 %v2051_v10, %v2051_v10 }
 0x6df   : > { %v3187_v20 = vpop.f32.mrf.mxu1 }
 0x6e0   : > { %2136 = vrot.lane.b32.xlu1 %v2897_v57, %s3663_s10  ;;  %2138 = vrot.lane.b32.xlu0 %v2898_v27, %s3663_s10  ;;  %v2901_v56 = vpack.c.bf16 %v3187_v20, %v3187_v20 }
 0x6e1   : > { %v2054_v63 = vpop.f32.mrf.mxu1 }
 0x6e2   : > { %v2899_v26 = vpack.c.bf16 %v2054_v63, %v2054_v63 }
 0x6e4   : > { %2142 = vrot.lane.b32.xlu0 %v2900_v12, %s3663_s10  ;;  %2140 = vrot.lane.b32.xlu1 %v2899_v26, %s3663_s10 }
 0x6e8   : > { %2144 = vrot.lane.b32.xlu1 %v2901_v56, %s3663_s10 }
 0x73a   : > { %v2115_v28 = vpop.permute.xlu1 %2114 }
 0x73b   : > { %2163 = vst.msk [vmem:[#allocation8] sm:$0xf] %vm2162_vm13, %v2115_v28 }
 0x73e   : > { %v2119_v48 = vpop.permute.xlu1 %2118  ;;  %v2117_v13 = vpop.permute.xlu0 %2116 }
 0x73f   : > { %2165 = vst.msk [vmem:[#allocation8 + $0x8] sm:$0xf] %vm2162_vm13, %v2119_v48  ;;  %2164 = vst.msk [vmem:[#allocation8 + $0x4] sm:$0xf] %vm2162_vm13, %v2117_v13 }
 0x742   : > { %v2121_v54 = vpop.permute.xlu1 %2120  ;;  %v2123_v47 = vpop.permute.xlu0 %2122 }
 0x743   : > { %2166 = vst.msk [vmem:[#allocation8 + $0xc] sm:$0xf] %vm2162_vm13, %v2121_v54  ;;  %2167 = vst.msk [vmem:[#allocation8 + $0x10] sm:$0xf] %vm2162_vm13, %v2123_v47 }
 0x746   : > { %v2125_v37 = vpop.permute.xlu1 %2124  ;;  %v2127_v7 = vpop.permute.xlu0 %2126  ;;  %v3356_v2 = vld [vmem:[#allocation8] sm:$0xff]  }
 0x747   : > { %2168 = vst.msk [vmem:[#allocation8 + $0x14] sm:$0xf] %vm2162_vm13, %v2125_v37  ;;  %2169 = vst.msk [vmem:[#allocation8 + $0x18] sm:$0xf] %vm2162_vm13, %v2127_v7  ;;  %3190 = vmatprep.mubr.msk.bf16.mxu0 %vm2243_vm14, %v3356_v2 }
 0x74a   : > { %v2129_v4 = vpop.permute.xlu1 %2128  ;;  %v2131_v60 = vpop.permute.xlu0 %2130  ;;  %v3357_v14 = vld [vmem:[#allocation8 + $0x8] sm:$0xff]  }
 0x74b   : > { %2170 = vst.msk [vmem:[#allocation8 + $0x1c] sm:$0xf] %vm2162_vm13, %v2129_v4  ;;  %2171 = vst.msk [vmem:[#allocation8 + $0x20] sm:$0xf] %vm2162_vm13, %v2131_v60  ;;  %3191 = vmatmul.mubr.msk.bf16.vlgmr.msra.gmra.mxu0 %vm2243_vm14, %v3357_v14 }
 0x74e   : > { %v2133_v17 = vpop.permute.xlu1 %2132  ;;  %v2135_v16 = vpop.permute.xlu0 %2134  ;;  %v3358_v30 = vld [vmem:[#allocation8 + $0x10] sm:$0xff]  }
 0x74f   : > { %2172 = vst.msk [vmem:[#allocation8 + $0x24] sm:$0xf] %vm2162_vm13, %v2133_v17  ;;  %2173 = vst.msk [vmem:[#allocation8 + $0x28] sm:$0xf] %vm2162_vm13, %v2135_v16  ;;  %3194 = vmatprep.mubr.msk.bf16.mxu0 %vm2243_vm14, %v3358_v30 }
 0x752   : > { %v2137_v38 = vpop.permute.xlu1 %2136  ;;  %v2139_v24 = vpop.permute.xlu0 %2138  ;;  %v3359_v36 = vld [vmem:[#allocation8 + $0x18] sm:$0xff]  }
 0x753   : > { %2174 = vst.msk [vmem:[#allocation8 + $0x2c] sm:$0xf] %vm2162_vm13, %v2137_v38  ;;  %2175 = vst.msk [vmem:[#allocation8 + $0x30] sm:$0xf] %vm2162_vm13, %v2139_v24  ;;  %3195 = vmatmul.mubr.msk.bf16.gmra.mxu0 %vm2243_vm14, %v3359_v36 }
 0x756   : > { %v2141_v23 = vpop.permute.xlu1 %2140  ;;  %v2143_v1 = vpop.permute.xlu0 %2142  ;;  %v3360_v22 = vld [vmem:[#allocation8 + $0x20] sm:$0xff]  }
 0x757   : > { %2176 = vst.msk [vmem:[#allocation8 + $0x34] sm:$0xf] %vm2162_vm13, %v2141_v23  ;;  %2177 = vst.msk [vmem:[#allocation8 + $0x38] sm:$0xf] %vm2162_vm13, %v2143_v1  ;;  %3198 = vmatprep.mubr.msk.bf16.mxu0 %vm2243_vm14, %v3360_v22 }
 0x75a   : > { %v2145_v40 = vpop.permute.xlu1 %2144  ;;  %v3361_v42 = vld [vmem:[#allocation8 + $0x28] sm:$0xff]  }
 0x75b   : > { %2178 = vst.msk [vmem:[#allocation8 + $0x3c] sm:$0xf] %vm2162_vm13, %v2145_v40  ;;  %3199 = vmatmul.mubr.msk.bf16.gmra.mxu0 %vm2243_vm14, %v3361_v42 }
 0x75e   : > { %v3362_v46 = vld [vmem:[#allocation8 + $0x30] sm:$0xff]  }
 0x75f   : > { %3202 = vmatprep.mubr.msk.bf16.mxu0 %vm2243_vm14, %v3362_v46 }
 0x762   : > { %v3363_v45 = vld [vmem:[#allocation8 + $0x38] sm:$0xff]  }
 0x763   : > { %3203 = vmatmul.mubr.msk.bf16.gmra.mxu0 %vm2243_vm14, %v3363_v45 }
 0x80b   : > { %v3192_v58 = vpop.f32.mrf.mxu0 }
 0x80c   : > { %v2472_v55 = vmul.f32 %v3192_v58, %v3192_v58 }
 0x80d   : > { %v2302_v19 = vpop.f32.mrf.mxu0 }
 0x80e   : > { %v2470_v25 = vmul.f32 %v2302_v19, %v2302_v19 }
 0x80f   : > { %v3193_v8 = vpop.f32.mrf.mxu0 }
 0x810   : > { %v2968_v50 = vpack.c.bf16 %v3193_v8, %v3192_v58  ;;  %v2473_v0 = vmul.f32 %v3193_v8, %v3193_v8 }
 0x811   : > { %v2305_v51 = vpop.f32.mrf.mxu0 }
 0x812   : > { %3007 = vst [vmem:[%s3884_s14 + $0x8] sm:$0xff] %v2968_v50   ;;  %v2963_v59 = vpack.c.bf16 %v2305_v51, %v2302_v19  ;;  %v2446_v5 = vadd.f32 %v2305_v51, %v2302_v19  ;;  %v2471_v6 = vmul.f32 %v2305_v51, %v2305_v51 }
 0x813   : > { %v3196_v61 = vpop.f32.mrf.mxu0 }
 0x814   : > { %2964 = vst [vmem:[%s3884_s14] sm:$0xff] %v2963_v59   ;;  %v2447_v18 = vadd.f32 %v3192_v58, %v2446_v5  ;;  %v2486_v29 = vadd.f32 %v2471_v6, %v2470_v25  ;;  %v2476_v52 = vmul.f32 %v3196_v61, %v3196_v61 }
 0x815   : > { %v2318_v43 = vpop.f32.mrf.mxu0 }
 0x816   : > { %v2487_v34 = vadd.f32 %v2486_v29, %v2472_v55  ;;  %v2448_v62 = vadd.f32 %v3193_v8, %v2447_v18  ;;  %v2474_v39 = vmul.f32 %v2318_v43, %v2318_v43 }
 0x817   : > { %v3197_v31 = vpop.f32.mrf.mxu0 }
 0x818   : > { %v2449_v11 = vadd.f32 %v2448_v62, %v2318_v43  ;;  %v2488_v49 = vadd.f32 %v2487_v34, %v2473_v0  ;;  %v2978_v33 = vpack.c.bf16 %v3197_v31, %v3196_v61  ;;  %v2477_v10 = vmul.f32 %v3197_v31, %v3197_v31  ;;  %v2445_v34 = vld [vmem:[%s3886_s17] sm:$0x1] }
 0x819   : > { %v2321_v44 = vpop.f32.mrf.mxu0 }
 0x81a   : > { %v2489_v3 = vadd.f32 %v2488_v49, %v2474_v39  ;;  %3009 = vst [vmem:[%s3884_s14 + $0x18] sm:$0xff] %v2978_v33   ;;  %v2973_v32 = vpack.c.bf16 %v2321_v44, %v2318_v43  ;;  %v2450_v53 = vadd.f32 %v2449_v11, %v2321_v44  ;;  %v2475_v35 = vmul.f32 %v2321_v44, %v2321_v44  ;;  %v2469_v11 = vld [vmem:[%s3886_s17 + $0x1] sm:$0x1] }
 0x81b   : > { %v3200_v41 = vpop.f32.mrf.mxu0 }
 0x81c   : > { %3008 = vst [vmem:[%s3884_s14 + $0x10] sm:$0xff] %v2973_v32   ;;  %v2451_v15 = vadd.f32 %v3196_v61, %v2450_v53  ;;  %v2490_v21 = vadd.f32 %v2489_v3, %v2475_v35  ;;  %v2480_v7 = vmul.f32 %v3200_v41, %v3200_v41 }
 0x81d   : > { %v2334_v9 = vpop.f32.mrf.mxu0 }
 0x81e   : > { %v2491_v57 = vadd.f32 %v2490_v21, %v2476_v52  ;;  %v2452_v27 = vadd.f32 %v3197_v31, %v2451_v15  ;;  %v2478_v12 = vmul.f32 %v2334_v9, %v2334_v9 }
 0x81f   : > { %v3201_v20 = vpop.f32.mrf.mxu0 }
 0x820   : > { %v2453_v63 = vadd.f32 %v2452_v27, %v2334_v9  ;;  %v2492_v26 = vadd.f32 %v2491_v57, %v2477_v10  ;;  %v2988_v56 = vpack.c.bf16 %v3201_v20, %v3200_v41  ;;  %v2481_v14 = vmul.f32 %v3201_v20, %v3201_v20 }
 0x821   : > { %v2337_v28 = vpop.f32.mrf.mxu0 }
 0x822   : > { %v2493_v48 = vadd.f32 %v2492_v26, %v2478_v12  ;;  %3011 = vst [vmem:[%s3884_s14 + $0x28] sm:$0xff] %v2988_v56   ;;  %v2983_v13 = vpack.c.bf16 %v2337_v28, %v2334_v9  ;;  %v2454_v54 = vadd.f32 %v2453_v63, %v2337_v28  ;;  %v2479_v47 = vmul.f32 %v2337_v28, %v2337_v28 }
 0x823   : > { %v3204_v37 = vpop.f32.mrf.mxu0 }
 0x824   : > { %3010 = vst [vmem:[%s3884_s14 + $0x20] sm:$0xff] %v2983_v13   ;;  %v2455_v2 = vadd.f32 %v3200_v41, %v2454_v54  ;;  %v2494_v4 = vadd.f32 %v2493_v48, %v2479_v47  ;;  %v2484_v45 = vmul.f32 %v3204_v37, %v3204_v37 }
 0x825   : > { %v2350_v60 = vpop.f32.mrf.mxu0 }
 0x826   : > { %v2495_v17 = vadd.f32 %v2494_v4, %v2480_v7  ;;  %v2456_v16 = vadd.f32 %v3201_v20, %v2455_v2  ;;  %v2482_v24 = vmul.f32 %v2350_v60, %v2350_v60 }
 0x827   : > { %v3205_v30 = vpop.f32.mrf.mxu0 }
 0x828   : > { %v2457_v38 = vadd.f32 %v2456_v16, %v2350_v60  ;;  %v2496_v36 = vadd.f32 %v2495_v17, %v2481_v14  ;;  %v2998_v23 = vpack.c.bf16 %v3205_v30, %v3204_v37  ;;  %v2485_v8 = vmul.f32 %v3205_v30, %v3205_v30 }
 0x829   : > { %v2353_v1 = vpop.f32.mrf.mxu0 }
 0x82a   : > { %v2497_v22 = vadd.f32 %v2496_v36, %v2482_v24  ;;  %3013 = vst [vmem:[%s3884_s14 + $0x38] sm:$0xff] %v2998_v23   ;;  %v2993_v40 = vpack.c.bf16 %v2353_v1, %v2350_v60  ;;  %v2458_v42 = vadd.f32 %v2457_v38, %v2353_v1  ;;  %v2483_v46 = vmul.f32 %v2353_v1, %v2353_v1 }
 0x82c   : > { %3012 = vst [vmem:[%s3884_s14 + $0x30] sm:$0xff] %v2993_v40   ;;  %v2459_v58 = vadd.f32 %v3204_v37, %v2458_v42  ;;  %v2498_v19 = vadd.f32 %v2497_v22, %v2483_v46 }
 0x82e   : > { %v2460_v50 = vadd.f32 %v3205_v30, %v2459_v58  ;;  %v2499_v51 = vadd.f32 %v2498_v19, %v2484_v45 }
 0x830   : > { %v2461_v25 = vrot.slane %v2460_v50, 4  ;;  %v2500_v59 = vadd.f32 %v2499_v51, %v2485_v8 }
 0x832   : > { %v2462_v5 = vadd.f32 %v2461_v25, %v2460_v50  ;;  %v2501_v6 = vrot.slane %v2500_v59, 4 }
 0x834   : > { %v2463_v61 = vrot.slane %v2462_v5, 2  ;;  %v2502_v55 = vadd.f32 %v2501_v6, %v2500_v59 }
 0x836   : > { %v2464_v18 = vadd.f32 %v2463_v61, %v2462_v5  ;;  %v2503_v29 = vrot.slane %v2502_v55, 2 }
 0x838   : > { %v2465_v43 = vrot.slane %v2464_v18, 1  ;;  %v2504_v0 = vadd.f32 %v2503_v29, %v2502_v55 }
 0x83a   : > { %v2466_v62 = vadd.f32 %v2465_v43, %v2464_v18  ;;  %v2505_v31 = vrot.slane %v2504_v0, 1 }
 0x83c   : > { %v2467_v39 = vadd.f32 %v2466_v62, %v2445_v34  ;;  %v2506_v49 = vadd.f32 %v2505_v31, %v2504_v0 }
 0x83e   : > { %2468 = vst [vmem:[%s3886_s17] sm:$0x1] %v2467_v39  ;;  %v2507_v33 = vadd.f32 %v2506_v49, %v2469_v11 }
 0x840   : > { %2508 = vst [vmem:[%s3886_s17 + $0x1] sm:$0x1] %v2507_v33 }
 0x841 PF: > { %s4579_s23 = sld [smem:[#allocation20_spill]]  ;;  %s2522_s27 = smul.u32 %s3630_s19, %s3634_s20 }
 0x842   : > { %s2844_s29 = sshll.u32 %s3638_s21, 5  ;;  %s2531_s12 = sshll.u32 %s3884_s14, 4  ;;  %s4407_s12 = int_to_ptr.vmem [resolvable:$true] %s2531_s12 }
 0x843   : > { %s2843_s16 = sshll.u32 %s2522_s27, 4  ;;  %s4581_s15 = sld [smem:[#allocation37_spill]] }
 0x844   : > { %s2528_s18 = sadd.s32 %s2844_s29, %s2843_s16  ;;  %s3492_s19 = scalar_lea.vmem %s4407_s12, 1024 }
 0x845   : > { %s2845_s13 = sshll.u32 %s2528_s18, 6  ;;  %p3493_p2 = scmp.ne.s32.totalorder %s4407_s12, %s3492_s19 }
 0x846   : > { %s3664_s14 = smov [#allocation10]  }
 0x847   : > { %s4583_s11 = sand.u32 1, %s4579_s23   ;;  %p3494_p4 = pnand %p3493_p2, %p3809_p5 }
 0x848   : > { %s4418_s26 = scalar_lea.sflag [#allocation11], %s4583_s11  ;;  %s3496_s20 = sshll.u32 %s3664_s14, 4  ;;  %s3497_s20 = int_to_ptr.vmem [resolvable:$false] %s3496_s20 }
 0x849   : > { %s4582_s30 = smov %s4581_s15  ;;  %s4414_s25 = scalar_lea.hbm %s4581_s15, %s2845_s13 }
 0x84a   : > { %p3495_p6 = pneg %p3494_p4  ;;  %s3498_s9 = scalar_lea.vmem %s3497_s20, 2048 }
 0x84b   : > { %p3499_p8 = scmp.lt.s32.totalorder %s4407_s12, %s3497_s20  ;;  %p3500_p9 = scmp.lt.s32.totalorder %s3498_s9, %s3492_s19 }
 0x84d   : > { %p3501_p11 = por %p3500_p9, %p3499_p8 }
 0x84f   : > { %p3502_p12 = pnand %p3501_p11, %p3495_p6 }
 0x851   : > { %3505 = shalt.err (!%p3502_p12)
}
 0x852   : > { %s3506_s10 = scalar_lea.hbm %s4414_s25, 1024  ;;  %s3510_s16 = scalar_lea.hbm %s4582_s30, 4096 }
 0x853   : > { %p3507_p13 = scmp.ne.s32.totalorder %s4414_s25, %s3506_s10  ;;  %p3511_p2 = scmp.lt.s32.totalorder %s4414_s25, %s4582_s30 }
 0x854   : > { %p3512_p4 = scmp.lt.s32.totalorder %s3510_s16, %s3506_s10 }
 0x855   : > { %p3508_p0 = pnand %p3507_p13, %p3809_p5 }
 0x856   : > { %p3513_p6 = por %p3512_p4, %p3511_p2 }
 0x857   : > { %p3509_p3 = pneg %p3508_p0 }
 0x859   : > { %p3514_p8 = pnand %p3513_p6, %p3509_p3 }
 0x85b   : > { %3517 = shalt.err (!%p3514_p8)
}
 0x85c   : > { %s3665_s22 = smov 64   ;;  %s4584_s24 = sld [smem:[#allocation17_spill]] }
 0x85d   : > { %s3666_s11 = smov 4   ;;  %s4586_s20 = sld [smem:[#allocation38_spill]] }
 0x85e   : > { %3213 = dma.vmem_to_hbm [thread:$0]  (%p3809_p5), %s4407_s12, 1024, %s4414_s25, %s4418_s26, %s3665_s22, %s3665_s22, %s3666_s11  }
 0x85f   : > { %s2547_s23 = sshll.u32 %s3886_s17, 4  ;;  %s3667_s13 = smov [#allocation12]   ;;  %s2548_s23 = int_to_ptr.vmem [resolvable:$true] %s2547_s23 }
 0x860   : > { %s3518_s18 = scalar_lea.vmem %s2548_s23, 32  ;;  %s3522_s0 = sshll.u32 %s3667_s13, 4  ;;  %s3523_s0 = int_to_ptr.vmem [resolvable:$false] %s3522_s0 }
 0x861   : > { %p3519_p9 = scmp.ne.s32.totalorder %s2548_s23, %s3518_s18  ;;  %s3524_s1 = scalar_lea.vmem %s3523_s0, 64 }
 0x862   : > { %s4588_s27 = sand.u32 1, %s4584_s24   ;;  %p3525_p13 = scmp.lt.s32.totalorder %s2548_s23, %s3523_s0 }
 0x863   : > { %s4587_s9 = smov %s4586_s20  ;;  %s2545_s10 = scalar_lea.hbm %s4586_s20, %s2844_s29 }
 0x864   : > { %s2515_s16 = scalar_lea.sflag [#allocation13], %s4588_s27  ;;  %p3520_p11 = pnand %p3519_p9, %p3835_p10 }
 0x865   : > { %p3526_p5 = scmp.lt.s32.totalorder %s3524_s1, %s3518_s18 }
 0x866   : > { %p3521_p12 = pneg %p3520_p11 }
 0x867   : > { %p3527_p0 = por %p3526_p5, %p3525_p13 }
 0x869   : > { %p3528_p3 = pnand %p3527_p0, %p3521_p12 }
 0x86b   : > { %3531 = shalt.err (!%p3528_p3)
}
 0x86c   : > { %s3532_s21 = scalar_lea.hbm %s2545_s10, 32  ;;  %s3536_s29 = scalar_lea.hbm %s4587_s9, 64 }
 0x86d   : > { %p3533_p2 = scmp.ne.s32.totalorder %s2545_s10, %s3532_s21  ;;  %p3537_p8 = scmp.lt.s32.totalorder %s2545_s10, %s4587_s9 }
 0x86e   : > { %p3538_p9 = scmp.lt.s32.totalorder %s3536_s29, %s3532_s21 }
 0x86f   : > { %p3534_p4 = pnand %p3533_p2, %p3835_p10 }
 0x870   : > { %p3539_p11 = por %p3538_p9, %p3537_p8 }
 0x871   : > { %p3535_p6 = pneg %p3534_p4 }
 0x873   : > { %p3540_p1 = pnand %p3539_p11, %p3535_p6 }
 0x875   : > { %3543 = shalt.err (!%p3540_p1)
}
 0x876   : > { %3214 = dma.vmem_to_hbm [thread:$0]  (%p3835_p10), %s2548_s23, 32, %s2545_s10, %s2515_s16  }
 0x877 PF: > { %s4589_s0 = sld [smem:[#allocation25_spill]] }
 0x878   : > { %s4590_s1 = sld [smem:[#allocation19_spill]] }
 0x87d   : > { %p3224_p12 = scmp.ge.s32.totalorder %s4589_s0, 2 }
 0x87e   : > { %s2559_s22 = sand.u32 1, %s4590_s1  }
 0x87f   : > { %p3218_p13 = pnand %p3224_p12, %p3824_p7  ;;  %s2560_s24 = scalar_lea.sflag [#allocation11], %s2559_s22 }
 0x881   : > { %p3219_p5 = pneg %p3218_p13 }
 0x883   : > { %3597 = dma.done.wait (%p3219_p5), %s2560_s24, 1024  }
 0x884   : > { %3599 = vsyncadd (%p3219_p5), %s2560_s24, 4294966272  ;;  %s4592_s11 = sld [smem:[#allocation16_spill]] }
 0x885   : > { %s4593_s19 = sld [smem:[#allocation32_spill]] }
 0x88a   : > { %s2568_s14 = sand.u32 1, %s4592_s11  }
 0x88b   : > { %p4594_p0 = scmp.ne.s32.totalorder %s4593_s19, 0  ;;  %s2569_s15 = scalar_lea.sflag [#allocation13], %s2568_s14 }
 0x88d   : > { %p3221_p1 = pnand %p3224_p12, %p4594_p0 }
 0x88f   : > { %p3222_p3 = pneg %p3221_p1 }
 0x891   : > { %3601 = dma.done.wait (%p3222_p3), %s2569_s15, 32  }
 0x892   : > { %3603 = vsyncadd (%p3222_p3), %s2569_s15, 4294967264  ;;  %s27_s25 = sadd.s32 1, %s4589_s0   ;;  %s4596_s13 = sld [smem:[#allocation17_spill]] }
 0x893   : > { %p4469_p10 = scmp.ge.s32.totalorder %s27_s25, 10   ;;  %s4597_s14 = sld [smem:[#allocation18_spill]] }
 0x894   : > { %s4598_s15 = sld [smem:[#allocation33_spill]] }
 0x895   : > { %s4599_s16 = sld [smem:[#allocation20_spill]] }
 0x896   : > { %s4600_s17 = sld [smem:[#allocation21_spill]] }
 0x897   : > { %s4601_s18 = sld [smem:[#allocation34_spill]] }
 0x898   : > { %s4602_s19 = sld [smem:[#allocation22_spill]] }
 0x899   : > { %s4603_s10 = sld [smem:[#allocation23_spill]] }
 0x89a   : > { %s4604_s21 = sld [smem:[#allocation24_spill]] }
 0x89b   : > { %s4605_s22 = sld [smem:[#allocation26_spill]]  ;;  %26 = sbr.rel (!%p4469_p10) target bundleno = 15 (0xf), region = 132 }
 0x89c   : > { %s4606_s23 = sld [smem:[#allocation28_spill]] }
 0x89d   : > { %s4607_s24 = sld [smem:[#allocation30_spill]] }
 0x89f   : > { %s4609_s20 = smov %s4603_s10 }
 0x8a0   :  { %2574 = vsyncpa [#allocation11], 1 }
 0x8a1   :  { %2576 = vsyncpa [#allocation11 + $0x1], 1 }
 0x8a2   :  { %2577 = vsyncpa [#allocation13], 1 }
 0x8a3   :  { %2579 = vsyncpa [#allocation13 + $0x1], 1 }

// kernel: tpu_custom_call.1
= control target key start
LH: loop header
LB: loop body
LE: loop exit
PB: predicated region body
PF: predicated region fallthrough
CT: control target
= control target key end

     0   :  { %s4507_s0 = inlined_call_operand.vmem [shape: bf16[2,256,16], index: 0, kind: input, shape index: {}]   ;;  %s4508_s1 = inlined_call_operand.vmem [shape: bf16[2,16,128], index: 1, kind: input, shape index: {}]   ;;  %s4509_s2 = inlined_call_operand.vmem [shape: f32[2,1,128], index: 2, kind: input, shape index: {}]   ;;  %s4510_s3 = inlined_call_operand.vmem [shape: bf16[16,16], index: 3, kind: input, shape index: {}]   ;;  %s4511_s4 = inlined_call_operand.vmem [shape: bf16[16,16], index: 4, kind: input, shape index: {}]   ;;  %s4512_s5 = inlined_call_operand.vmem [shape: f32[16,1], index: 5, kind: input, shape index: {}]   ;;  %s4513_s6 = inlined_call_operand.vmem [shape: bf16[16,16], index: 6, kind: input, shape index: {}]   ;;  %s4514_s7 = inlined_call_operand.vmem [shape: f32[16,1], index: 7, kind: input, shape index: {}]   ;;  %s4515_s8 = inlined_call_operand.vmem [shape: bf16[16,128], index: 8, kind: input, shape index: {}]   ;;  %s4516_s9 = inlined_call_operand.hbm [shape: bf16[2,256,128], index: 9, kind: output, shape index: {0}]   ;;  %s4517_s10 = inlined_call_operand.hbm [shape: f32[2,2,128], index: 10, kind: output, shape index: {1}]  }
   0x1   :  { %4542 = sst [smem:[#allocation35_spill]] %s4507_s0 }
   0x2   :  { %4543 = sst [smem:[#allocation36_spill]] %s4508_s1 }
   0x3   :  { %4544 = sst [smem:[#allocation37_spill]] %s4516_s9 }
   0x4   :  { %4545 = sst [smem:[#allocation38_spill]] %s4517_s10 }
   0x5   :  { %16 = vsyncpa [#allocation11], 0 }
   0x6   :  { %18 = vsyncpa [#allocation11 + $0x1], 0 }
   0x7   :  { %19 = vsyncpa [#allocation13], 0 }
   0x8   :  { %21 = vsyncpa [#allocation13 + $0x1], 0  ;;  %s3717_s13 = smov 0   ;;  %s3719_s14 = smov 0  }
   0x9   :  { %s3721_s15 = smov 0   ;;  %s3723_s16 = smov 0  }
   0xa   :  { %s3725_s17 = smov 0   ;;  %s3727_s18 = smov 0  }
   0xb   :  { %s3729_s19 = smov 0   ;;  %s3731_s20 = smov 0  }
   0xc   :  { %s3733_s21 = smov 0   ;;  %s3735_s22 = smov 0  }
   0xd   :  { %s3737_s23 = smov 0   ;;  %s3739_s24 = smov 0  }
   0xe   :  { %s3741_s25 = smov 0  }
   0xf LB: > { %4546 = sst [smem:[#allocation16_spill]] %s3600_s13  ;;  %s2689_s26 = sadd.s32 4294967295, %s3648_s25   ;;  %s3648_s25 = sphi %s3741_s25, %s27_s25   ;;  %s3644_s24 = sphi %s3739_s24, %s4601_s24   ;;  %s3640_s23 = sphi %s3737_s23, %s4600_s23   ;;  %s3636_s22 = sphi %s3735_s22, %s4599_s22   ;;  %s3632_s21 = sphi %s3733_s21, %s4598_s21   ;;  %s3628_s20 = sphi %s3731_s20, %s4603_s20   ;;  %s3624_s19 = sphi %s3729_s19, %s4596_s19   ;;  %s3620_s18 = sphi %s3727_s18, %s4595_s18   ;;  %s3616_s17 = sphi %s3725_s17, %s4594_s17   ;;  %s3612_s16 = sphi %s3723_s16, %s4593_s16   ;;  %s3608_s15 = sphi %s3721_s15, %s4592_s15   ;;  %s3604_s14 = sphi %s3719_s14, %s4591_s14   ;;  %s3600_s13 = sphi %s3717_s13, %s4590_s13  }
  0x10   : > { %4547 = sst [smem:[#allocation17_spill]] %s3604_s14  ;;  %s2690_s27 = sadd.s32 4294967294, %s3648_s25  }
  0x11   : > { %4548 = sst [smem:[#allocation18_spill]] %s3608_s15  ;;  %s39_s28 = sadd.s32 1, %s3636_s22 }
  0x12   : > { %4549 = sst [smem:[#allocation19_spill]] %s3612_s16  ;;  %s42_s29 = sadd.s32 1, %s3640_s23 }
  0x13   : > { %4550 = sst [smem:[#allocation20_spill]] %s3616_s17  ;;  %p40_p0 = scmp.ge.s32.totalorder %s39_s28, 2 }
  0x14   : > { %4551 = sst [smem:[#allocation21_spill]] %s3620_s18  ;;  %s46_s30 = sadd.s32 1, %s3644_s24 }
  0x15   : > { %4552 = sst [smem:[#allocation22_spill]] %s3636_s22  ;;  %s260_s11 = smul.u32 %s3636_s22, %s3640_s23 }
  0x16   : > { %4553 = sst [smem:[#allocation23_spill]] %s3640_s23  ;;  %s267_s12 = sadd.s32 1, %s3620_s18 }
  0x17   : > { %4554 = sst [smem:[#allocation24_spill]] %s3644_s24  ;;  %s4605_s28 = smov (%p40_p0, %s39_s28), 0 }
  0x18   : > { %4555 = sst [smem:[#allocation25_spill]] %s3648_s25  ;;  %s4607_s29 = smov (!%p40_p0, %s42_s29), %s3640_s23 }
  0x19   : > { %4556 = sst [smem:[#allocation26_spill]] %s4605_s28  ;;  %p277_p1 = scmp.ne.s32.totalorder %s3620_s18, %s3616_s17 }
  0x1a   : > { %p3795_p2 = scmp.eq.s32.totalorder %s2689_s26, 7  ;;  %p44_p3 = scmp.ge.s32.totalorder %s4607_s29, 2 }
  0x1b   : > { %p283_p4 = scmp.ne.s32.totalorder %s3616_s17, %s3612_s16  ;;  %p3807_p6 = scmp.eq.s32.totalorder %s2690_s27, 7 }
  0x1c   : > { %p3803_p5 = por %p3795_p2, %p277_p1  ;;  %s4609_s29 = smov (%p44_p3, %s4607_s29), 0 }
  0x1d   : > { %4561 = sst [smem:[#allocation28_spill]] %s4609_s29  ;;  %s4611_s30 = smov (!%p44_p3, %s46_s30), %s3644_s24 }
  0x1e   : > { %s4558_s22 = scalar_select %p3803_p5, 1, 0 }
  0x1f   : > { %s261_s26 = smul.u32 %s4609_s29, %s4605_s28  ;;  %p3818_p7 = por %p3807_p6, %p283_p4 }
  0x20   : > { %4559 = sst [smem:[#allocation27_spill]] %s4558_s22  ;;  %p48_p8 = scmp.ge.s32.totalorder %s4611_s30, 2 }
  0x21   : > { %s4562_s16 = scalar_select %p3818_p7, 1, 0 }
  0x22   : > { %s293_s27 = sadd.s32 1, %s3608_s15  ;;  %s263_s9 = ssub.s32 %s260_s11, %s261_s26 }
  0x23   : > { %4563 = sst [smem:[#allocation29_spill]] %s4562_s16  ;;  %p303_p9 = scmp.ne.s32.totalorder %s3608_s15, %s3604_s14 }
  0x24   : > { %s4613_s30 = smov (%p48_p8, %s4611_s30), 0  ;;  %p309_p11 = scmp.ne.s32.totalorder %s3604_s14, %s3600_s13 }
  0x25   : > { %4564 = sst [smem:[#allocation30_spill]] %s4613_s30  ;;  %p3829_p10 = por %p303_p9, %p3795_p2 }
  0x26   : > { %s262_s29 = ssub.s32 %s3644_s24, %s4613_s30  ;;  %p2693_p12 = scmp.ge.s32.totalorder %s3648_s25, 1 }
  0x27   : > { %s4565_s22 = scalar_select %p3829_p10, 1, 0 }
  0x28   : > { %s264_s28 = sor.u32 %s263_s9, %s262_s29  ;;  %p291_p13 = scmp.eq.s32.totalorder %s262_s29, 0 }
  0x29   : > { %4566 = sst [smem:[#allocation31_spill]] %s4565_s22  ;;  %p265_p0 = scmp.eq.s32.totalorder %s264_s28, 0 }
  0x2a   : > { %p3840_p1 = por %p309_p11, %p3807_p6  ;;  %p377_p3 = scmp.lt.s32.totalorder %s3648_s25, 9 }
  0x2b   : > { %s3845_s11 = scalar_select %p291_p13, %s3608_s15, %s293_s27  }
  0x2c   : > { %s4567_s16 = scalar_select %p3840_p1, 1, 0 }
  0x2d   : > { %4569 = sst [smem:[#allocation33_spill]] %s3845_s11  ;;  %p378_p2 = pnand %p2693_p12, %p377_p3 }
  0x2e   : > { %4568 = sst [smem:[#allocation32_spill]] %s4567_s16  ;;  %s4533_s9 = sand.u32 (!%p378_p2), 1, %s3616_s17  }
  0x2f   : > { %s3848_s26 = scalar_select %p265_p0, %s3620_s18, %s267_s12  }
  0x30   : > { %381 = sbr.rel (%p378_p2) target bundleno = 2167 (0x877), region = 56  ;;  %s4534_s10 = sand.u32 (!%p378_p2), 1, %s3604_s14  }
  0x31   : > { %4570 = sst [smem:[#allocation34_spill]] %s3848_s26  ;;  %s2694_s23 = sshll.u32 (!%p378_p2), %s4533_s9, 6 }
  0x32   : > { %s2695_s28 = sshll.u32 (!%p378_p2), %s4534_s10, 1  ;;  %s434_s29 = ssub.s32 (!%p378_p2), 1, %s3628_s20 }
  0x33   : > { %p437_p4 = scmp.lt.s32.totalorder (!%p378_p2), %s3632_s21, 1  ;;  %s435_s12 = smul.u32 (!%p378_p2), %s3624_s19, %s434_s29 }
  0x34   : > { %p459_p6 = scmp.eq.s32.totalorder (!%p378_p2), %s3628_s20, 0  ;;  %p460_p8 = scmp.eq.s32.totalorder (!%p378_p2), %s3624_s19, 0 }
  0x35   : > { %s438_s27 = scalar_select %p437_p4, %s3632_s21, 1 }
  0x36   : > { %s2696_s30 = sshll.u32 %s435_s12, 4  ;;  %s4571_s1 = sld [smem:[#allocation36_spill]] }
  0x37   : > { %p439_p9 = scmp.lt.s32.totalorder %s2696_s30, 31  ;;  %s2697_s24 = sshll.u32 %s438_s27, 5 }
  0x38   : > { %s2843_s26 = sshll.u32 %s438_s27, 3  ;;  %s3866_s15 = scalar_lea.vmem %s4509_s2, %s438_s27 }
  0x39   : > { %s4615_s30 = smov (!%p439_p9, %s2696_s30), 31  ;;  %p461_p11 = pnand %p460_p8, %p459_p6 }
  0x3a   : > { %s442_s29 = sadd.s32 %s2697_s24, %s4615_s30  ;;  %s4572_s0 = sld [smem:[#allocation35_spill]] }
  0x3b   : > { %s2698_s13 = sshll.u32 %s442_s29, 2  ;;  %s3878_s14 = scalar_lea.vmem [#allocation10], %s2694_s23 }
  0x3c   : > { %s452_s10 = scalar_lea.vmem %s4571_s1, %s2843_s26  ;;  %s3880_s17 = scalar_lea.vmem [#allocation12], %s2695_s28 }
  0x3d   : > { %464 = sbr.rel (%p461_p11) target bundleno = 276 (0x114), region = 60 }
  0x40   : > { %s3876_s22 = scalar_lea.vmem %s4572_s0, %s2698_s13 }
  0x42   : > { %vm465_vm0 = vcmask 122880   ;;  %v3650_v0 = vmov 0.0   ;;  %v3335_v1 = vld [vmem:[%s452_s10] sm:$0xff]   ;;  %vm3651_vm1 = vmmov 0   ;;  %vm496_vm2 = vcmask 130048   ;;  %v544_v7 = vld [vmem:[%s4514_s7 + $0x8] sm:$0xff] }
  0x43   : > { %466 = vst.msk [vmem:[#allocation2] sm:$0x1] %vm465_vm0, %v3650_v0  ;;  %467 = vst.msk [vmem:[#allocation3] sm:$0x1] %vm465_vm0, %v3650_v0  ;;  %3070 = vmatprep.subr.bf16.mxu0 %v3650_v0  ;;  %3076 = vmatprep.subr.bf16.mxu1 %v3650_v0  ;;  %v3336_v2 = vld [vmem:[%s4511_s4] sm:$0xff]   ;;  %v3652_v6 = vmov 0  }
  0x44   : > { %3072 = vmatprep.mubr.msk.bf16.mxu0 %vm3651_vm1, %v3650_v0  ;;  %3078 = vmatprep.mubr.msk.bf16.mxu1 %vm3651_vm1, %v3650_v0  ;;  %v3337_v3 = vld [vmem:[%s4513_s6] sm:$0xff]   ;;  %v474_v8 = vld [vmem:[%s4512_s5 + $0x8] sm:$0xff] }
  0x45   : > { %3071 = vmatpush3.bf16.msra.mxu0 %v3335_v1  ;;  %3077 = vmatpush3.bf16.msra.mxu1 %v3335_v1  ;;  %v543_v4 = vld [vmem:[%s4514_s7] sm:$0xff] }
  0x46   : > { %v473_v5 = vld [vmem:[%s4512_s5] sm:$0xff]  ;;  %3334 = vset.pattern.permute.xlu1 %v3652_v6  ;;  %3333 = vset.pattern.permute.xlu0 %v3652_v6 }
  0x47   : > { %547 = vperm.xlu1 %3334, %v543_v4   ;;  %477 = vperm.xlu0 %3333, %v473_v5   ;;  %v2706_v19 = vld [vmem:[%s3866_s15] ss:$0 sm:$0xff] }
  0x48   : > { %3073 = vmatmul.mubr.msk.bf16.vlgmr.msra.gmra.mxu0 %vm496_vm2, %v3336_v2  ;;  %3079 = vmatmul.mubr.msk.bf16.vlgmr.msra.gmra.mxu1 %vm496_vm2, %v3337_v3 }
  0x4b   : > { %552 = vperm.xlu1 %3334, %v544_v7   ;;  %482 = vperm.xlu0 %3333, %v474_v8  }
  0xc2   : > { %v548_v9 = vpop.permute.xlu1 %547  ;;  %v478_v10 = vpop.permute.xlu0 %477 }
  0xc6   : > { %v553_v15 = vpop.permute.xlu1 %552  ;;  %v483_v16 = vpop.permute.xlu0 %482 }
 0x108   : > { %v534_v11 = vpop.f32.mrf.mxu0  ;;  %v597_v12 = vpop.f32.mrf.mxu1 }
 0x109   : > { %v535_v17 = vadd.f32 %v534_v11, %v478_v10  ;;  %v598_v18 = vadd.f32 %v597_v12, %v548_v9 }
 0x10a   : > { %v3074_v13 = vpop.f32.mrf.mxu0  ;;  %v3080_v14 = vpop.f32.mrf.mxu1 }
 0x10b   : > { %v610_v26 = vmul.f32 %v2706_v19, %v535_v17  ;;  %v622_v27 = vmul.f32 %v2706_v19, %v598_v18 }
 0x10c   : > { %v537_v20 = vpop.f32.mrf.mxu0  ;;  %v600_v21 = vpop.f32.mrf.mxu1 }
 0x10d   : > { %v538_v22 = vadd.f32 %v537_v20, %v483_v16  ;;  %v601_v23 = vadd.f32 %v600_v21, %v553_v15 }
 0x10e   : > { %v3075_v24 = vpop.f32.mrf.mxu0  ;;  %v3081_v25 = vpop.f32.mrf.mxu1 }
 0x10f   : > { %v611_v28 = vmul.f32 %v2706_v19, %v538_v22  ;;  %v623_v29 = vmul.f32 %v2706_v19, %v601_v23 }
 0x111   : > { %v2915_v30 = vpack.c.bf16 %v611_v28, %v610_v26  ;;  %v2920_v31 = vpack.c.bf16 %v623_v29, %v622_v27 }
 0x113   : > { %2916 = vst [vmem:[#allocation5] sm:$0xff] %v2915_v30   ;;  %2921 = vst [vmem:[#allocation6] sm:$0xff] %v2920_v31  }
 0x114 PF: > { %p2711_p12 = scmp.ne.s32.totalorder %s3628_s20, 0 }
 0x115   : > { %s2729_s12 = sshll.u32 (!%p2711_p12), %s3624_s19, 7 }
 0x116   : > { %636 = sbr.rel (%p2711_p12) target bundleno = 535 (0x217), region = 64  ;;  %s985_s16 = sshra.s32 (!%p2711_p12), %s2729_s12, 3 }
 0x117   : > { %s2746_s18 = sshll.u32 (!%p2711_p12), %s985_s16, 2 }
 0x118   : > { %s3924_s13 = scalar_lea.vmem (!%p2711_p12), [#allocation9], %s2746_s18 }
 0x11b   : > { %v3338_v32 = vld [vmem:[%s4510_s3] sm:$0xff]   ;;  %vm701_vm3 = vcmask 130048   ;;  %v3340_v34 = vld [vmem:[%s3876_s22 + $0x8] sm:$0xff]   ;;  %v3341_v35 = vld [vmem:[%s3876_s22 + $0x10] sm:$0xff]   ;;  %vm989_vm4 = vcmask 125952   ;;  %vm862_vm5 = vcmask 122880  }
 0x11c   : > { %v3339_v33 = vld [vmem:[%s3876_s22] sm:$0xff]   ;;  %3082 = vmatprep.subr.bf16.mxu0 %v3338_v32  ;;  %3200 = vmatprep.subr.bf16.mxu1 %v3338_v32  ;;  %v3344_v37 = vld [vmem:[%s3876_s22 + $0x28] sm:$0xff]   ;;  %v3345_v38 = vld [vmem:[%s3876_s22 + $0x30] sm:$0xff]  }
 0x11d   : > { %3083 = vmatpush3.bf16.msra.mxu0 %v3338_v32  ;;  %3084 = vmatprep.mubr.msk.bf16.mxu0 %vm701_vm3, %v3339_v33  ;;  %v3343_v36 = vld [vmem:[%s3876_s22 + $0x20] sm:$0xff]   ;;  %v3342_v39 = vld [vmem:[%s3876_s22 + $0x18] sm:$0xff]  }
 0x11e   : > { %3201 = vmatpush3.bf16.msra.mxu1 %v3338_v32  ;;  %3092 = vmatprep.mubr.msk.bf16.mxu1 %vm701_vm3, %v3343_v36  ;;  %v3346_v40 = vld [vmem:[%s3876_s22 + $0x38] sm:$0xff]  }
 0x120   : > { %3085 = vmatmul.mubr.msk.bf16.vlgmr.msra.gmra.mxu0 %vm701_vm3, %v3340_v34 }
 0x121   : > { %3088 = vmatprep.mubr.msk.bf16.mxu0 %vm701_vm3, %v3341_v35  ;;  %3093 = vmatmul.mubr.msk.bf16.vlgmr.msra.gmra.mxu1 %vm701_vm3, %v3344_v37 }
 0x122   : > { %3096 = vmatprep.mubr.msk.bf16.mxu1 %vm701_vm3, %v3345_v38 }
 0x128   : > { %3089 = vmatmul.mubr.msk.bf16.gmra.mxu0 %vm701_vm3, %v3342_v39 }
 0x129   : > { %3097 = vmatmul.mubr.msk.bf16.gmra.mxu1 %vm701_vm3, %v3346_v40 }
 0x1e0   : > { %v3086_v41 = vpop.f32.mrf.mxu0 }
 0x1e1   : > { %v2850_v42 = vpack.c.bf16 %v3086_v41, %v3086_v41  ;;  %v3922_v44 = vpop.f32.mrf.mxu1  ;;  %v867_v51 = vmul.f32 %v3086_v41, %v3086_v41  ;;  %v827_v59 = vsel %vm701_vm3, %v3086_v41, 0.0 }
 0x1e2   : > { %v760_v43 = vpop.f32.mrf.mxu0  ;;  %v2858_v47 = vpack.c.bf16 %v3922_v44, %v3922_v44 }
 0x1e3   : > { %992 = vst.msk [vmem:[%s3924_s13 + $0x8] sm:$0xf] %vm989_vm4, %v2850_v42  ;;  %v2848_v45 = vpack.c.bf16 %v760_v43, %v760_v43  ;;  %v3930_v48 = vpop.f32.mrf.mxu1  ;;  %v865_v49 = vmul.f32 %v760_v43, %v760_v43  ;;  %v824_v55 = vsel %vm701_vm3, %v760_v43, 0.0  ;;  %v884_v8 = vsel %vm701_vm3, %v867_v51, 0.0 }
 0x1e4   : > { %v3087_v46 = vpop.f32.mrf.mxu0  ;;  %1000 = vst.msk [vmem:[%s3924_s13 + $0x28] sm:$0xf] %vm989_vm4, %v2858_v47  ;;  %v2856_v53 = vpack.c.bf16 %v3930_v48, %v3930_v48  ;;  %v873_v41 = vmul.f32 %v3930_v48, %v3930_v48  ;;  %v839_v47 = vsel %vm701_vm3, %v3930_v48, 0.0 }
 0x1e5   : > { %990 = vst.msk [vmem:[%s3924_s13] sm:$0xf] %vm989_vm4, %v2848_v45  ;;  %v2851_v50 = vpack.c.bf16 %v3087_v46, %v3087_v46  ;;  %v3938_v54 = vpop.f32.mrf.mxu1  ;;  %v881_v63 = vsel %vm701_vm3, %v865_v49, 0.0  ;;  %v868_v0 = vmul.f32 %v3087_v46, %v3087_v46  ;;  %v829_v9 = vsel %vm701_vm3, %v3087_v46, 0.0 }
 0x1e6   : > { %v763_v52 = vpop.f32.mrf.mxu0  ;;  %998 = vst.msk [vmem:[%s3924_s13 + $0x20] sm:$0xf] %vm989_vm4, %v2856_v53  ;;  %v2859_v6 = vpack.c.bf16 %v3938_v54, %v3938_v54  ;;  %v875_v53 = vmul.f32 %v3922_v44, %v3922_v44 }
 0x1e7   : > { %993 = vst.msk [vmem:[%s3924_s13 + $0xc] sm:$0xf] %vm989_vm4, %v2851_v50  ;;  %v825_v56 = vsel %vm701_vm3, %v763_v52, 0.0  ;;  %v866_v57 = vmul.f32 %v763_v52, %v763_v52  ;;  %v2849_v58 = vpack.c.bf16 %v763_v52, %v763_v52  ;;  %v3947_v62 = vpop.f32.mrf.mxu1  ;;  %v886_v16 = vsel %vm701_vm3, %v868_v0, 0.0 }
 0x1e8   : > { %v826_v60 = vadd.f32 %v825_v56, %v824_v55  ;;  %v3090_v61 = vpop.f32.mrf.mxu0  ;;  %1001 = vst.msk [vmem:[%s3924_s13 + $0x2c] sm:$0xf] %vm989_vm4, %v2859_v6  ;;  %v2857_v23 = vpack.c.bf16 %v3947_v62, %v3947_v62  ;;  %v874_v49 = vmul.f32 %v3947_v62, %v3947_v62  ;;  %v896_v55 = vsel %vm701_vm3, %v873_v41, 0.0 }
 0x1e9   : > { %v882_v1 = vsel %vm701_vm3, %v866_v57, 0.0  ;;  %991 = vst.msk [vmem:[%s3924_s13 + $0x4] sm:$0xf] %vm989_vm4, %v2849_v58  ;;  %v2854_v2 = vpack.c.bf16 %v3090_v61, %v3090_v61  ;;  %v3955_v7 = vpop.f32.mrf.mxu1  ;;  %v871_v19 = vmul.f32 %v3090_v61, %v3090_v61  ;;  %v835_v31 = vsel %vm701_vm3, %v3090_v61, 0.0 }
 0x1ea   : > { %v828_v3 = vadd.f32 %v827_v59, %v826_v60  ;;  %v883_v4 = vadd.f32 %v882_v1, %v881_v63  ;;  %v776_v5 = vpop.f32.mrf.mxu0  ;;  %999 = vst.msk [vmem:[%s3924_s13 + $0x24] sm:$0xf] %vm989_vm4, %v2857_v23  ;;  %v2862_v34 = vpack.c.bf16 %v3955_v7, %v3955_v7  ;;  %v841_v56 = vsel %vm701_vm3, %v3947_v62, 0.0 }
 0x1eb   : > { %996 = vst.msk [vmem:[%s3924_s13 + $0x18] sm:$0xf] %vm989_vm4, %v2854_v2  ;;  %v869_v10 = vmul.f32 %v776_v5, %v776_v5  ;;  %v2852_v11 = vpack.c.bf16 %v776_v5, %v776_v5  ;;  %v808_v15 = vpop.f32.mrf.mxu1  ;;  %v831_v17 = vsel %vm701_vm3, %v776_v5, 0.0  ;;  %v892_v39 = vsel %vm701_vm3, %v871_v19, 0.0 }
 0x1ec   : > { %v885_v12 = vadd.f32 %v884_v8, %v883_v4  ;;  %v830_v13 = vadd.f32 %v829_v9, %v828_v3  ;;  %v3091_v14 = vpop.f32.mrf.mxu0  ;;  %v2860_v37 = vpack.c.bf16 %v808_v15, %v808_v15  ;;  %1004 = vst.msk [vmem:[%s3924_s13 + $0x38] sm:$0xf] %vm989_vm4, %v2862_v34  ;;  %v843_v58 = vsel %vm701_vm3, %v3922_v44, 0.0 }
 0x1ed   : > { %994 = vst.msk [vmem:[%s3924_s13 + $0x10] sm:$0xf] %vm989_vm4, %v2852_v11  ;;  %v2855_v18 = vpack.c.bf16 %v3091_v14, %v3091_v14  ;;  %v3969_v24 = vpop.f32.mrf.mxu1  ;;  %v888_v25 = vsel %vm701_vm3, %v869_v10, 0.0  ;;  %v872_v32 = vmul.f32 %v3091_v14, %v3091_v14  ;;  %v837_v40 = vsel %vm701_vm3, %v3091_v14, 0.0 }
 0x1ee   : > { %v832_v20 = vadd.f32 %v831_v17, %v830_v13  ;;  %v887_v21 = vadd.f32 %v886_v16, %v885_v12  ;;  %v779_v22 = vpop.f32.mrf.mxu0  ;;  %v2863_v42 = vpack.c.bf16 %v3969_v24, %v3969_v24  ;;  %1002 = vst.msk [vmem:[%s3924_s13 + $0x30] sm:$0xf] %vm989_vm4, %v2860_v37  ;;  %v876_v59 = vmul.f32 %v3938_v54, %v3938_v54 }
 0x1ef   : > { %997 = vst.msk [vmem:[%s3924_s13 + $0x1c] sm:$0xf] %vm989_vm4, %v2855_v18  ;;  %v833_v26 = vsel %vm701_vm3, %v779_v22, 0.0  ;;  %v870_v27 = vmul.f32 %v779_v22, %v779_v22  ;;  %v2853_v28 = vpack.c.bf16 %v779_v22, %v779_v22  ;;  %v811_v38 = vpop.f32.mrf.mxu1  ;;  %v894_v46 = vsel %vm701_vm3, %v872_v32, 0.0 }
 0x1f0   : > { %v889_v29 = vadd.f32 %v888_v25, %v887_v21  ;;  %v834_v30 = vadd.f32 %v833_v26, %v832_v20  ;;  %1005 = vst.msk [vmem:[%s3924_s13 + $0x3c] sm:$0xf] %vm989_vm4, %v2863_v42  ;;  %v2861_v50 = vpack.c.bf16 %v811_v38, %v811_v38  ;;  %v898_v60 = vsel %vm701_vm3, %v874_v49, 0.0 }
 0x1f1   : > { %v890_v33 = vsel %vm701_vm3, %v870_v27, 0.0  ;;  %995 = vst.msk [vmem:[%s3924_s13 + $0x14] sm:$0xf] %vm989_vm4, %v2853_v28  ;;  %v900_v0 = vsel %vm701_vm3, %v875_v53, 0.0  ;;  %v845_v1 = vsel %vm701_vm3, %v3938_v54, 0.0  ;;  %v877_v62 = vmul.f32 %v808_v15, %v808_v15 }
 0x1f2   : > { %v836_v35 = vadd.f32 %v835_v31, %v834_v30  ;;  %v891_v36 = vadd.f32 %v890_v33, %v889_v29  ;;  %1003 = vst.msk [vmem:[%s3924_s13 + $0x34] sm:$0xf] %vm989_vm4, %v2861_v50  ;;  %v902_v4 = vsel %vm701_vm3, %v876_v59, 0.0  ;;  %v847_v5 = vsel %vm701_vm3, %v808_v15, 0.0  ;;  %v823_v33 = vld [vmem:[#allocation2] sm:$0x1] }
 0x1f3   : > { %v878_v44 = vmul.f32 %v811_v38, %v811_v38  ;;  %v879_v9 = vmul.f32 %v3955_v7, %v3955_v7  ;;  %v904_v10 = vsel %vm701_vm3, %v877_v62, 0.0  ;;  %v849_v11 = vsel %vm701_vm3, %v811_v38, 0.0 }
 0x1f4   : > { %v838_v43 = vadd.f32 %v837_v40, %v836_v35  ;;  %v893_v45 = vadd.f32 %v892_v39, %v891_v36  ;;  %v851_v54 = vsel %vm701_vm3, %v3955_v7, 0.0  ;;  %v880_v14 = vmul.f32 %v3969_v24, %v3969_v24  ;;  %v864_v36 = vld [vmem:[#allocation3] sm:$0x1] }
 0x1f5   : > { %v906_v15 = vsel %vm701_vm3, %v878_v44, 0.0  ;;  %v908_v18 = vsel %vm701_vm3, %v879_v9, 0.0  ;;  %v853_v19 = vsel %vm701_vm3, %v3969_v24, 0.0 }
 0x1f6   : > { %v895_v51 = vadd.f32 %v894_v46, %v893_v45  ;;  %v840_v52 = vadd.f32 %v839_v47, %v838_v43  ;;  %v910_v22 = vsel %vm701_vm3, %v880_v14, 0.0 }
 0x1f8   : > { %v842_v57 = vadd.f32 %v841_v56, %v840_v52  ;;  %v897_v48 = vadd.f32 %v896_v55, %v895_v51 }
 0x1fa   : > { %v844_v61 = vadd.f32 %v843_v58, %v842_v57  ;;  %v899_v63 = vadd.f32 %v898_v60, %v897_v48 }
 0x1fc   : > { %v901_v2 = vadd.f32 %v900_v0, %v899_v63  ;;  %v846_v3 = vadd.f32 %v845_v1, %v844_v61 }
 0x1fe   : > { %v848_v6 = vadd.f32 %v847_v5, %v846_v3  ;;  %v903_v8 = vadd.f32 %v902_v4, %v901_v2 }
 0x200   : > { %v905_v12 = vadd.f32 %v904_v10, %v903_v8  ;;  %v850_v13 = vadd.f32 %v849_v11, %v848_v6 }
 0x202   : > { %v852_v16 = vadd.f32 %v851_v54, %v850_v13  ;;  %v907_v17 = vadd.f32 %v906_v15, %v905_v12 }
 0x204   : > { %v854_v20 = vadd.f32 %v853_v19, %v852_v16  ;;  %v909_v21 = vadd.f32 %v908_v18, %v907_v17 }
 0x206   : > { %v855_v23 = vrot.slane %v854_v20, 4  ;;  %v911_v25 = vadd.f32 %v910_v22, %v909_v21 }
 0x208   : > { %v856_v26 = vadd.f32 %v855_v23, %v854_v20  ;;  %v912_v7 = vrot.slane %v911_v25, 4 }
 0x20a   : > { %v857_v27 = vrot.slane %v856_v26, 2  ;;  %v913_v28 = vadd.f32 %v912_v7, %v911_v25 }
 0x20c   : > { %v858_v29 = vadd.f32 %v857_v27, %v856_v26  ;;  %v914_v30 = vrot.slane %v913_v28, 2 }
 0x20e   : > { %v859_v31 = vrot.slane %v858_v29, 1  ;;  %v915_v32 = vadd.f32 %v914_v30, %v913_v28 }
 0x210   : > { %v860_v34 = vadd.f32 %v859_v31, %v858_v29  ;;  %v916_v35 = vrot.slane %v915_v32, 1 }
 0x212   : > { %v861_v24 = vadd.f32 %v860_v34, %v823_v33  ;;  %v917_v37 = vadd.f32 %v916_v35, %v915_v32 }
 0x214   : > { %863 = vst.msk [vmem:[#allocation2] sm:$0x1] %vm862_vm5, %v861_v24  ;;  %v918_v38 = vadd.f32 %v917_v37, %v864_v36 }
 0x216   : > { %919 = vst.msk [vmem:[#allocation3] sm:$0x1] %vm862_vm5, %v918_v38 }
 0x217 PF: > { %p1006_p13 = scmp.eq.s32.totalorder %s3628_s20, 1 }
 0x219   : > { %p1007_p0 = pnand %p1006_p13, %p460_p8 }
 0x21a   : > { %s3655_s22 = smov (!%p1007_p0), 120  }
 0x21b   : > { %1010 = sbr.rel (%p1007_p0) target bundleno = 886 (0x376), region = 68 }
 0x220   : > { %v1012_v39 = vld [vmem:[#allocation2] sm:$0x1]  ;;  %v1014_v40 = vld [vmem:[#allocation3] sm:$0x1]  ;;  %v1028_v43 = vld [vmem:[#allocation5] sm:$0xf]  ;;  %v1078_v55 = vlaneseq }
 0x221   : > { %v1013_v41 = vmul.f32 0.00390625, %v1012_v39  ;;  %v1015_v42 = vmul.f32 0.00390625, %v1014_v40  ;;  %vm1034_vm6 = vcmask 1043456   ;;  %v3653_v45 = vmov 0.0   ;;  %v1029_v47 = vld [vmem:[#allocation5 + $0x4] sm:$0xf] }
 0x222   : > { %1011 = vst [vmem:[%s3880_s17] sm:$0x3] %v3653_v45  ;;  %3100 = vmatprep.subr.bf16.mxu0 %v3653_v45  ;;  %v1036_v46 = vsel %vm1034_vm6, %v1028_v43, 0  ;;  %3105 = vmatprep.subr.bf16.mxu1 %v3653_v45  ;;  %vm3654_vm7 = vmmov 0   ;;  %v1087_v50 = vsel %vm1034_vm6, %v1029_v47, 0  ;;  %v1079_v56 = vshrl.u32 %v1078_v55, 7 }
 0x223   : > { %v1016_v49 = vmul.f32 %v1013_v41, %v1013_v41  ;;  %3101 = vmatpush3.bf16.msra.mxu0 %v1036_v46  ;;  %3102 = vmatprep.mubr.msk.f32.mxu0 %vm3654_vm7, %v3653_v45  ;;  %vm1022_vm8 = vcmask 122880   ;;  %vm1030_vm9 = vcmask 64512   ;;  %v1025_v63 = vld [vmem:[%s3866_s15] sm:$0x1] }
 0x224   : > { %3106 = vmatpush3.bf16.msra.mxu1 %v1087_v50  ;;  %3107 = vmatprep.mubr.msk.f32.mxu1 %vm3654_vm7, %v3653_v45  ;;  %v1080_v58 = vsub.s32 0, %v1079_v56  ;;  %v1026_v0 = vmul.f32 10000.0, %v1025_v63 }
 0x225   : > { %v1017_v51 = vsub.f32 %v1015_v42, %v1016_v49 }
 0x226   : > { %v2747_v1 = vadd.f32 -10000.0, %v1026_v0 }
 0x227   : > { %v1018_v52 = vmax.f32 %v1017_v51, 0.0 }
 0x229   : > { %v1019_v53 = vadd.f32 1e-05, %v1018_v52 }
 0x22b   : > { %3347 = vrsqrt.f32 %v1019_v53 }
 0x238   : > { %v3348_v57 = vpop.eup %3347 }
 0x239   : > { %v1021_v48 = vmul.f32 0.25, %v3348_v57 }
 0x23b   : > { %1023 = vst.msk [vmem:[#allocation4] sm:$0x1] %vm1022_vm8, %v1021_v48  ;;  %v1024_v59 = vmul.f32 %v1021_v48, %v1013_v41 }
 0x23d   : > { %v1081_v60 = vrot.slane %v1024_v59, %v1080_v58  ;;  %3103 = vmatmul.mubr.msk.f32.vlgmr.msra.gmra.mxu0 %vm1030_vm9, %v1024_v59 }
 0x23f   : > { %1082 = vrot.lane.b32.xlu0 %v1081_v60, %s3655_s22 }
 0x2b1   : > { %v1083_v61 = vpop.permute.xlu0 %1082 }
 0x2b2   : > { %3108 = vmatmul.mubr.msk.f32.vlgmr.msra.gmra.mxu1 %vm1030_vm9, %v1083_v61 }
 0x2fd   : > { %v1072_v62 = vpop.f32.mrf.mxu0 }
 0x2fe   : > { %v1076_v2 = vsub.f32 %v2747_v1, %v1072_v62 }
 0x2ff   : > { %v3104_v3 = vpop.f32.mrf.mxu0 }
 0x300   : > { %1077 = vst [vmem:[#allocation7] sm:$0x1] %v1076_v2 }
 0x372   : > { %v1123_v4 = vpop.f32.mrf.mxu1 }
 0x373   : > { %v1127_v5 = vsub.f32 %v2747_v1, %v1123_v4 }
 0x374   : > { %v3109_v44 = vpop.f32.mrf.mxu1 }
 0x375   : > { %1128 = vst [vmem:[#allocation7 + $0x1] sm:$0x1] %v1127_v5 }
 0x376 PF: > { %p2750_p3 = scmp.ne.s32.totalorder %s3628_s20, 1 }
 0x377   : > { %s2751_s24 = sshll.u32 (!%p2750_p3), %s3624_s19, 7  ;;  %s3656_s11 = smov (!%p2750_p3), 120  }
 0x378   : > { %1131 = sbr.rel (%p2750_p3) target bundleno = 2113 (0x841), region = 72  ;;  %s1133_s15 = sshra.s32 (!%p2750_p3), %s2751_s24, 3 }
 0x379   : > { %s2752_s25 = sshll.u32 (!%p2750_p3), %s1133_s15, 2  ;;  %s3657_s10 = smov (!%p2750_p3), 8  }
 0x37a   : > { %s1136_s30 = scalar_lea.vmem (!%p2750_p3), [#allocation9], %s2752_s25 }
 0x37d   : > { %v1200_v6 = vld [vmem:[#allocation5] sm:$0xf]  ;;  %vm1234_vm10 = vcmask 1043456   ;;  %v1201_v9 = vld [vmem:[#allocation5 + $0x4] sm:$0xf]  ;;  %vm1209_vm11 = vcmask 64512   ;;  %v1205_v4 = vlaneseq }
 0x37e   : > { %3204 = vmatprep.subr.msk.bf16.mxu0 %vm1234_vm10, %v1200_v6  ;;  %v1236_v8 = vsel %vm1234_vm10, %v1200_v6, 0  ;;  %3205 = vmatprep.subr.msk.bf16.mxu1 %vm1234_vm10, %v1200_v6  ;;  %v2753_v10 = vld [vmem:[#allocation4] ss:$0 sm:$0xff]  ;;  %v2994_v12 = vld [vmem:[%s1136_s30 + $0x8] sm:$0xff]   ;;  %v2995_v13 = vld [vmem:[%s1136_s30 + $0x10] sm:$0xff]   ;;  %v1718_v32 = vsel %vm1234_vm10, %v1201_v9, 0 }
 0x37f   : > { %3111 = vmatpush3.bf16.msra.mxu0 %v1236_v8  ;;  %3203 = vmatpush3.bf16.msra.mxu1 %v1236_v8  ;;  %v2923_v11 = vld [vmem:[%s1136_s30] sm:$0xff]   ;;  %v2928_v15 = vunpack.c.l.bf16 %v2994_v12  ;;  %v2929_v16 = vunpack.c.h.bf16 %v2994_v12  ;;  %v2996_v17 = vld [vmem:[%s1136_s30 + $0x18] sm:$0xff]   ;;  %v2932_v18 = vunpack.c.l.bf16 %v2995_v13  ;;  %v2933_v19 = vunpack.c.h.bf16 %v2995_v13  ;;  %v2998_v27 = vld [vmem:[%s1136_s30 + $0x28] sm:$0xff]  }
 0x380   : > { %3206 = vmatprep.subr.msk.bf16.mxu0 %vm1234_vm10, %v1201_v9  ;;  %v2924_v54 = vunpack.c.l.bf16 %v2923_v11  ;;  %v2925_v14 = vunpack.c.h.bf16 %v2923_v11  ;;  %v2936_v20 = vunpack.c.l.bf16 %v2996_v17  ;;  %v2937_v21 = vunpack.c.h.bf16 %v2996_v17  ;;  %v2997_v22 = vld [vmem:[%s1136_s30 + $0x20] sm:$0xff]   ;;  %v2999_v31 = vld [vmem:[%s1136_s30 + $0x30] sm:$0xff]   ;;  %v3000_v24 = vld [vmem:[%s1136_s30 + $0x38] sm:$0xff]  }
 0x381   : > { %v1178_v26 = vmul.f32 %v2928_v15, %v2753_v10  ;;  %v1179_v7 = vmul.f32 %v2929_v16, %v2753_v10  ;;  %v1180_v28 = vmul.f32 %v2932_v18, %v2753_v10  ;;  %v1181_v29 = vmul.f32 %v2933_v19, %v2753_v10  ;;  %v1204_v6 = vld [vmem:[#allocation7] sm:$0x3] }
 0x382   : > { %v1176_v23 = vmul.f32 %v2924_v54, %v2753_v10  ;;  %v1177_v25 = vmul.f32 %v2925_v14, %v2753_v10  ;;  %v1182_v30 = vmul.f32 %v2936_v20, %v2753_v10  ;;  %v2940_v35 = vunpack.c.l.bf16 %v2997_v22 }
 0x383   : > { %v1193_v34 = vpack.c.bf16 %v1179_v7, %v1178_v26  ;;  %v2941_v36 = vunpack.c.h.bf16 %v2997_v22  ;;  %v1194_v37 = vpack.c.bf16 %v1181_v29, %v1180_v28  ;;  %v1183_v38 = vmul.f32 %v2937_v21, %v2753_v10 }
 0x384   : > { %v1192_v33 = vpack.c.bf16 %v1177_v25, %v1176_v23  ;;  %v2944_v39 = vunpack.c.l.bf16 %v2998_v27  ;;  %v2945_v40 = vunpack.c.h.bf16 %v2998_v27  ;;  %v1184_v41 = vmul.f32 %v2940_v35, %v2753_v10 }
 0x385   : > { %v1185_v42 = vmul.f32 %v2941_v36, %v2753_v10  ;;  %v2948_v43 = vunpack.c.l.bf16 %v2999_v31  ;;  %v2949_v45 = vunpack.c.h.bf16 %v2999_v31  ;;  %1681 = vrot.lane.b32.xlu1 %v1194_v37, %s3656_s11  ;;  %v2952_v49 = vunpack.c.l.bf16 %v3000_v24 }
 0x386   : > { %1677 = vrot.lane.b32.xlu0 %v1192_v33, %s3656_s11  ;;  %3112 = vmatprep.mubr.msk.bf16.mxu0 %vm1209_vm11, %v1192_v33  ;;  %v1186_v46 = vmul.f32 %v2944_v39, %v2753_v10  ;;  %v1187_v47 = vmul.f32 %v2945_v40, %v2753_v10  ;;  %v2953_v50 = vunpack.c.h.bf16 %v3000_v24  ;;  %v1195_v55 = vpack.c.bf16 %v1183_v38, %v1182_v30 }
 0x387   : > { %3113 = vmatmul.mubr.msk.bf16.vlgmr.msra.gmra.mxu0 %vm1209_vm11, %v1193_v34  ;;  %v1196_v51 = vpack.c.bf16 %v1185_v42, %v1184_v41  ;;  %v1188_v52 = vmul.f32 %v2948_v43, %v2753_v10  ;;  %v1189_v53 = vmul.f32 %v2949_v45, %v2753_v10  ;;  %v1190_v48 = vmul.f32 %v2952_v49, %v2753_v10 }
 0x388   : > { %3116 = vmatprep.mubr.msk.bf16.mxu0 %vm1209_vm11, %v1194_v37  ;;  %3147 = vmatpush3.bf16.msra.mxu0 %v1718_v32  ;;  %v1197_v56 = vpack.c.bf16 %v1187_v47, %v1186_v46  ;;  %v1191_v58 = vmul.f32 %v2953_v50, %v2753_v10  ;;  %v1206_v5 = vshrl.u32 %v1205_v4, 7  ;;  %vm1648_vm12 = vcmask 60416  }
 0x389   : > { %3120 = vmatprep.mubr.msk.bf16.mxu1 %vm1209_vm11, %v1196_v51  ;;  %v1198_v57 = vpack.c.bf16 %v1189_v53, %v1188_v52  ;;  %1683 = vrot.lane.b32.xlu1 %v1195_v55, %s3656_s11  ;;  %vm2162_vm13 = vcmask 126016   ;;  %vm2243_vm14 = vcmask 130048  }
 0x38a   : > { %1679 = vrot.lane.b32.xlu0 %v1193_v34, %s3656_s11  ;;  %3121 = vmatmul.mubr.msk.bf16.vlgmr.msra.gmra.mxu1 %vm1209_vm11, %v1197_v56  ;;  %v1199_v59 = vpack.c.bf16 %v1191_v58, %v1190_v48  ;;  %v1207_v44 = vsub.s32 0, %v1206_v5  ;;  %v1667_v39 = vsub.s32 1, %v1206_v5 }
 0x38b   : > { %3124 = vmatprep.mubr.msk.bf16.mxu1 %vm1209_vm11, %v1198_v57 }
 0x38c   : > { %v1208_v8 = vrot.slane %v1204_v6, %v1207_v44  ;;  %v1668_v41 = vrot.slane %v1204_v6, %v1667_v39 }
 0x38d   : > { %1687 = vrot.lane.b32.xlu1 %v1197_v56, %s3656_s11 }
 0x38e   : > { %1685 = vrot.lane.b32.xlu0 %v1196_v51, %s3656_s11 }
 0x38f   : > { %3117 = vmatmul.mubr.msk.bf16.gmra.mxu0 %vm1209_vm11, %v1195_v55 }
 0x391   : > { %1691 = vrot.lane.b32.xlu1 %v1199_v59, %s3656_s11 }
 0x392   : > { %1689 = vrot.lane.b32.xlu0 %v1198_v57, %s3656_s11  ;;  %3125 = vmatmul.mubr.msk.bf16.gmra.mxu1 %vm1209_vm11, %v1199_v59 }
 0x3f7   : > { %v1682_v61 = vpop.permute.xlu1 %1681 }
 0x3f8   : > { %v1678_v60 = vpop.permute.xlu0 %1677 }
 0x3f9   : > { %3148 = vmatprep.mubr.msk.bf16.mxu0 %vm1209_vm11, %v1678_v60 }
 0x3fb   : > { %v1684_v0 = vpop.permute.xlu1 %1683 }
 0x3fc   : > { %v1680_v63 = vpop.permute.xlu0 %1679 }
 0x3fd   : > { %3149 = vmatmul.mubr.msk.bf16.vlgmr.msra.gmra.mxu0 %vm1209_vm11, %v1680_v63 }
 0x3fe   : > { %3152 = vmatprep.mubr.msk.bf16.mxu0 %vm1209_vm11, %v1682_v61 }
 0x3ff   : > { %v1688_v62 = vpop.permute.xlu1 %1687 }
 0x400   : > { %v1686_v1 = vpop.permute.xlu0 %1685 }
 0x403   : > { %v1692_v3 = vpop.permute.xlu1 %1691 }
 0x404   : > { %v1690_v2 = vpop.permute.xlu0 %1689 }
 0x405   : > { %3153 = vmatmul.mubr.msk.bf16.gmra.mxu0 %vm1209_vm11, %v1684_v0 }
 0x406   : > { %3156 = vmatprep.mubr.msk.bf16.mxu0 %vm1209_vm11, %v1686_v1 }
 0x40d   : > { %3157 = vmatmul.mubr.msk.bf16.gmra.mxu0 %vm1209_vm11, %v1688_v62 }
 0x40e   : > { %3160 = vmatprep.mubr.msk.bf16.mxu0 %vm1209_vm11, %v1690_v2 }
 0x415   : > { %3161 = vmatmul.mubr.msk.bf16.gmra.mxu0 %vm1209_vm11, %v1692_v3 }
 0x447   : > { %v3114_v9 = vpop.f32.mrf.mxu0 }
 0x448   : > { %v4068_v54 = vadd.f32 %v3114_v9, %v1208_v8 }
 0x449   : > { %v1272_v10 = vpop.f32.mrf.mxu0 }
 0x44a   : > { %v4066_v11 = vadd.f32 %v1272_v10, %v1208_v8  ;;  %v3122_v13 = vpop.f32.mrf.mxu1 }
 0x44b   : > { %v3115_v12 = vpop.f32.mrf.mxu0  ;;  %v4091_v31 = vadd.f32 %v3122_v13, %v1208_v8 }
 0x44c   : > { %1335 = vmax.xlane.f32.xlu0 %v4066_v11  ;;  %v1304_v15 = vpop.f32.mrf.mxu1  ;;  %v4073_v19 = vadd.f32 %v3115_v12, %v1208_v8 }
 0x44d   : > { %v1275_v14 = vpop.f32.mrf.mxu0  ;;  %v4089_v29 = vadd.f32 %v1304_v15, %v1208_v8 }
 0x44e   : > { %v4071_v16 = vadd.f32 %v1275_v14, %v1208_v8  ;;  %v3123_v18 = vpop.f32.mrf.mxu1 }
 0x44f   : > { %v3118_v17 = vpop.f32.mrf.mxu0  ;;  %v4097_v34 = vadd.f32 %v3123_v18, %v1208_v8 }
 0x450   : > { %1337 = vmax.xlane.f32.xlu1 %v4071_v16  ;;  %1339 = vmax.xlane.f32.xlu0 %v4068_v54  ;;  %v1307_v21 = vpop.f32.mrf.mxu1  ;;  %v4079_v25 = vadd.f32 %v3118_v17, %v1208_v8 }
 0x451   : > { %v1288_v20 = vpop.f32.mrf.mxu0  ;;  %v4095_v32 = vadd.f32 %v1307_v21, %v1208_v8 }
 0x452   : > { %v4077_v22 = vadd.f32 %v1288_v20, %v1208_v8  ;;  %v3126_v7 = vpop.f32.mrf.mxu1 }
 0x453   : > { %v3119_v23 = vpop.f32.mrf.mxu0  ;;  %v4103_v24 = vadd.f32 %v3126_v7, %v1208_v8 }
 0x454   : > { %1343 = vmax.xlane.f32.xlu1 %v4077_v22  ;;  %1341 = vmax.xlane.f32.xlu0 %v4073_v19  ;;  %v4085_v28 = vadd.f32 %v3119_v23, %v1208_v8  ;;  %v1320_v30 = vpop.f32.mrf.mxu1 }
 0x455   : > { %v1291_v26 = vpop.f32.mrf.mxu0  ;;  %v4101_v35 = vadd.f32 %v1320_v30, %v1208_v8 }
 0x456   : > { %v4083_v27 = vadd.f32 %v1291_v26, %v1208_v8  ;;  %v3127_v33 = vpop.f32.mrf.mxu1 }
 0x457   : > { %v4109_v38 = vadd.f32 %v3127_v33, %v1208_v8 }
 0x458   : > { %1347 = vmax.xlane.f32.xlu1 %v4079_v25  ;;  %1345 = vmax.xlane.f32.xlu0 %v4083_v27  ;;  %v1323_v36 = vpop.f32.mrf.mxu1 }
 0x459   : > { %v4107_v37 = vadd.f32 %v1323_v36, %v1208_v8 }
 0x45c   : > { %1351 = vmax.xlane.f32.xlu1 %v4089_v29  ;;  %1349 = vmax.xlane.f32.xlu0 %v4085_v28 }
 0x460   : > { %1355 = vmax.xlane.f32.xlu1 %v4091_v31  ;;  %1353 = vmax.xlane.f32.xlu0 %v4095_v32 }
 0x464   : > { %1359 = vmax.xlane.f32.xlu1 %v4101_v35  ;;  %1357 = vmax.xlane.f32.xlu0 %v4097_v34 }
 0x468   : > { %1363 = vmax.xlane.f32.xlu1 %v4103_v24  ;;  %1361 = vmax.xlane.f32.xlu0 %v4107_v37 }
 0x46c   : > { %1365 = vmax.xlane.f32.xlu0 %v4109_v38 }
 0x4bd   : > { %v3150_v40 = vpop.f32.mrf.mxu0 }
 0x4be   : > { %v4117_v47 = vadd.f32 %v3150_v40, %v1668_v41 }
 0x4bf   : > { %v1754_v42 = vpop.f32.mrf.mxu0 }
 0x4c0   : > { %v4114_v43 = vadd.f32 %v1754_v42, %v1668_v41 }
 0x4c1   : > { %v3151_v45 = vpop.f32.mrf.mxu0 }
 0x4c2   : > { %1817 = vmax.xlane.f32.xlu1 %v4114_v43  ;;  %v4123_v52 = vadd.f32 %v3151_v45, %v1668_v41 }
 0x4c3   : > { %v1757_v46 = vpop.f32.mrf.mxu0 }
 0x4c4   : > { %v4119_v49 = vadd.f32 %v1757_v46, %v1668_v41 }
 0x4c5   : > { %v3154_v50 = vpop.f32.mrf.mxu0 }
 0x4c6   : > { %1821 = vmax.xlane.f32.xlu1 %v4117_v47  ;;  %1819 = vmax.xlane.f32.xlu0 %v4119_v49  ;;  %v4129_v57 = vadd.f32 %v3154_v50, %v1668_v41 }
 0x4c7   : > { %v1770_v51 = vpop.f32.mrf.mxu0 }
 0x4c8   : > { %v4125_v53 = vadd.f32 %v1770_v51, %v1668_v41 }
 0x4c9   : > { %v3155_v55 = vpop.f32.mrf.mxu0 }
 0x4ca   : > { %1825 = vmax.xlane.f32.xlu1 %v4125_v53  ;;  %1823 = vmax.xlane.f32.xlu0 %v4123_v52  ;;  %v4135_v60 = vadd.f32 %v3155_v55, %v1668_v41 }
 0x4cb   : > { %v1773_v56 = vpop.f32.mrf.mxu0 }
 0x4cc   : > { %v4131_v48 = vadd.f32 %v1773_v56, %v1668_v41 }
 0x4cd   : > { %v3158_v58 = vpop.f32.mrf.mxu0 }
 0x4ce   : > { %1829 = vmax.xlane.f32.xlu1 %v4129_v57  ;;  %1827 = vmax.xlane.f32.xlu0 %v4131_v48  ;;  %v4141_v1 = vadd.f32 %v3158_v58, %v1668_v41 }
 0x4cf   : > { %v1786_v59 = vpop.f32.mrf.mxu0 }
 0x4d0   : > { %v4137_v61 = vadd.f32 %v1786_v59, %v1668_v41 }
 0x4d1   : > { %v3159_v63 = vpop.f32.mrf.mxu0 }
 0x4d2   : > { %1833 = vmax.xlane.f32.xlu1 %v4137_v61  ;;  %1831 = vmax.xlane.f32.xlu0 %v4135_v60  ;;  %v4148_v44 = vadd.f32 %v3159_v63, %v1668_v41 }
 0x4d3   : > { %v1789_v0 = vpop.f32.mrf.mxu0 }
 0x4d4   : > { %v4143_v62 = vadd.f32 %v1789_v0, %v1668_v41 }
 0x4d5   : > { %v3162_v2 = vpop.f32.mrf.mxu0  ;;  %v1336_v3 = vpop.xlane.xlu0 %1335 }
 0x4d6   : > { %v1367_v4 = vsub.f32 %v4066_v11, %v1336_v3  ;;  %1837 = vmax.xlane.f32.xlu1 %v4141_v1  ;;  %1835 = vmax.xlane.f32.xlu0 %v4143_v62  ;;  %v4156_v15 = vadd.f32 %v3162_v2, %v1668_v41 }
 0x4d7   : > { %v1802_v5 = vpop.f32.mrf.mxu0 }
 0x4d8   : > { %v1383_v6 = vmul.f32 1.442695, %v1367_v4  ;;  %v4150_v8 = vadd.f32 %v1802_v5, %v1668_v41 }
 0x4d9   : > { %v3163_v9 = vpop.f32.mrf.mxu0  ;;  %v1338_v10 = vpop.xlane.xlu1 %1337 }
 0x4da   : > { %3358 = vpow2.f32 %v1383_v6  ;;  %v1368_v12 = vsub.f32 %v4071_v16, %v1338_v10  ;;  %v1340_v13 = vpop.xlane.xlu0 %1339  ;;  %1841 = vmax.xlane.f32.xlu1 %v4150_v8  ;;  %1839 = vmax.xlane.f32.xlu0 %v4148_v44 }
 0x4db   : > { %v1369_v11 = vsub.f32 %v4068_v54, %v1340_v13  ;;  %v1805_v14 = vpop.f32.mrf.mxu0  ;;  %v4164_v54 = vadd.f32 %v3163_v9, %v1668_v41 }
 0x4dc   : > { %v1385_v17 = vmul.f32 1.442695, %v1368_v12  ;;  %v4158_v18 = vadd.f32 %v1805_v14, %v1668_v41 }
 0x4dd   : > { %v1387_v20 = vmul.f32 1.442695, %v1369_v11  ;;  %v1344_v21 = vpop.xlane.xlu1 %1343 }
 0x4de   : > { %3360 = vpow2.f32 %v1385_v17  ;;  %v1371_v23 = vsub.f32 %v4077_v22, %v1344_v21  ;;  %v1342_v26 = vpop.xlane.xlu0 %1341  ;;  %1845 = vmax.xlane.f32.xlu1 %v4156_v15  ;;  %1843 = vmax.xlane.f32.xlu0 %v4158_v18 }
 0x4df   : > { %3362 = vpow2.f32 %v1387_v20  ;;  %v1370_v16 = vsub.f32 %v4073_v19, %v1342_v26 }
 0x4e0   : > { %v1391_v7 = vmul.f32 1.442695, %v1371_v23 }
 0x4e1   : > { %v1389_v30 = vmul.f32 1.442695, %v1370_v16  ;;  %v1348_v33 = vpop.xlane.xlu1 %1347 }
 0x4e2   : > { %3364 = vpow2.f32 %v1391_v7  ;;  %v1373_v36 = vsub.f32 %v4079_v25, %v1348_v33  ;;  %v1346_v39 = vpop.xlane.xlu0 %1345  ;;  %1847 = vmax.xlane.f32.xlu0 %v4164_v54  ;;  %v1202_v33 = vld [vmem:[#allocation6] sm:$0xf] }
 0x4e3   : > { %3366 = vpow2.f32 %v1389_v30  ;;  %v1372_v22 = vsub.f32 %v4083_v27, %v1346_v39  ;;  %3128 = vmatprep.subr.bf16.mxu1 %v1202_v33  ;;  %v4226_v39 = vld [vmem:[#allocation6 + $0x4] sm:$0xf] }
 0x4e4   : > { %v1395_v40 = vmul.f32 1.442695, %v1373_v36  ;;  %3129 = vmatpush3.bf16.xpose.msra.mxu1 %v1202_v33 }
 0x4e5   : > { %v1393_v42 = vmul.f32 1.442695, %v1372_v22  ;;  %v1352_v45 = vpop.xlane.xlu1 %1351  ;;  %3164 = vmatprep.subr.bf16.mxu1 %v4226_v39 }
 0x4e6   : > { %3368 = vpow2.f32 %v1395_v40  ;;  %v1375_v19 = vsub.f32 %v4089_v29, %v1352_v45  ;;  %v1350_v41 = vpop.xlane.xlu0 %1349 }
 0x4e7   : > { %v4170_v46 = vpop.eup %3358  ;;  %3370 = vpow2.f32 %v1393_v42  ;;  %v1374_v50 = vsub.f32 %v4085_v28, %v1350_v41 }
 0x4e8   : > { %v1399_v51 = vmul.f32 1.442695, %v1375_v19  ;;  %1415 = vadd.xlane.f32.xlu1 %v4170_v46 }
 0x4e9   : > { %v1397_v25 = vmul.f32 1.442695, %v1374_v50  ;;  %v1356_v55 = vpop.xlane.xlu1 %1355 }
 0x4ea   : > { %3372 = vpow2.f32 %v1399_v51  ;;  %v1377_v27 = vsub.f32 %v4091_v31, %v1356_v55  ;;  %v1354_v56 = vpop.xlane.xlu0 %1353 }
 0x4eb   : > { %v4175_v58 = vpop.eup %3360  ;;  %3374 = vpow2.f32 %v1397_v25  ;;  %v1376_v29 = vsub.f32 %v4095_v32, %v1354_v56 }
 0x4ec   : > { %v4178_v59 = vpop.eup %3362  ;;  %v1403_v63 = vmul.f32 1.442695, %v1377_v27  ;;  %1417 = vadd.xlane.f32.xlu0 %v4175_v58 }
 0x4ed   : > { %v1401_v28 = vmul.f32 1.442695, %v1376_v29  ;;  %1419 = vadd.xlane.f32.xlu1 %v4178_v59  ;;  %v1360_v0 = vpop.xlane.xlu1 %1359 }
 0x4ee   : > { %3376 = vpow2.f32 %v1403_v63  ;;  %v1379_v2 = vsub.f32 %v4101_v35, %v1360_v0  ;;  %v1358_v3 = vpop.xlane.xlu0 %1357 }
 0x4ef   : > { %v4183_v31 = vpop.eup %3364  ;;  %3378 = vpow2.f32 %v1401_v28  ;;  %v1378_v4 = vsub.f32 %v4097_v34, %v1358_v3 }
 0x4f0   : > { %v4186_v5 = vpop.eup %3366  ;;  %v1407_v32 = vmul.f32 1.442695, %v1379_v2 }
 0x4f1   : > { %v1405_v6 = vmul.f32 1.442695, %v1378_v4  ;;  %1423 = vadd.xlane.f32.xlu1 %v4183_v31  ;;  %1421 = vadd.xlane.f32.xlu0 %v4186_v5  ;;  %v1364_v9 = vpop.xlane.xlu1 %1363 }
 0x4f2   : > { %3380 = vpow2.f32 %v1407_v32  ;;  %v1381_v10 = vsub.f32 %v4103_v24, %v1364_v9  ;;  %v1362_v12 = vpop.xlane.xlu0 %1361 }
 0x4f3   : > { %v4191_v35 = vpop.eup %3368  ;;  %3382 = vpow2.f32 %v1405_v6  ;;  %v1380_v13 = vsub.f32 %v4107_v37, %v1362_v12 }
 0x4f4   : > { %v4194_v11 = vpop.eup %3370  ;;  %v1411_v34 = vmul.f32 1.442695, %v1381_v10 }
 0x4f5   : > { %v1409_v14 = vmul.f32 1.442695, %v1380_v13  ;;  %1427 = vadd.xlane.f32.xlu1 %v4191_v35  ;;  %1425 = vadd.xlane.f32.xlu0 %v4194_v11 }
 0x4f6   : > { %3384 = vpow2.f32 %v1411_v34  ;;  %v1366_v17 = vpop.xlane.xlu0 %1365 }
 0x4f7   : > { %v4198_v20 = vpop.eup %3372  ;;  %3386 = vpow2.f32 %v1409_v14  ;;  %v1382_v24 = vsub.f32 %v4109_v38, %v1366_v17 }
 0x4f8   : > { %v4201_v21 = vpop.eup %3374 }
 0x4f9   : > { %v1413_v23 = vmul.f32 1.442695, %v1382_v24  ;;  %1431 = vadd.xlane.f32.xlu1 %v4198_v20  ;;  %1429 = vadd.xlane.f32.xlu0 %v4201_v21 }
 0x4fb   : > { %v4205_v37 = vpop.eup %3376  ;;  %3388 = vpow2.f32 %v1413_v23 }
 0x4fc   : > { %v4207_v26 = vpop.eup %3378 }
 0x4fd   : > { %1435 = vadd.xlane.f32.xlu1 %v4205_v37  ;;  %1433 = vadd.xlane.f32.xlu0 %v4207_v26 }
 0x4ff   : > { %v4211_v16 = vpop.eup %3380 }
 0x500   : > { %v4213_v7 = vpop.eup %3382 }
 0x501   : > { %1439 = vadd.xlane.f32.xlu1 %v4211_v16  ;;  %1437 = vadd.xlane.f32.xlu0 %v4213_v7 }
 0x503   : > { %v4217_v38 = vpop.eup %3384 }
 0x504   : > { %v4219_v30 = vpop.eup %3386 }
 0x505   : > { %1443 = vadd.xlane.f32.xlu1 %v4217_v38  ;;  %1441 = vadd.xlane.f32.xlu0 %v4219_v30 }
 0x508   : > { %v4223_v36 = vpop.eup %3388 }
 0x509   : > { %1445 = vadd.xlane.f32.xlu0 %v4223_v36 }
 0x54b   : > { %v1818_v22 = vpop.xlane.xlu1 %1817 }
 0x54c   : > { %v1849_v40 = vsub.f32 %v4114_v43, %v1818_v22 }
 0x54e   : > { %v1865_v42 = vmul.f32 1.442695, %v1849_v40 }
 0x54f   : > { %v1822_v45 = vpop.xlane.xlu1 %1821  ;;  %v1820_v19 = vpop.xlane.xlu0 %1819 }
 0x550   : > { %3390 = vpow2.f32 %v1865_v42  ;;  %v1851_v41 = vsub.f32 %v4117_v47, %v1822_v45  ;;  %v1850_v50 = vsub.f32 %v4119_v49, %v1820_v19 }
 0x552   : > { %v1869_v51 = vmul.f32 1.442695, %v1851_v41  ;;  %v1867_v25 = vmul.f32 1.442695, %v1850_v50 }
 0x553   : > { %v1826_v55 = vpop.xlane.xlu1 %1825  ;;  %v1824_v27 = vpop.xlane.xlu0 %1823 }
 0x554   : > { %3392 = vpow2.f32 %v1869_v51  ;;  %v1853_v56 = vsub.f32 %v4125_v53, %v1826_v55  ;;  %v1852_v29 = vsub.f32 %v4123_v52, %v1824_v27 }
 0x555   : > { %3394 = vpow2.f32 %v1867_v25 }
 0x556   : > { %v1873_v63 = vmul.f32 1.442695, %v1853_v56  ;;  %v1871_v43 = vmul.f32 1.442695, %v1852_v29 }
 0x557   : > { %v1830_v28 = vpop.xlane.xlu1 %1829  ;;  %v1828_v0 = vpop.xlane.xlu0 %1827 }
 0x558   : > { %3396 = vpow2.f32 %v1873_v63  ;;  %v1855_v2 = vsub.f32 %v4129_v57, %v1830_v28  ;;  %v1854_v47 = vsub.f32 %v4131_v48, %v1828_v0 }
 0x559   : > { %3398 = vpow2.f32 %v1871_v43 }
 0x55a   : > { %v1877_v49 = vmul.f32 1.442695, %v1855_v2  ;;  %v1875_v3 = vmul.f32 1.442695, %v1854_v47 }
 0x55b   : > { %v1834_v4 = vpop.xlane.xlu1 %1833  ;;  %v1832_v32 = vpop.xlane.xlu0 %1831 }
 0x55c   : > { %3400 = vpow2.f32 %v1877_v49  ;;  %v1857_v53 = vsub.f32 %v4137_v61, %v1834_v4  ;;  %v1856_v52 = vsub.f32 %v4135_v60, %v1832_v32 }
 0x55d   : > { %v4238_v6 = vpop.eup %3390  ;;  %3402 = vpow2.f32 %v1875_v3 }
 0x55e   : > { %v1881_v9 = vmul.f32 1.442695, %v1857_v53  ;;  %v1879_v10 = vmul.f32 1.442695, %v1856_v52  ;;  %1897 = vadd.xlane.f32.xlu1 %v4238_v6 }
 0x55f   : > { %v1838_v57 = vpop.xlane.xlu1 %1837  ;;  %v1836_v12 = vpop.xlane.xlu0 %1835 }
 0x560   : > { %3404 = vpow2.f32 %v1881_v9  ;;  %v1859_v48 = vsub.f32 %v4141_v1, %v1838_v57  ;;  %v1858_v13 = vsub.f32 %v4143_v62, %v1836_v12 }
 0x561   : > { %v4243_v34 = vpop.eup %3392  ;;  %3406 = vpow2.f32 %v1879_v10 }
 0x562   : > { %v4245_v61 = vpop.eup %3394  ;;  %v1885_v60 = vmul.f32 1.442695, %v1859_v48  ;;  %v1883_v14 = vmul.f32 1.442695, %v1858_v13  ;;  %1901 = vadd.xlane.f32.xlu1 %v4243_v34 }
 0x563   : > { %1899 = vadd.xlane.f32.xlu0 %v4245_v61  ;;  %v1842_v17 = vpop.xlane.xlu1 %1841  ;;  %v1840_v24 = vpop.xlane.xlu0 %1839 }
 0x564   : > { %3408 = vpow2.f32 %v1885_v60  ;;  %v1861_v23 = vsub.f32 %v4150_v8, %v1842_v17  ;;  %v1860_v1 = vsub.f32 %v4148_v44, %v1840_v24 }
 0x565   : > { %v4251_v33 = vpop.eup %3396  ;;  %3410 = vpow2.f32 %v1883_v14 }
 0x566   : > { %v4253_v62 = vpop.eup %3398  ;;  %v1889_v22 = vmul.f32 1.442695, %v1861_v23  ;;  %v1887_v40 = vmul.f32 1.442695, %v1860_v1  ;;  %1905 = vadd.xlane.f32.xlu1 %v4251_v33 }
 0x567   : > { %1903 = vadd.xlane.f32.xlu0 %v4253_v62  ;;  %v1846_v42 = vpop.xlane.xlu1 %1845  ;;  %v1844_v45 = vpop.xlane.xlu0 %1843 }
 0x568   : > { %3412 = vpow2.f32 %v1889_v22  ;;  %v1863_v19 = vsub.f32 %v4156_v15, %v1846_v42  ;;  %v1862_v8 = vsub.f32 %v4158_v18, %v1844_v45 }
 0x569   : > { %v4259_v41 = vpop.eup %3400  ;;  %3414 = vpow2.f32 %v1887_v40 }
 0x56a   : > { %v4261_v44 = vpop.eup %3402  ;;  %v1893_v50 = vmul.f32 1.442695, %v1863_v19  ;;  %v1891_v51 = vmul.f32 1.442695, %v1862_v8  ;;  %1909 = vadd.xlane.f32.xlu1 %v4259_v41 }
 0x56b   : > { %1907 = vadd.xlane.f32.xlu0 %v4261_v44  ;;  %v1848_v25 = vpop.xlane.xlu0 %1847 }
 0x56c   : > { %3416 = vpow2.f32 %v1893_v50  ;;  %v1864_v55 = vsub.f32 %v4164_v54, %v1848_v25 }
 0x56d   : > { %v4266_v27 = vpop.eup %3404  ;;  %3418 = vpow2.f32 %v1891_v51 }
 0x56e   : > { %v4268_v15 = vpop.eup %3406  ;;  %v1895_v18 = vmul.f32 1.442695, %v1864_v55  ;;  %1913 = vadd.xlane.f32.xlu1 %v4266_v27 }
 0x56f   : > { %1911 = vadd.xlane.f32.xlu0 %v4268_v15 }
 0x570   : > { %3420 = vpow2.f32 %v1895_v18 }
 0x571   : > { %v4272_v56 = vpop.eup %3408  ;;  %v1416_v29 = vpop.xlane.xlu1 %1415 }
 0x572   : > { %v4274_v63 = vpop.eup %3410  ;;  %1917 = vadd.xlane.f32.xlu1 %v4272_v56  ;;  %3422 = vrcp.f32 %v1416_v29 }
 0x573   : > { %1915 = vadd.xlane.f32.xlu0 %v4274_v63 }
 0x575   : > { %v4278_v54 = vpop.eup %3412  ;;  %v1418_v43 = vpop.xlane.xlu0 %1417 }
 0x576   : > { %v4280_v28 = vpop.eup %3414  ;;  %v1420_v0 = vpop.xlane.xlu1 %1419  ;;  %3424 = vrcp.f32 %v1418_v43  ;;  %1921 = vadd.xlane.f32.xlu1 %v4278_v54 }
 0x577   : > { %1919 = vadd.xlane.f32.xlu0 %v4280_v28  ;;  %3426 = vrcp.f32 %v1420_v0 }
 0x579   : > { %v4284_v2 = vpop.eup %3416 }
 0x57a   : > { %v4286_v47 = vpop.eup %3418  ;;  %v1424_v49 = vpop.xlane.xlu1 %1423  ;;  %1925 = vadd.xlane.f32.xlu1 %v4284_v2 }
 0x57b   : > { %v1422_v3 = vpop.xlane.xlu0 %1421  ;;  %1923 = vadd.xlane.f32.xlu0 %v4286_v47 }
 0x57c   : > { %3428 = vrcp.f32 %v1422_v3 }
 0x57d   : > { %v4290_v4 = vpop.eup %3420  ;;  %3430 = vrcp.f32 %v1424_v49 }
 0x57e   : > { %v1428_v32 = vpop.xlane.xlu1 %1427 }
 0x57f   : > { %v1426_v53 = vpop.xlane.xlu0 %1425  ;;  %1927 = vadd.xlane.f32.xlu0 %v4290_v4  ;;  %v3423_v52 = vpop.eup %3422 }
 0x580   : > { %3432 = vrcp.f32 %v1426_v53  ;;  %v1463_v12 = vmul.f32 %v3423_v52, %v4170_v46 }
 0x581   : > { %3434 = vrcp.f32 %v1428_v32 }
 0x582   : > { %v1432_v9 = vpop.xlane.xlu1 %1431 }
 0x583   : > { %v1430_v10 = vpop.xlane.xlu0 %1429  ;;  %v3425_v57 = vpop.eup %3424 }
 0x584   : > { %3436 = vrcp.f32 %v1430_v10  ;;  %v1464_v48 = vmul.f32 %v3425_v57, %v4175_v58  ;;  %v3427_v17 = vpop.eup %3426 }
 0x585   : > { %3438 = vrcp.f32 %v1432_v9  ;;  %v1465_v22 = vmul.f32 %v3427_v17, %v4178_v59 }
 0x586   : > { %v1436_v13 = vpop.xlane.xlu1 %1435  ;;  %v1479_v14 = vpack.c.bf16 %v1464_v48, %v1463_v12 }
 0x587   : > { %v1434_v60 = vpop.xlane.xlu0 %1433 }
 0x588   : > { %3440 = vrcp.f32 %v1434_v60  ;;  %3130 = vmatprep.mubr.bf16.mxu1 %v1479_v14 }
 0x589   : > { %v3429_v24 = vpop.eup %3428  ;;  %3442 = vrcp.f32 %v1436_v13 }
 0x58a   : > { %v1440_v23 = vpop.xlane.xlu1 %1439  ;;  %v1466_v40 = vmul.f32 %v3429_v24, %v4186_v5  ;;  %v3431_v42 = vpop.eup %3430 }
 0x58b   : > { %v1438_v1 = vpop.xlane.xlu0 %1437  ;;  %v1467_v8 = vmul.f32 %v3431_v42, %v4183_v31 }
 0x58c   : > { %3444 = vrcp.f32 %v1438_v1  ;;  %v1480_v46 = vpack.c.bf16 %v1466_v40, %v1465_v22 }
 0x58d   : > { %v3433_v45 = vpop.eup %3432  ;;  %3446 = vrcp.f32 %v1440_v23 }
 0x58e   : > { %3131 = vmatmul.mubr.bf16.vlgmr.msra.gmra.mxu1 %v1480_v46  ;;  %v1444_v58 = vpop.xlane.xlu1 %1443  ;;  %v1468_v50 = vmul.f32 %v3433_v45, %v4194_v11  ;;  %v3435_v51 = vpop.eup %3434 }
 0x58f   : > { %v1442_v19 = vpop.xlane.xlu0 %1441  ;;  %3165 = vmatpush3.bf16.xpose.msra.mxu1 %v4226_v39  ;;  %v1469_v55 = vmul.f32 %v3435_v51, %v4191_v35 }
 0x590   : > { %3448 = vrcp.f32 %v1442_v19  ;;  %v1481_v25 = vpack.c.bf16 %v1468_v50, %v1467_v8 }
 0x591   : > { %v3437_v59 = vpop.eup %3436  ;;  %3450 = vrcp.f32 %v1444_v58 }
 0x592   : > { %3134 = vmatprep.mubr.bf16.mxu1 %v1481_v25  ;;  %v1470_v18 = vmul.f32 %v3437_v59, %v4201_v21  ;;  %v3439_v29 = vpop.eup %3438 }
 0x593   : > { %v1446_v5 = vpop.xlane.xlu0 %1445  ;;  %v1471_v31 = vmul.f32 %v3439_v29, %v4198_v20 }
 0x594   : > { %3452 = vrcp.f32 %v1446_v5  ;;  %v1482_v43 = vpack.c.bf16 %v1470_v18, %v1469_v55 }
 0x595   : > { %v3441_v0 = vpop.eup %3440 }
 0x596   : > { %3135 = vmatmul.mubr.bf16.gmra.mxu1 %v1482_v43  ;;  %v1472_v11 = vmul.f32 %v3441_v0, %v4207_v26  ;;  %v3443_v39 = vpop.eup %3442 }
 0x597   : > { %v1473_v32 = vmul.f32 %v3443_v39, %v4205_v37 }
 0x598   : > { %v1483_v49 = vpack.c.bf16 %v1472_v11, %v1471_v31 }
 0x599   : > { %v3445_v3 = vpop.eup %3444 }
 0x59a   : > { %3138 = vmatprep.mubr.bf16.mxu1 %v1483_v49  ;;  %v1474_v53 = vmul.f32 %v3445_v3, %v4213_v7  ;;  %v3447_v35 = vpop.eup %3446 }
 0x59b   : > { %v1475_v10 = vmul.f32 %v3447_v35, %v4211_v16 }
 0x59c   : > { %v1484_v52 = vpack.c.bf16 %v1474_v53, %v1473_v32 }
 0x59d   : > { %v3449_v21 = vpop.eup %3448 }
 0x59e   : > { %v3451_v9 = vpop.eup %3450  ;;  %3139 = vmatmul.mubr.bf16.gmra.mxu1 %v1484_v52  ;;  %v1476_v57 = vmul.f32 %v3449_v21, %v4219_v30 }
 0x59f   : > { %v1477_v26 = vmul.f32 %v3451_v9, %v4217_v38 }
 0x5a0   : > { %v1485_v12 = vpack.c.bf16 %v1476_v57, %v1475_v10 }
 0x5a1   : > { %v3453_v20 = vpop.eup %3452 }
 0x5a2   : > { %v1478_v48 = vmul.f32 %v3453_v20, %v4223_v36  ;;  %3142 = vmatprep.mubr.bf16.mxu1 %v1485_v12 }
 0x5a4   : > { %v1486_v13 = vpack.c.bf16 %v1478_v48, %v1477_v26 }
 0x5a6   : > { %3143 = vmatmul.mubr.bf16.gmra.mxu1 %v1486_v13 }
 0x5e7   : > { %v1898_v37 = vpop.xlane.xlu1 %1897 }
 0x5e8   : > { %3454 = vrcp.f32 %v1898_v37 }
 0x5eb   : > { %v1902_v7 = vpop.xlane.xlu1 %1901 }
 0x5ec   : > { %v1900_v60 = vpop.xlane.xlu0 %1899 }
 0x5ed   : > { %3456 = vrcp.f32 %v1900_v60 }
 0x5ee   : > { %3458 = vrcp.f32 %v1902_v7 }
 0x5ef   : > { %v1906_v14 = vpop.xlane.xlu1 %1905 }
 0x5f0   : > { %v1904_v17 = vpop.xlane.xlu0 %1903 }
 0x5f1   : > { %3460 = vrcp.f32 %v1904_v17 }
 0x5f2   : > { %3462 = vrcp.f32 %v1906_v14 }
 0x5f3   : > { %v1910_v16 = vpop.xlane.xlu1 %1909 }
 0x5f4   : > { %v1908_v30 = vpop.xlane.xlu0 %1907 }
 0x5f5   : > { %3464 = vrcp.f32 %v1908_v30  ;;  %v3455_v24 = vpop.eup %3454 }
 0x5f6   : > { %3466 = vrcp.f32 %v1910_v16  ;;  %v1945_v22 = vmul.f32 %v3455_v24, %v4238_v6 }
 0x5f7   : > { %v1914_v38 = vpop.xlane.xlu1 %1913 }
 0x5f8   : > { %v1912_v36 = vpop.xlane.xlu0 %1911 }
 0x5f9   : > { %3468 = vrcp.f32 %v1912_v36 }
 0x5fa   : > { %v3457_v23 = vpop.eup %3456  ;;  %3470 = vrcp.f32 %v1914_v38 }
 0x5fb   : > { %v1918_v1 = vpop.xlane.xlu1 %1917  ;;  %v1946_v40 = vmul.f32 %v3457_v23, %v4245_v61  ;;  %v3459_v42 = vpop.eup %3458 }
 0x5fc   : > { %v1916_v46 = vpop.xlane.xlu0 %1915  ;;  %v1947_v8 = vmul.f32 %v3459_v42, %v4243_v34 }
 0x5fd   : > { %3472 = vrcp.f32 %v1916_v46  ;;  %v1961_v45 = vpack.c.bf16 %v1946_v40, %v1945_v22 }
 0x5fe   : > { %v3461_v58 = vpop.eup %3460  ;;  %3474 = vrcp.f32 %v1918_v1 }
 0x5ff   : > { %3166 = vmatprep.mubr.bf16.mxu1 %v1961_v45  ;;  %v1922_v19 = vpop.xlane.xlu1 %1921  ;;  %v1948_v50 = vmul.f32 %v3461_v58, %v4253_v62  ;;  %v3463_v51 = vpop.eup %3462 }
 0x600   : > { %v1920_v25 = vpop.xlane.xlu0 %1919  ;;  %v1949_v6 = vmul.f32 %v3463_v51, %v4251_v33 }
 0x601   : > { %3476 = vrcp.f32 %v1920_v25  ;;  %v1962_v59 = vpack.c.bf16 %v1948_v50, %v1947_v8  ;;  %v3349_v8 = vld [vmem:[%s4515_s8] sm:$0xff]  }
 0x602   : > { %v3465_v5 = vpop.eup %3464  ;;  %3478 = vrcp.f32 %v1922_v19  ;;  %3182 = vmatprep.subr.bf16.mxu0 %v3349_v8 }
 0x603   : > { %3167 = vmatmul.mubr.bf16.vlgmr.msra.gmra.mxu1 %v1962_v59  ;;  %v1950_v61 = vmul.f32 %v3465_v5, %v4261_v44  ;;  %v3467_v55 = vpop.eup %3466  ;;  %v1926_v18 = vpop.xlane.xlu1 %1925  ;;  %3183 = vmatpush3.bf16.msra.mxu0 %v3349_v8 }
 0x604   : > { %v1924_v29 = vpop.xlane.xlu0 %1923  ;;  %v1951_v34 = vmul.f32 %v3467_v55, %v4259_v41 }
 0x605   : > { %3480 = vrcp.f32 %v1924_v29  ;;  %v1963_v43 = vpack.c.bf16 %v1950_v61, %v1949_v6 }
 0x606   : > { %v3469_v0 = vpop.eup %3468  ;;  %3482 = vrcp.f32 %v1926_v18 }
 0x607   : > { %3170 = vmatprep.mubr.bf16.mxu1 %v1963_v43  ;;  %v1952_v62 = vmul.f32 %v3469_v0, %v4268_v15  ;;  %v3471_v31 = vpop.eup %3470 }
 0x608   : > { %v1928_v11 = vpop.xlane.xlu0 %1927  ;;  %v1953_v33 = vmul.f32 %v3471_v31, %v4266_v27 }
 0x609   : > { %3484 = vrcp.f32 %v1928_v11  ;;  %v1964_v39 = vpack.c.bf16 %v1952_v62, %v1951_v34 }
 0x60a   : > { %v3473_v49 = vpop.eup %3472 }
 0x60b   : > { %3171 = vmatmul.mubr.bf16.gmra.mxu1 %v1964_v39  ;;  %v1954_v44 = vmul.f32 %v3473_v49, %v4274_v63  ;;  %v3475_v3 = vpop.eup %3474 }
 0x60c   : > { %v1955_v35 = vmul.f32 %v3475_v3, %v4272_v56 }
 0x60d   : > { %v1965_v32 = vpack.c.bf16 %v1954_v44, %v1953_v33 }
 0x60e   : > { %v3477_v53 = vpop.eup %3476 }
 0x60f   : > { %3174 = vmatprep.mubr.bf16.mxu1 %v1965_v32  ;;  %v1956_v41 = vmul.f32 %v3477_v53, %v4280_v28  ;;  %v3479_v52 = vpop.eup %3478 }
 0x610   : > { %v1957_v9 = vmul.f32 %v3479_v52, %v4278_v54 }
 0x611   : > { %v1966_v15 = vpack.c.bf16 %v1956_v41, %v1955_v35 }
 0x612   : > { %v3481_v21 = vpop.eup %3480 }
 0x613   : > { %3175 = vmatmul.mubr.bf16.gmra.mxu1 %v1966_v15  ;;  %v1958_v10 = vmul.f32 %v3481_v21, %v4286_v47  ;;  %v3483_v57 = vpop.eup %3482 }
 0x614   : > { %v1959_v63 = vmul.f32 %v3483_v57, %v4284_v2 }
 0x615   : > { %v1967_v27 = vpack.c.bf16 %v1958_v10, %v1957_v9 }
 0x616   : > { %v3485_v20 = vpop.eup %3484 }
 0x617   : > { %3178 = vmatprep.mubr.bf16.mxu1 %v1967_v27  ;;  %v1960_v12 = vmul.f32 %v3485_v20, %v4290_v4 }
 0x619   : > { %v1968_v26 = vpack.c.bf16 %v1960_v12, %v1959_v63 }
 0x61b   : > { %3179 = vmatmul.mubr.bf16.gmra.mxu1 %v1968_v26 }
 0x64e   : > { %v3132_v56 = vpop.f32.mrf.mxu1 }
 0x64f   : > { %v2866_v28 = vpack.c.bf16 %v3132_v56, %v3132_v56 }
 0x650   : > { %v1521_v48 = vpop.f32.mrf.mxu1 }
 0x651   : > { %1651 = vst.msk [vmem:[#allocation8 + $0x8] sm:$0xf] %vm1648_vm12, %v2866_v28  ;;  %v2864_v13 = vpack.c.bf16 %v1521_v48, %v1521_v48 }
 0x652   : > { %v3133_v54 = vpop.f32.mrf.mxu1 }
 0x653   : > { %1649 = vst.msk [vmem:[#allocation8] sm:$0xf] %vm1648_vm12, %v2864_v13  ;;  %v2867_v47 = vpack.c.bf16 %v3133_v54, %v3133_v54 }
 0x654   : > { %v1524_v37 = vpop.f32.mrf.mxu1 }
 0x655   : > { %1652 = vst.msk [vmem:[#allocation8 + $0xc] sm:$0xf] %vm1648_vm12, %v2867_v47  ;;  %v2865_v7 = vpack.c.bf16 %v1524_v37, %v1524_v37 }
 0x656   : > { %v3136_v2 = vpop.f32.mrf.mxu1 }
 0x657   : > { %1650 = vst.msk [vmem:[#allocation8 + $0x4] sm:$0xf] %vm1648_vm12, %v2865_v7  ;;  %v2870_v4 = vpack.c.bf16 %v3136_v2, %v3136_v2 }
 0x658   : > { %v1537_v60 = vpop.f32.mrf.mxu1 }
 0x659   : > { %1655 = vst.msk [vmem:[#allocation8 + $0x18] sm:$0xf] %vm1648_vm12, %v2870_v4  ;;  %v2868_v14 = vpack.c.bf16 %v1537_v60, %v1537_v60 }
 0x65a   : > { %v3137_v17 = vpop.f32.mrf.mxu1 }
 0x65b   : > { %1653 = vst.msk [vmem:[#allocation8 + $0x10] sm:$0xf] %vm1648_vm12, %v2868_v14  ;;  %v2871_v16 = vpack.c.bf16 %v3137_v17, %v3137_v17 }
 0x65c   : > { %v1540_v30 = vpop.f32.mrf.mxu1 }
 0x65d   : > { %1656 = vst.msk [vmem:[#allocation8 + $0x1c] sm:$0xf] %vm1648_vm12, %v2871_v16  ;;  %v2869_v38 = vpack.c.bf16 %v1540_v30, %v1540_v30 }
 0x65e   : > { %v3140_v24 = vpop.f32.mrf.mxu1 }
 0x65f   : > { %1654 = vst.msk [vmem:[#allocation8 + $0x14] sm:$0xf] %vm1648_vm12, %v2869_v38  ;;  %v2874_v36 = vpack.c.bf16 %v3140_v24, %v3140_v24 }
 0x660   : > { %v1553_v23 = vpop.f32.mrf.mxu1 }
 0x661   : > { %1659 = vst.msk [vmem:[#allocation8 + $0x28] sm:$0xf] %vm1648_vm12, %v2874_v36  ;;  %v2872_v1 = vpack.c.bf16 %v1553_v23, %v1553_v23 }
 0x662   : > { %v3141_v22 = vpop.f32.mrf.mxu1 }
 0x663   : > { %1657 = vst.msk [vmem:[#allocation8 + $0x20] sm:$0xf] %vm1648_vm12, %v2872_v1  ;;  %v2875_v40 = vpack.c.bf16 %v3141_v22, %v3141_v22 }
 0x664   : > { %v1556_v42 = vpop.f32.mrf.mxu1 }
 0x665   : > { %1660 = vst.msk [vmem:[#allocation8 + $0x2c] sm:$0xf] %vm1648_vm12, %v2875_v40  ;;  %v2873_v46 = vpack.c.bf16 %v1556_v42, %v1556_v42 }
 0x666   : > { %v3144_v45 = vpop.f32.mrf.mxu1 }
 0x667   : > { %1658 = vst.msk [vmem:[#allocation8 + $0x24] sm:$0xf] %vm1648_vm12, %v2873_v46  ;;  %v2878_v58 = vpack.c.bf16 %v3144_v45, %v3144_v45 }
 0x668   : > { %v1569_v19 = vpop.f32.mrf.mxu1 }
 0x669   : > { %1663 = vst.msk [vmem:[#allocation8 + $0x38] sm:$0xf] %vm1648_vm12, %v2878_v58  ;;  %v2876_v50 = vpack.c.bf16 %v1569_v19, %v1569_v19 }
 0x66a   : > { %v3145_v51 = vpop.f32.mrf.mxu1 }
 0x66b   : > { %1661 = vst.msk [vmem:[#allocation8 + $0x30] sm:$0xf] %vm1648_vm12, %v2876_v50  ;;  %v2879_v25 = vpack.c.bf16 %v3145_v51, %v3145_v51 }
 0x66c   : > { %v1572_v59 = vpop.f32.mrf.mxu1 }
 0x66d   : > { %1664 = vst.msk [vmem:[#allocation8 + $0x3c] sm:$0xf] %vm1648_vm12, %v2879_v25  ;;  %v2877_v5 = vpack.c.bf16 %v1572_v59, %v1572_v59 }
 0x66f   : > { %1662 = vst.msk [vmem:[#allocation8 + $0x34] sm:$0xf] %vm1648_vm12, %v2877_v5 }
 0x6c3   : > { %v3168_v6 = vpop.f32.mrf.mxu1 }
 0x6c4   : > { %v2882_v43 = vpack.c.bf16 %v3168_v6, %v3168_v6 }
 0x6c5   : > { %v2003_v61 = vpop.f32.mrf.mxu1 }
 0x6c6   : > { %v2880_v55 = vpack.c.bf16 %v2003_v61, %v2003_v61 }
 0x6c7   : > { %v3169_v18 = vpop.f32.mrf.mxu1 }
 0x6c8   : > { %2114 = vrot.lane.b32.xlu1 %v2880_v55, %s3657_s10  ;;  %v2883_v31 = vpack.c.bf16 %v3169_v18, %v3169_v18 }
 0x6c9   : > { %v2006_v29 = vpop.f32.mrf.mxu1 }
 0x6ca   : > { %v2881_v0 = vpack.c.bf16 %v2006_v29, %v2006_v29 }
 0x6cb   : > { %v3172_v34 = vpop.f32.mrf.mxu1 }
 0x6cc   : > { %2118 = vrot.lane.b32.xlu1 %v2882_v43, %s3657_s10  ;;  %2116 = vrot.lane.b32.xlu0 %v2881_v0, %s3657_s10  ;;  %v2886_v33 = vpack.c.bf16 %v3172_v34, %v3172_v34 }
 0x6cd   : > { %v2019_v62 = vpop.f32.mrf.mxu1 }
 0x6ce   : > { %v2884_v11 = vpack.c.bf16 %v2019_v62, %v2019_v62 }
 0x6cf   : > { %v3173_v39 = vpop.f32.mrf.mxu1 }
 0x6d0   : > { %2120 = vrot.lane.b32.xlu1 %v2883_v31, %s3657_s10  ;;  %2122 = vrot.lane.b32.xlu0 %v2884_v11, %s3657_s10  ;;  %v2887_v53 = vpack.c.bf16 %v3173_v39, %v3173_v39 }
 0x6d1   : > { %v2022_v49 = vpop.f32.mrf.mxu1 }
 0x6d2   : > { %v2885_v44 = vpack.c.bf16 %v2022_v49, %v2022_v49 }
 0x6d3   : > { %v3176_v3 = vpop.f32.mrf.mxu1 }
 0x6d4   : > { %2126 = vrot.lane.b32.xlu0 %v2886_v33, %s3657_s10  ;;  %2124 = vrot.lane.b32.xlu1 %v2885_v44, %s3657_s10  ;;  %v2890_v15 = vpack.c.bf16 %v3176_v3, %v3176_v3 }
 0x6d5   : > { %v2035_v32 = vpop.f32.mrf.mxu1 }
 0x6d6   : > { %v2888_v35 = vpack.c.bf16 %v2035_v32, %v2035_v32 }
 0x6d7   : > { %v3177_v41 = vpop.f32.mrf.mxu1 }
 0x6d8   : > { %2128 = vrot.lane.b32.xlu1 %v2887_v53, %s3657_s10  ;;  %2130 = vrot.lane.b32.xlu0 %v2888_v35, %s3657_s10  ;;  %v2891_v57 = vpack.c.bf16 %v3177_v41, %v3177_v41 }
 0x6d9   : > { %v2038_v52 = vpop.f32.mrf.mxu1 }
 0x6da   : > { %v2889_v21 = vpack.c.bf16 %v2038_v52, %v2038_v52 }
 0x6db   : > { %v3180_v9 = vpop.f32.mrf.mxu1 }
 0x6dc   : > { %2134 = vrot.lane.b32.xlu0 %v2890_v15, %s3657_s10  ;;  %2132 = vrot.lane.b32.xlu1 %v2889_v21, %s3657_s10  ;;  %v2894_v12 = vpack.c.bf16 %v3180_v9, %v3180_v9 }
 0x6dd   : > { %v2051_v10 = vpop.f32.mrf.mxu1 }
 0x6de   : > { %v2892_v27 = vpack.c.bf16 %v2051_v10, %v2051_v10 }
 0x6df   : > { %v3181_v20 = vpop.f32.mrf.mxu1 }
 0x6e0   : > { %2136 = vrot.lane.b32.xlu1 %v2891_v57, %s3657_s10  ;;  %2138 = vrot.lane.b32.xlu0 %v2892_v27, %s3657_s10  ;;  %v2895_v56 = vpack.c.bf16 %v3181_v20, %v3181_v20 }
 0x6e1   : > { %v2054_v63 = vpop.f32.mrf.mxu1 }
 0x6e2   : > { %v2893_v26 = vpack.c.bf16 %v2054_v63, %v2054_v63 }
 0x6e4   : > { %2142 = vrot.lane.b32.xlu0 %v2894_v12, %s3657_s10  ;;  %2140 = vrot.lane.b32.xlu1 %v2893_v26, %s3657_s10 }
 0x6e8   : > { %2144 = vrot.lane.b32.xlu1 %v2895_v56, %s3657_s10 }
 0x73a   : > { %v2115_v28 = vpop.permute.xlu1 %2114 }
 0x73b   : > { %2163 = vst.msk [vmem:[#allocation8] sm:$0xf] %vm2162_vm13, %v2115_v28 }
 0x73e   : > { %v2119_v48 = vpop.permute.xlu1 %2118  ;;  %v2117_v13 = vpop.permute.xlu0 %2116 }
 0x73f   : > { %2165 = vst.msk [vmem:[#allocation8 + $0x8] sm:$0xf] %vm2162_vm13, %v2119_v48  ;;  %2164 = vst.msk [vmem:[#allocation8 + $0x4] sm:$0xf] %vm2162_vm13, %v2117_v13 }
 0x742   : > { %v2121_v54 = vpop.permute.xlu1 %2120  ;;  %v2123_v47 = vpop.permute.xlu0 %2122 }
 0x743   : > { %2166 = vst.msk [vmem:[#allocation8 + $0xc] sm:$0xf] %vm2162_vm13, %v2121_v54  ;;  %2167 = vst.msk [vmem:[#allocation8 + $0x10] sm:$0xf] %vm2162_vm13, %v2123_v47 }
 0x746   : > { %v2125_v37 = vpop.permute.xlu1 %2124  ;;  %v2127_v7 = vpop.permute.xlu0 %2126  ;;  %v3350_v2 = vld [vmem:[#allocation8] sm:$0xff]  }
 0x747   : > { %2168 = vst.msk [vmem:[#allocation8 + $0x14] sm:$0xf] %vm2162_vm13, %v2125_v37  ;;  %2169 = vst.msk [vmem:[#allocation8 + $0x18] sm:$0xf] %vm2162_vm13, %v2127_v7  ;;  %3184 = vmatprep.mubr.msk.bf16.mxu0 %vm2243_vm14, %v3350_v2 }
 0x74a   : > { %v2129_v4 = vpop.permute.xlu1 %2128  ;;  %v2131_v60 = vpop.permute.xlu0 %2130  ;;  %v3351_v14 = vld [vmem:[#allocation8 + $0x8] sm:$0xff]  }
 0x74b   : > { %2170 = vst.msk [vmem:[#allocation8 + $0x1c] sm:$0xf] %vm2162_vm13, %v2129_v4  ;;  %2171 = vst.msk [vmem:[#allocation8 + $0x20] sm:$0xf] %vm2162_vm13, %v2131_v60  ;;  %3185 = vmatmul.mubr.msk.bf16.vlgmr.msra.gmra.mxu0 %vm2243_vm14, %v3351_v14 }
 0x74e   : > { %v2133_v17 = vpop.permute.xlu1 %2132  ;;  %v2135_v16 = vpop.permute.xlu0 %2134  ;;  %v3352_v30 = vld [vmem:[#allocation8 + $0x10] sm:$0xff]  }
 0x74f   : > { %2172 = vst.msk [vmem:[#allocation8 + $0x24] sm:$0xf] %vm2162_vm13, %v2133_v17  ;;  %2173 = vst.msk [vmem:[#allocation8 + $0x28] sm:$0xf] %vm2162_vm13, %v2135_v16  ;;  %3188 = vmatprep.mubr.msk.bf16.mxu0 %vm2243_vm14, %v3352_v30 }
 0x752   : > { %v2137_v38 = vpop.permute.xlu1 %2136  ;;  %v2139_v24 = vpop.permute.xlu0 %2138  ;;  %v3353_v36 = vld [vmem:[#allocation8 + $0x18] sm:$0xff]  }
 0x753   : > { %2174 = vst.msk [vmem:[#allocation8 + $0x2c] sm:$0xf] %vm2162_vm13, %v2137_v38  ;;  %2175 = vst.msk [vmem:[#allocation8 + $0x30] sm:$0xf] %vm2162_vm13, %v2139_v24  ;;  %3189 = vmatmul.mubr.msk.bf16.gmra.mxu0 %vm2243_vm14, %v3353_v36 }
 0x756   : > { %v2141_v23 = vpop.permute.xlu1 %2140  ;;  %v2143_v1 = vpop.permute.xlu0 %2142  ;;  %v3354_v22 = vld [vmem:[#allocation8 + $0x20] sm:$0xff]  }
 0x757   : > { %2176 = vst.msk [vmem:[#allocation8 + $0x34] sm:$0xf] %vm2162_vm13, %v2141_v23  ;;  %2177 = vst.msk [vmem:[#allocation8 + $0x38] sm:$0xf] %vm2162_vm13, %v2143_v1  ;;  %3192 = vmatprep.mubr.msk.bf16.mxu0 %vm2243_vm14, %v3354_v22 }
 0x75a   : > { %v2145_v40 = vpop.permute.xlu1 %2144  ;;  %v3355_v42 = vld [vmem:[#allocation8 + $0x28] sm:$0xff]  }
 0x75b   : > { %2178 = vst.msk [vmem:[#allocation8 + $0x3c] sm:$0xf] %vm2162_vm13, %v2145_v40  ;;  %3193 = vmatmul.mubr.msk.bf16.gmra.mxu0 %vm2243_vm14, %v3355_v42 }
 0x75e   : > { %v3356_v46 = vld [vmem:[#allocation8 + $0x30] sm:$0xff]  }
 0x75f   : > { %3196 = vmatprep.mubr.msk.bf16.mxu0 %vm2243_vm14, %v3356_v46 }
 0x762   : > { %v3357_v45 = vld [vmem:[#allocation8 + $0x38] sm:$0xff]  }
 0x763   : > { %3197 = vmatmul.mubr.msk.bf16.gmra.mxu0 %vm2243_vm14, %v3357_v45 }
 0x80b   : > { %v3186_v58 = vpop.f32.mrf.mxu0 }
 0x80c   : > { %v2472_v55 = vmul.f32 %v3186_v58, %v3186_v58 }
 0x80d   : > { %v2302_v19 = vpop.f32.mrf.mxu0 }
 0x80e   : > { %v2470_v25 = vmul.f32 %v2302_v19, %v2302_v19 }
 0x80f   : > { %v3187_v8 = vpop.f32.mrf.mxu0 }
 0x810   : > { %v2962_v50 = vpack.c.bf16 %v3187_v8, %v3186_v58  ;;  %v2473_v0 = vmul.f32 %v3187_v8, %v3187_v8 }
 0x811   : > { %v2305_v51 = vpop.f32.mrf.mxu0 }
 0x812   : > { %3001 = vst [vmem:[%s3878_s14 + $0x8] sm:$0xff] %v2962_v50   ;;  %v2957_v59 = vpack.c.bf16 %v2305_v51, %v2302_v19  ;;  %v2446_v5 = vadd.f32 %v2305_v51, %v2302_v19  ;;  %v2471_v6 = vmul.f32 %v2305_v51, %v2305_v51 }
 0x813   : > { %v3190_v61 = vpop.f32.mrf.mxu0 }
 0x814   : > { %2958 = vst [vmem:[%s3878_s14] sm:$0xff] %v2957_v59   ;;  %v2447_v18 = vadd.f32 %v3186_v58, %v2446_v5  ;;  %v2486_v29 = vadd.f32 %v2471_v6, %v2470_v25  ;;  %v2476_v52 = vmul.f32 %v3190_v61, %v3190_v61 }
 0x815   : > { %v2318_v43 = vpop.f32.mrf.mxu0 }
 0x816   : > { %v2487_v34 = vadd.f32 %v2486_v29, %v2472_v55  ;;  %v2448_v62 = vadd.f32 %v3187_v8, %v2447_v18  ;;  %v2474_v39 = vmul.f32 %v2318_v43, %v2318_v43 }
 0x817   : > { %v3191_v31 = vpop.f32.mrf.mxu0 }
 0x818   : > { %v2449_v11 = vadd.f32 %v2448_v62, %v2318_v43  ;;  %v2488_v49 = vadd.f32 %v2487_v34, %v2473_v0  ;;  %v2972_v33 = vpack.c.bf16 %v3191_v31, %v3190_v61  ;;  %v2477_v10 = vmul.f32 %v3191_v31, %v3191_v31  ;;  %v2445_v34 = vld [vmem:[%s3880_s17] sm:$0x1] }
 0x819   : > { %v2321_v44 = vpop.f32.mrf.mxu0 }
 0x81a   : > { %v2489_v3 = vadd.f32 %v2488_v49, %v2474_v39  ;;  %3003 = vst [vmem:[%s3878_s14 + $0x18] sm:$0xff] %v2972_v33   ;;  %v2967_v32 = vpack.c.bf16 %v2321_v44, %v2318_v43  ;;  %v2450_v53 = vadd.f32 %v2449_v11, %v2321_v44  ;;  %v2475_v35 = vmul.f32 %v2321_v44, %v2321_v44  ;;  %v2469_v11 = vld [vmem:[%s3880_s17 + $0x1] sm:$0x1] }
 0x81b   : > { %v3194_v41 = vpop.f32.mrf.mxu0 }
 0x81c   : > { %3002 = vst [vmem:[%s3878_s14 + $0x10] sm:$0xff] %v2967_v32   ;;  %v2451_v15 = vadd.f32 %v3190_v61, %v2450_v53  ;;  %v2490_v21 = vadd.f32 %v2489_v3, %v2475_v35  ;;  %v2480_v7 = vmul.f32 %v3194_v41, %v3194_v41 }
 0x81d   : > { %v2334_v9 = vpop.f32.mrf.mxu0 }
 0x81e   : > { %v2491_v57 = vadd.f32 %v2490_v21, %v2476_v52  ;;  %v2452_v27 = vadd.f32 %v3191_v31, %v2451_v15  ;;  %v2478_v12 = vmul.f32 %v2334_v9, %v2334_v9 }
 0x81f   : > { %v3195_v20 = vpop.f32.mrf.mxu0 }
 0x820   : > { %v2453_v63 = vadd.f32 %v2452_v27, %v2334_v9  ;;  %v2492_v26 = vadd.f32 %v2491_v57, %v2477_v10  ;;  %v2982_v56 = vpack.c.bf16 %v3195_v20, %v3194_v41  ;;  %v2481_v14 = vmul.f32 %v3195_v20, %v3195_v20 }
 0x821   : > { %v2337_v28 = vpop.f32.mrf.mxu0 }
 0x822   : > { %v2493_v48 = vadd.f32 %v2492_v26, %v2478_v12  ;;  %3005 = vst [vmem:[%s3878_s14 + $0x28] sm:$0xff] %v2982_v56   ;;  %v2977_v13 = vpack.c.bf16 %v2337_v28, %v2334_v9  ;;  %v2454_v54 = vadd.f32 %v2453_v63, %v2337_v28  ;;  %v2479_v47 = vmul.f32 %v2337_v28, %v2337_v28 }
 0x823   : > { %v3198_v37 = vpop.f32.mrf.mxu0 }
 0x824   : > { %3004 = vst [vmem:[%s3878_s14 + $0x20] sm:$0xff] %v2977_v13   ;;  %v2455_v2 = vadd.f32 %v3194_v41, %v2454_v54  ;;  %v2494_v4 = vadd.f32 %v2493_v48, %v2479_v47  ;;  %v2484_v45 = vmul.f32 %v3198_v37, %v3198_v37 }
 0x825   : > { %v2350_v60 = vpop.f32.mrf.mxu0 }
 0x826   : > { %v2495_v17 = vadd.f32 %v2494_v4, %v2480_v7  ;;  %v2456_v16 = vadd.f32 %v3195_v20, %v2455_v2  ;;  %v2482_v24 = vmul.f32 %v2350_v60, %v2350_v60 }
 0x827   : > { %v3199_v30 = vpop.f32.mrf.mxu0 }
 0x828   : > { %v2457_v38 = vadd.f32 %v2456_v16, %v2350_v60  ;;  %v2496_v36 = vadd.f32 %v2495_v17, %v2481_v14  ;;  %v2992_v23 = vpack.c.bf16 %v3199_v30, %v3198_v37  ;;  %v2485_v8 = vmul.f32 %v3199_v30, %v3199_v30 }
 0x829   : > { %v2353_v1 = vpop.f32.mrf.mxu0 }
 0x82a   : > { %v2497_v22 = vadd.f32 %v2496_v36, %v2482_v24  ;;  %3007 = vst [vmem:[%s3878_s14 + $0x38] sm:$0xff] %v2992_v23   ;;  %v2987_v40 = vpack.c.bf16 %v2353_v1, %v2350_v60  ;;  %v2458_v42 = vadd.f32 %v2457_v38, %v2353_v1  ;;  %v2483_v46 = vmul.f32 %v2353_v1, %v2353_v1 }
 0x82c   : > { %3006 = vst [vmem:[%s3878_s14 + $0x30] sm:$0xff] %v2987_v40   ;;  %v2459_v58 = vadd.f32 %v3198_v37, %v2458_v42  ;;  %v2498_v19 = vadd.f32 %v2497_v22, %v2483_v46 }
 0x82e   : > { %v2460_v50 = vadd.f32 %v3199_v30, %v2459_v58  ;;  %v2499_v51 = vadd.f32 %v2498_v19, %v2484_v45 }
 0x830   : > { %v2461_v25 = vrot.slane %v2460_v50, 4  ;;  %v2500_v59 = vadd.f32 %v2499_v51, %v2485_v8 }
 0x832   : > { %v2462_v5 = vadd.f32 %v2461_v25, %v2460_v50  ;;  %v2501_v6 = vrot.slane %v2500_v59, 4 }
 0x834   : > { %v2463_v61 = vrot.slane %v2462_v5, 2  ;;  %v2502_v55 = vadd.f32 %v2501_v6, %v2500_v59 }
 0x836   : > { %v2464_v18 = vadd.f32 %v2463_v61, %v2462_v5  ;;  %v2503_v29 = vrot.slane %v2502_v55, 2 }
 0x838   : > { %v2465_v43 = vrot.slane %v2464_v18, 1  ;;  %v2504_v0 = vadd.f32 %v2503_v29, %v2502_v55 }
 0x83a   : > { %v2466_v62 = vadd.f32 %v2465_v43, %v2464_v18  ;;  %v2505_v31 = vrot.slane %v2504_v0, 1 }
 0x83c   : > { %v2467_v39 = vadd.f32 %v2466_v62, %v2445_v34  ;;  %v2506_v49 = vadd.f32 %v2505_v31, %v2504_v0 }
 0x83e   : > { %2468 = vst [vmem:[%s3880_s17] sm:$0x1] %v2467_v39  ;;  %v2507_v33 = vadd.f32 %v2506_v49, %v2469_v11 }
 0x840   : > { %2508 = vst [vmem:[%s3880_s17 + $0x1] sm:$0x1] %v2507_v33 }
 0x841 PF: > { %s4573_s23 = sld [smem:[#allocation20_spill]]  ;;  %s2522_s27 = smul.u32 %s3624_s19, %s3628_s20 }
 0x842   : > { %s2838_s29 = sshll.u32 %s3632_s21, 5  ;;  %s2531_s12 = sshll.u32 %s3878_s14, 4  ;;  %s4401_s12 = int_to_ptr.vmem [resolvable:$true] %s2531_s12 }
 0x843   : > { %s2837_s16 = sshll.u32 %s2522_s27, 4  ;;  %s4575_s15 = sld [smem:[#allocation37_spill]] }
 0x844   : > { %s2528_s18 = sadd.s32 %s2838_s29, %s2837_s16  ;;  %s3486_s19 = scalar_lea.vmem %s4401_s12, 1024 }
 0x845   : > { %s2839_s13 = sshll.u32 %s2528_s18, 6  ;;  %p3487_p2 = scmp.ne.s32.totalorder %s4401_s12, %s3486_s19 }
 0x846   : > { %s3658_s14 = smov [#allocation10]  }
 0x847   : > { %s4577_s11 = sand.u32 1, %s4573_s23   ;;  %p3488_p4 = pnand %p3487_p2, %p3803_p5 }
 0x848   : > { %s4412_s26 = scalar_lea.sflag [#allocation11], %s4577_s11  ;;  %s3490_s20 = sshll.u32 %s3658_s14, 4  ;;  %s3491_s20 = int_to_ptr.vmem [resolvable:$false] %s3490_s20 }
 0x849   : > { %s4576_s30 = smov %s4575_s15  ;;  %s4408_s25 = scalar_lea.hbm %s4575_s15, %s2839_s13 }
 0x84a   : > { %p3489_p6 = pneg %p3488_p4  ;;  %s3492_s9 = scalar_lea.vmem %s3491_s20, 2048 }
 0x84b   : > { %p3493_p8 = scmp.lt.s32.totalorder %s4401_s12, %s3491_s20  ;;  %p3494_p9 = scmp.lt.s32.totalorder %s3492_s9, %s3486_s19 }
 0x84d   : > { %p3495_p11 = por %p3494_p9, %p3493_p8 }
 0x84f   : > { %p3496_p12 = pnand %p3495_p11, %p3489_p6 }
 0x851   : > { %3499 = shalt.err (!%p3496_p12)
}
 0x852   : > { %s3500_s10 = scalar_lea.hbm %s4408_s25, 1024  ;;  %s3504_s16 = scalar_lea.hbm %s4576_s30, 4096 }
 0x853   : > { %p3501_p13 = scmp.ne.s32.totalorder %s4408_s25, %s3500_s10  ;;  %p3505_p2 = scmp.lt.s32.totalorder %s4408_s25, %s4576_s30 }
 0x854   : > { %p3506_p4 = scmp.lt.s32.totalorder %s3504_s16, %s3500_s10 }
 0x855   : > { %p3502_p0 = pnand %p3501_p13, %p3803_p5 }
 0x856   : > { %p3507_p6 = por %p3506_p4, %p3505_p2 }
 0x857   : > { %p3503_p3 = pneg %p3502_p0 }
 0x859   : > { %p3508_p8 = pnand %p3507_p6, %p3503_p3 }
 0x85b   : > { %3511 = shalt.err (!%p3508_p8)
}
 0x85c   : > { %s3659_s22 = smov 64   ;;  %s4578_s24 = sld [smem:[#allocation17_spill]] }
 0x85d   : > { %s3660_s11 = smov 4   ;;  %s4580_s20 = sld [smem:[#allocation38_spill]] }
 0x85e   : > { %3207 = dma.vmem_to_hbm [thread:$0]  (%p3803_p5), %s4401_s12, 1024, %s4408_s25, %s4412_s26, %s3659_s22, %s3659_s22, %s3660_s11  }
 0x85f   : > { %s2547_s23 = sshll.u32 %s3880_s17, 4  ;;  %s3661_s13 = smov [#allocation12]   ;;  %s2548_s23 = int_to_ptr.vmem [resolvable:$true] %s2547_s23 }
 0x860   : > { %s3512_s18 = scalar_lea.vmem %s2548_s23, 32  ;;  %s3516_s0 = sshll.u32 %s3661_s13, 4  ;;  %s3517_s0 = int_to_ptr.vmem [resolvable:$false] %s3516_s0 }
 0x861   : > { %p3513_p9 = scmp.ne.s32.totalorder %s2548_s23, %s3512_s18  ;;  %s3518_s1 = scalar_lea.vmem %s3517_s0, 64 }
 0x862   : > { %s4582_s27 = sand.u32 1, %s4578_s24   ;;  %p3519_p13 = scmp.lt.s32.totalorder %s2548_s23, %s3517_s0 }
 0x863   : > { %s4581_s9 = smov %s4580_s20  ;;  %s2545_s10 = scalar_lea.hbm %s4580_s20, %s2838_s29 }
 0x864   : > { %s2515_s16 = scalar_lea.sflag [#allocation13], %s4582_s27  ;;  %p3514_p11 = pnand %p3513_p9, %p3829_p10 }
 0x865   : > { %p3520_p5 = scmp.lt.s32.totalorder %s3518_s1, %s3512_s18 }
 0x866   : > { %p3515_p12 = pneg %p3514_p11 }
 0x867   : > { %p3521_p0 = por %p3520_p5, %p3519_p13 }
 0x869   : > { %p3522_p3 = pnand %p3521_p0, %p3515_p12 }
 0x86b   : > { %3525 = shalt.err (!%p3522_p3)
}
 0x86c   : > { %s3526_s21 = scalar_lea.hbm %s2545_s10, 32  ;;  %s3530_s29 = scalar_lea.hbm %s4581_s9, 64 }
 0x86d   : > { %p3527_p2 = scmp.ne.s32.totalorder %s2545_s10, %s3526_s21  ;;  %p3531_p8 = scmp.lt.s32.totalorder %s2545_s10, %s4581_s9 }
 0x86e   : > { %p3532_p9 = scmp.lt.s32.totalorder %s3530_s29, %s3526_s21 }
 0x86f   : > { %p3528_p4 = pnand %p3527_p2, %p3829_p10 }
 0x870   : > { %p3533_p11 = por %p3532_p9, %p3531_p8 }
 0x871   : > { %p3529_p6 = pneg %p3528_p4 }
 0x873   : > { %p3534_p1 = pnand %p3533_p11, %p3529_p6 }
 0x875   : > { %3537 = shalt.err (!%p3534_p1)
}
 0x876   : > { %3208 = dma.vmem_to_hbm [thread:$0]  (%p3829_p10), %s2548_s23, 32, %s2545_s10, %s2515_s16  }
 0x877 PF: > { %s4583_s0 = sld [smem:[#allocation25_spill]] }
 0x878   : > { %s4584_s1 = sld [smem:[#allocation19_spill]] }
 0x87d   : > { %p3218_p12 = scmp.ge.s32.totalorder %s4583_s0, 2 }
 0x87e   : > { %s2559_s22 = sand.u32 1, %s4584_s1  }
 0x87f   : > { %p3212_p13 = pnand %p3218_p12, %p3818_p7  ;;  %s2560_s24 = scalar_lea.sflag [#allocation11], %s2559_s22 }
 0x881   : > { %p3213_p5 = pneg %p3212_p13 }
 0x883   : > { %3591 = dma.done.wait (%p3213_p5), %s2560_s24, 1024  }
 0x884   : > { %3593 = vsyncadd (%p3213_p5), %s2560_s24, 4294966272  ;;  %s4586_s11 = sld [smem:[#allocation16_spill]] }
 0x885   : > { %s4587_s19 = sld [smem:[#allocation32_spill]] }
 0x88a   : > { %s2568_s14 = sand.u32 1, %s4586_s11  }
 0x88b   : > { %p4588_p0 = scmp.ne.s32.totalorder %s4587_s19, 0  ;;  %s2569_s15 = scalar_lea.sflag [#allocation13], %s2568_s14 }
 0x88d   : > { %p3215_p1 = pnand %p3218_p12, %p4588_p0 }
 0x88f   : > { %p3216_p3 = pneg %p3215_p1 }
 0x891   : > { %3595 = dma.done.wait (%p3216_p3), %s2569_s15, 32  }
 0x892   : > { %3597 = vsyncadd (%p3216_p3), %s2569_s15, 4294967264  ;;  %s27_s25 = sadd.s32 1, %s4583_s0   ;;  %s4590_s13 = sld [smem:[#allocation17_spill]] }
 0x893   : > { %p4463_p10 = scmp.ge.s32.totalorder %s27_s25, 10   ;;  %s4591_s14 = sld [smem:[#allocation18_spill]] }
 0x894   : > { %s4592_s15 = sld [smem:[#allocation33_spill]] }
 0x895   : > { %s4593_s16 = sld [smem:[#allocation20_spill]] }
 0x896   : > { %s4594_s17 = sld [smem:[#allocation21_spill]] }
 0x897   : > { %s4595_s18 = sld [smem:[#allocation34_spill]] }
 0x898   : > { %s4596_s19 = sld [smem:[#allocation22_spill]] }
 0x899   : > { %s4597_s10 = sld [smem:[#allocation23_spill]] }
 0x89a   : > { %s4598_s21 = sld [smem:[#allocation24_spill]] }
 0x89b   : > { %s4599_s22 = sld [smem:[#allocation26_spill]]  ;;  %26 = sbr.rel (!%p4463_p10) target bundleno = 15 (0xf), region = 132 }
 0x89c   : > { %s4600_s23 = sld [smem:[#allocation28_spill]] }
 0x89d   : > { %s4601_s24 = sld [smem:[#allocation30_spill]] }
 0x89f   : > { %s4603_s20 = smov %s4597_s10 }
 0x8a0   :  { %2574 = vsyncpa [#allocation11], 1 }
 0x8a1   :  { %2576 = vsyncpa [#allocation11 + $0x1], 1 }
 0x8a2   :  { %2577 = vsyncpa [#allocation13], 1 }
 0x8a3   :  { %2579 = vsyncpa [#allocation13 + $0x1], 1 }

</bundles_post_ra>
